<compile_context>
chip_gen: v5e
topology: v5e:2x2
jax: 0.10.0
libtpu: 0.0.40
codegen_flags: <defaults>
</compile_context>

<pallas_src>
import math

import jax
import jax.numpy as jnp
from jax import lax
from jax.experimental import pallas as pl
from jax.experimental.pallas import tpu as pltpu


_VMEM_LIMIT = 48 * 1024 * 1024  # headroom below v7x's 64 MiB, above v5e/v6e scoped defaults


def _round_up(x, m):
    return ((x + m - 1) // m) * m


# ----------------------------------------------------------------------------
# Pallas kernel 1: tiled matmul (bf16 operands -> f32 accumulation) for the
# im2col 3x3x3 qkv Conv3d.
# ----------------------------------------------------------------------------
def _matmul_kernel(a_ref, b_ref, o_ref, acc_ref):
    @pl.when(pl.program_id(2) == 0)
    def _init():
        acc_ref[...] = jnp.zeros_like(acc_ref)

    acc_ref[...] += jnp.dot(a_ref[...], b_ref[...],
                            preferred_element_type=jnp.float32)

    @pl.when(pl.program_id(2) == pl.num_programs(2) - 1)
    def _store():
        o_ref[...] = acc_ref[...].astype(o_ref.dtype)


def pallas_matmul(a, b, tm=256, tn=256, tk=512):
    """a: (M, K) bf16, b: (K, N) bf16 -> (M, N) f32 via a tiled, pipelined MXU matmul."""
    M, K = a.shape
    K2, N = b.shape
    assert K == K2
    tm = min(tm, _round_up(M, 8))
    tn = min(tn, _round_up(N, 128))
    tk = min(tk, _round_up(K, 128))
    Mp, Kp, Np = _round_up(M, tm), _round_up(K, tk), _round_up(N, tn)
    a_p = jnp.pad(a, ((0, Mp - M), (0, Kp - K)))
    b_p = jnp.pad(b, ((0, Kp - K), (0, Np - N)))

    out = pl.pallas_call(
        _matmul_kernel,
        out_shape=jax.ShapeDtypeStruct((Mp, Np), jnp.float32),
        grid=(Mp // tm, Np // tn, Kp // tk),
        in_specs=[pl.BlockSpec((tm, tk), lambda i, j, k: (i, k)),
                  pl.BlockSpec((tk, tn), lambda i, j, k: (k, j))],
        out_specs=pl.BlockSpec((tm, tn), lambda i, j, k: (i, j)),
        scratch_shapes=[pltpu.VMEM((tm, tn), jnp.float32)],
        compiler_params=pltpu.CompilerParams(
            dimension_semantics=("parallel", "parallel", "arbitrary"),
            vmem_limit_bytes=_VMEM_LIMIT),
    )(a_p, b_p)
    return out[:M, :N]


# ----------------------------------------------------------------------------
# Pallas kernel 2: attention core, one grid step per (batch, head), all Z
# slices processed in-block.  Layouts are lane-dense (last dim = N = H*W):
#   q_ref : (1, 1, Z, N, Dh)
#   kt_ref: (1, 1, Z, Dh, N)   (k already transposed, like torch)
#   vt_ref: (1, 1, Z, Dh, N)
#   w_ref : (1, N, N)          precomputed exp(-factor*dis)/rowsum (hoisted out)
#   o_ref : (1, 1, Z, Dh, N)
# ----------------------------------------------------------------------------
def _attn_kernel(q_ref, kt_ref, vt_ref, w_ref, o_ref):
    eps2 = 1e-24  # (1e-12)^2 so that rsqrt(max(|x|^2, eps^2)) == 1/max(|x|, eps)
    q = q_ref[0, 0]    # (Z, N, Dh)
    kt = kt_ref[0, 0]  # (Z, Dh, N)
    vt = vt_ref[0, 0]  # (Z, Dh, N)
    w = w_ref[0]       # (N, N)

    # torch F.normalize(x, dim) == x * rsqrt(max(sum(x^2, dim), eps^2))
    qn = q * lax.rsqrt(jnp.maximum(jnp.sum(q * q, axis=-1, keepdims=True), eps2))   # over Dh
    kn = kt * lax.rsqrt(jnp.maximum(jnp.sum(kt * kt, axis=-1, keepdims=True), eps2))  # over N
    vn = vt * lax.rsqrt(jnp.maximum(jnp.sum(vt * vt, axis=1, keepdims=True), eps2))   # over Dh

    # (Z, N, N) = batched (N, Dh) @ (Dh, N); bf16 MXU operands, f32 accumulation.
    attn = jnp.einsum('znd,zdm->znm',
                      qn.astype(jnp.bfloat16), kn.astype(jnp.bfloat16),
                      preferred_element_type=jnp.float32)
    attn = attn * w[None, :, :]
    # TODO(synk): attn_drop (Dropout) is identity at inference; not applied.

    # out[z, d, n] = sum_m vn[z, d, m] * attn[z, n, m]   -> lane-dense (Dh, N) output.
    out = jnp.einsum('zdm,znm->zdn',
                     vn.astype(jnp.bfloat16), attn.astype(jnp.bfloat16),
                     preferred_element_type=jnp.float32)
    o_ref[0, 0] = out.astype(o_ref.dtype)


def pallas_attention(qh, kt, vt, wgt):
    B, G, Z, N, Dh = qh.shape
    return pl.pallas_call(
        _attn_kernel,
        out_shape=jax.ShapeDtypeStruct((B, G, Z, Dh, N), jnp.float32),
        grid=(B, G),
        in_specs=[
            pl.BlockSpec((1, 1, Z, N, Dh), lambda b, g: (b, g, 0, 0, 0)),
            pl.BlockSpec((1, 1, Z, Dh, N), lambda b, g: (b, g, 0, 0, 0)),
            pl.BlockSpec((1, 1, Z, Dh, N), lambda b, g: (b, g, 0, 0, 0)),
            pl.BlockSpec((1, N, N), lambda b, g: (g, 0, 0)),
        ],
        out_specs=pl.BlockSpec((1, 1, Z, Dh, N), lambda b, g: (b, g, 0, 0, 0)),
        compiler_params=pltpu.CompilerParams(
            dimension_semantics=("parallel", "parallel"),
            vmem_limit_bytes=_VMEM_LIMIT),
    )(qh, kt, vt, wgt)


# ----------------------------------------------------------------------------
# Glue (plain JAX): im2col (bf16), rearranges, dis-softmax precompute.
# ----------------------------------------------------------------------------
def conv3d_qkv(x, w):
    """3x3x3 Conv3d, padding=1, stride=1, bias=False. Returns channels-last (B,Z,H,W,Co)."""
    B, C, Z, H, W = x.shape
    Co = w.shape[0]
    xb = x.astype(jnp.bfloat16)                                     # halve im2col HBM traffic
    xp = jnp.pad(xb, ((0, 0), (0, 0), (1, 1), (1, 1), (1, 1)))
    pats = []
    for dz in range(3):
        for dh in range(3):
            for dw in range(3):
                pats.append(xp[:, :, dz:dz + Z, dh:dh + H, dw:dw + W])
    pats = jnp.stack(pats, axis=0)                                  # (27,B,C,Z,H,W) bf16
    pats = jnp.transpose(pats, (1, 3, 4, 5, 2, 0)).reshape(B * Z * H * W, C * 27)
    w_flat = w.reshape(Co, C * 27).astype(jnp.bfloat16)             # (c,dz,dh,dw) flattened
    out = pallas_matmul(pats, w_flat.T)                             # (B*Z*H*W, Co) f32
    return out.reshape(B, Z, H, W, Co)


def relative_pos_dis(height, width):
    ch = jnp.arange(height)
    cw = jnp.arange(width)
    coords = jnp.stack(jnp.meshgrid(ch, cw, indexing="ij"))         # (2, H, W)
    cf = coords.reshape(2, -1)                                      # (2, HW)
    rel = cf[:, :, None] - cf[:, None, :]                           # (2, HW, HW)
    dis = (rel[0].astype(jnp.float32) / height) ** 2 + \
          (rel[1].astype(jnp.float32) / width) ** 2
    return dis                                                      # (HW, HW)


def attention_forward(x, conv_w, headsita, num_heads):
    B, C, Z, H, W = x.shape
    G = num_heads
    Dh = C // G
    N = H * W

    y = conv3d_qkv(x, conv_w)                                       # (B, Z, H, W, 3C)
    y = y.reshape(B, Z, H, W, 3, G, Dh)
    q = y[..., 0, :, :]                                             # (B, Z, H, W, G, Dh)
    k = y[..., 1, :, :]
    v = y[..., 2, :, :]

    # 'b (g d) z h w -> b g z (h w) d'  (q), and k/v transposed so N is the lane dim.
    qh = jnp.transpose(q, (0, 4, 1, 2, 3, 5)).reshape(B, G, Z, N, Dh)
    kt = jnp.transpose(k, (0, 4, 1, 5, 2, 3)).reshape(B, G, Z, Dh, N)
    vt = jnp.transpose(v, (0, 4, 1, 5, 2, 3)).reshape(B, G, Z, Dh, N)

    # Hoist the dis "softmax" out of the kernel: it only depends on (head, N, N).
    dis = relative_pos_dis(H, W)                                    # (N, N)
    factor = 1.0 / (2.0 * (jax.nn.sigmoid(headsita) * (0.4 - 0.003) + 0.003) ** 2)
    wgt = jnp.exp(-(factor[:, None, None] * dis[None]))             # (G, N, N)
    wgt = wgt / jnp.sum(wgt, axis=-1, keepdims=True)

    out = pallas_attention(qh, kt, vt, wgt.astype(jnp.float32))     # (B, G, Z, Dh, N)

    t = math.ceil(N ** 0.5)                                         # 'b g z d (h w) -> b (g d) z h w'
    out = out.reshape(B, G, Z, Dh, t, t)
    return jnp.transpose(out, (0, 1, 3, 2, 4, 5)).reshape(B, G * Dh, Z, t, t)


# ----------------------------------------------------------------------------
# Pure-JAX f32 reference (highest precision) for a correctness check.
# ----------------------------------------------------------------------------
def reference_forward(x, conv_w, headsita, num_heads):
    B, C, Z, H, W = x.shape
    G, Dh, N = num_heads, C // num_heads, H * W
    qkv = lax.conv_general_dilated(
        x, conv_w, window_strides=(1, 1, 1), padding=((1, 1), (1, 1), (1, 1)),
        dimension_numbers=("NCDHW", "OIDHW", "NCDHW"),
        precision=lax.Precision.HIGHEST)
    q, k, v = jnp.split(qkv, 3, axis=1)

    def to_heads(t):
        t = t.reshape(B, G, Dh, Z, H, W)
        return jnp.transpose(t, (0, 1, 3, 4, 5, 2)).reshape(B, G, Z, N, Dh)

    q, k, v = to_heads(q), to_heads(k), to_heads(v)
    kt = jnp.swapaxes(k, -1, -2)

    def norm(t):
        return t / jnp.maximum(jnp.linalg.norm(t, axis=-1, keepdims=True), 1e-12)

    qn, kn, vn = norm(q), norm(kt), norm(v)
    attn = jnp.einsum("bgznd,bgzdm->bgznm", qn, kn, precision=lax.Precision.HIGHEST)
    dis = relative_pos_dis(H, W)
    factor = 1.0 / (2.0 * (jax.nn.sigmoid(headsita) * (0.4 - 0.003) + 0.003) ** 2)
    d = jnp.exp(-(factor[:, None, None] * dis[None]))
    d = d / jnp.sum(d, axis=-1, keepdims=True)                      # (G, N, N)
    attn = attn * d[None, :, None, :, :]
    out = jnp.einsum("bgznm,bgzmd->bgznd", attn, vn, precision=lax.Precision.HIGHEST)
    t = math.ceil(N ** 0.5)
    out = out.reshape(B, G, Z, t, t, Dh)
    return jnp.transpose(out, (0, 1, 5, 2, 3, 4)).reshape(B, G * Dh, Z, t, t)


if __name__ == "__main__":
    key = jax.random.PRNGKey(0)
    k_x, k_w, k_s = jax.random.split(key, 3)

    B, C, Z, H, W = 2, 32, 4, 8, 8       # hidden_size=32, input_x=input_y=8
    num_heads = 4

    x = jax.random.normal(k_x, (B, C, Z, H, W), dtype=jnp.float32)
    conv_w = 0.1 * jax.random.normal(k_w, (3 * C, C, 3, 3, 3), dtype=jnp.float32)
    headsita = jax.random.normal(k_s, (num_heads,), dtype=jnp.float32)

    fwd = jax.jit(attention_forward, static_argnums=(3,))
    out = fwd(x, conv_w, headsita, num_heads)
    out = jax.block_until_ready(out)

    ref = reference_forward(x, conv_w, headsita, num_heads)
    assert out.shape == (B, C, Z, H, W)
    assert bool(jnp.all(jnp.isfinite(out)))
    # bf16 MXU operands (f32 accumulation) vs. f32 HIGHEST reference.
    assert bool(jnp.allclose(out, ref, atol=5e-2, rtol=5e-2))
    print("KERNEL_OK")
</pallas_src>

<mosaic_0001>
module attributes {stable_mosaic.version = 11 : i64} {
  func.func @_matmul_kernel(%arg0: i32, %arg1: i32, %arg2: i32, %arg3: memref<256x512xbf16, #tpu.memory_space<vmem>>, %arg4: memref<512x128xbf16, #tpu.memory_space<vmem>>, %arg5: memref<256x128xf32, #tpu.memory_space<vmem>>, %arg6: memref<256x128xf32, #tpu.memory_space<vmem>>) attributes {dimension_semantics = [#tpu.dimension_semantics<parallel>, #tpu.dimension_semantics<parallel>, #tpu.dimension_semantics<arbitrary>], iteration_bounds = array<i64: 2, 1, 2>, scalar_prefetch = 0 : i64, scratch_operands = 1 : i64, tpu.core_type = #tpu.core_type<tc>, window_params = [{transform_indices = @transform_0, window_bounds = array<i64: 256, 512>}, {transform_indices = @transform_1, window_bounds = array<i64: 512, 128>}, {transform_indices = @transform_2, window_bounds = array<i64: 256, 128>}]} {
    %c0_i32 = arith.constant 0 : i32
    %0 = arith.cmpi eq, %arg2, %c0_i32 : i32
    %1 = arith.extui %0 : i1 to i32
    %c0_i32_0 = arith.constant 0 : i32
    %2 = arith.cmpi ne, %1, %c0_i32_0 : i32
    scf.if %2 {
      %cst_9 = arith.constant 0.000000e+00 : f32
      %12 = vector.broadcast %cst_9 : f32 to vector<256x128xf32>
      %c0_10 = arith.constant 0 : index
      %c0_11 = arith.constant 0 : index
      %13 = vector.load %arg6[%c0_10, %c0_11] : memref<256x128xf32, #tpu.memory_space<vmem>>, vector<256x128xf32>
      tpu.vector_store %arg6[%c0_10, %c0_11], %12 {strides = array<i32>} : memref<256x128xf32, #tpu.memory_space<vmem>>, vector<256x128xf32>,
    } else {
    }
    %c0 = arith.constant 0 : index
    %c0_1 = arith.constant 0 : index
    %3 = vector.load %arg6[%c0, %c0_1] : memref<256x128xf32, #tpu.memory_space<vmem>>, vector<256x128xf32>
    %c0_2 = arith.constant 0 : index
    %c0_3 = arith.constant 0 : index
    %4 = vector.load %arg3[%c0_2, %c0_3] : memref<256x512xbf16, #tpu.memory_space<vmem>>, vector<256x512xbf16>
    %c0_4 = arith.constant 0 : index
    %c0_5 = arith.constant 0 : index
    %5 = vector.load %arg4[%c0_4, %c0_5] : memref<512x128xbf16, #tpu.memory_space<vmem>>, vector<512x128xbf16>
    %cst = arith.constant dense<0.000000e+00> : vector<256x128xf32>
    %6 = tpu.matmul %4, %5, %cst {dimension_numbers = #tpu.dot_dimension_numbers<[1], [0], [0], [1], [0, 0, 1, 1], [], []>} : vector<256x512xbf16>, vector<512x128xbf16>, vector<256x128xf32> -> vector<256x128xf32>
    %7 = arith.addf %3, %6 : vector<256x128xf32>
    %c0_6 = arith.constant 0 : index
    %c0_7 = arith.constant 0 : index
    %8 = vector.load %arg6[%c0_6, %c0_7] : memref<256x128xf32, #tpu.memory_space<vmem>>, vector<256x128xf32>
    tpu.vector_store %arg6[%c0_6, %c0_7], %7 {strides = array<i32>} : memref<256x128xf32, #tpu.memory_space<vmem>>, vector<256x128xf32>,
    %c1_i32 = arith.constant 1 : i32
    %9 = arith.cmpi eq, %arg2, %c1_i32 : i32
    %10 = arith.extui %9 : i1 to i32
    %c0_i32_8 = arith.constant 0 : i32
    %11 = arith.cmpi ne, %10, %c0_i32_8 : i32
    scf.if %11 {
      %c0_9 = arith.constant 0 : index
      %c0_10 = arith.constant 0 : index
      %12 = vector.load %arg6[%c0_9, %c0_10] : memref<256x128xf32, #tpu.memory_space<vmem>>, vector<256x128xf32>
      %c0_11 = arith.constant 0 : index
      %c0_12 = arith.constant 0 : index
      %13 = vector.load %arg5[%c0_11, %c0_12] : memref<256x128xf32, #tpu.memory_space<vmem>>, vector<256x128xf32>
      tpu.vector_store %arg5[%c0_11, %c0_12], %12 {strides = array<i32>} : memref<256x128xf32, #tpu.memory_space<vmem>>, vector<256x128xf32>,
    } else {
    }
    return
  }
  func.func @transform_0(%arg0: i32, %arg1: i32, %arg2: i32) -> (i32, i32) {
    %c0_i32 = arith.constant 0 : i32
    return %arg0, %arg2 : i32, i32
  }
  func.func @transform_1(%arg0: i32, %arg1: i32, %arg2: i32) -> (i32, i32) {
    %c0_i32 = arith.constant 0 : i32
    return %arg2, %arg1 : i32, i32
  }
  func.func @transform_2(%arg0: i32, %arg1: i32, %arg2: i32) -> (i32, i32) {
    %c0_i32 = arith.constant 0 : i32
    return %arg0, %arg1 : i32, i32
  }
}

module attributes {stable_mosaic.version = 11 : i64} {
  func.func @_attn_kernel(%arg0: i32, %arg1: i32, %arg2: memref<1x1x4x64x8xf32, #tpu.memory_space<vmem>>, %arg3: memref<1x1x4x8x64xf32, #tpu.memory_space<vmem>>, %arg4: memref<1x1x4x8x64xf32, #tpu.memory_space<vmem>>, %arg5: memref<1x64x64xf32, #tpu.memory_space<vmem>>, %arg6: memref<1x1x4x8x64xf32, #tpu.memory_space<vmem>>) attributes {dimension_semantics = [#tpu.dimension_semantics<parallel>, #tpu.dimension_semantics<parallel>], iteration_bounds = array<i64: 2, 4>, scalar_prefetch = 0 : i64, scratch_operands = 0 : i64, tpu.core_type = #tpu.core_type<tc>, window_params = [{transform_indices = @transform_0, window_bounds = array<i64: 1, 1, 4, 64, 8>}, {transform_indices = @transform_1, window_bounds = array<i64: 1, 1, 4, 8, 64>}, {transform_indices = @transform_2, window_bounds = array<i64: 1, 1, 4, 8, 64>}, {transform_indices = @transform_3, window_bounds = array<i64: 1, 64, 64>}, {transform_indices = @transform_4, window_bounds = array<i64: 1, 1, 4, 8, 64>}]} {
    %c0 = arith.constant 0 : index
    %c0_0 = arith.constant 0 : index
    %c0_1 = arith.constant 0 : index
    %c0_2 = arith.constant 0 : index
    %c0_3 = arith.constant 0 : index
    %0 = vector.load %arg2[%c0, %c0_0, %c0_1, %c0_2, %c0_3] : memref<1x1x4x64x8xf32, #tpu.memory_space<vmem>>, vector<1x1x4x64x8xf32>
    %1 = vector.shape_cast %0 : vector<1x1x4x64x8xf32> to vector<4x64x8xf32>
    %c0_4 = arith.constant 0 : index
    %c0_5 = arith.constant 0 : index
    %c0_6 = arith.constant 0 : index
    %c0_7 = arith.constant 0 : index
    %c0_8 = arith.constant 0 : index
    %2 = vector.load %arg3[%c0_4, %c0_5, %c0_6, %c0_7, %c0_8] : memref<1x1x4x8x64xf32, #tpu.memory_space<vmem>>, vector<1x1x4x8x64xf32>
    %3 = vector.shape_cast %2 : vector<1x1x4x8x64xf32> to vector<4x8x64xf32>
    %c0_9 = arith.constant 0 : index
    %c0_10 = arith.constant 0 : index
    %c0_11 = arith.constant 0 : index
    %c0_12 = arith.constant 0 : index
    %c0_13 = arith.constant 0 : index
    %4 = vector.load %arg4[%c0_9, %c0_10, %c0_11, %c0_12, %c0_13] : memref<1x1x4x8x64xf32, #tpu.memory_space<vmem>>, vector<1x1x4x8x64xf32>
    %5 = vector.shape_cast %4 : vector<1x1x4x8x64xf32> to vector<4x8x64xf32>
    %c0_14 = arith.constant 0 : index
    %c0_15 = arith.constant 0 : index
    %c0_16 = arith.constant 0 : index
    %6 = vector.load %arg5[%c0_14, %c0_15, %c0_16] : memref<1x64x64xf32, #tpu.memory_space<vmem>>, vector<1x64x64xf32>
    %7 = vector.shape_cast %6 : vector<1x64x64xf32> to vector<64x64xf32>
    %8 = arith.mulf %1, %1 : vector<4x64x8xf32>
    %cst = arith.constant dense<0.000000e+00> : vector<4x64xf32>
    %9 = vector.multi_reduction <add>, %8, %cst [2] : vector<4x64x8xf32> to vector<4x64xf32>
    %10 = vector.shape_cast %9 : vector<4x64xf32> to vector<4x64x1xf32>
    %cst_17 = arith.constant 1.000000e-24 : f32
    %11 = vector.broadcast %cst_17 : f32 to vector<4x64x1xf32>
    %12 = arith.maximumf %10, %11 : vector<4x64x1xf32>
    %13 = math.rsqrt %12 : vector<4x64x1xf32>
    %14 = vector.broadcast %13 : vector<4x64x1xf32> to vector<4x64x8xf32>
    %15 = arith.mulf %1, %14 : vector<4x64x8xf32>
    %16 = arith.mulf %3, %3 : vector<4x8x64xf32>
    %cst_18 = arith.constant dense<0.000000e+00> : vector<4x8xf32>
    %17 = vector.multi_reduction <add>, %16, %cst_18 [2] : vector<4x8x64xf32> to vector<4x8xf32>
    %18 = vector.shape_cast %17 : vector<4x8xf32> to vector<4x8x1xf32>
    %cst_19 = arith.constant 1.000000e-24 : f32
    %19 = vector.broadcast %cst_19 : f32 to vector<4x8x1xf32>
    %20 = arith.maximumf %18, %19 : vector<4x8x1xf32>
    %21 = math.rsqrt %20 : vector<4x8x1xf32>
    %22 = vector.broadcast %21 : vector<4x8x1xf32> to vector<4x8x64xf32>
    %23 = arith.mulf %3, %22 : vector<4x8x64xf32>
    %24 = arith.mulf %5, %5 : vector<4x8x64xf32>
    %cst_20 = arith.constant dense<0.000000e+00> : vector<4x64xf32>
    %25 = vector.multi_reduction <add>, %24, %cst_20 [1] : vector<4x8x64xf32> to vector<4x64xf32>
    %26 = vector.shape_cast %25 : vector<4x64xf32> to vector<4x1x64xf32>
    %cst_21 = arith.constant 1.000000e-24 : f32
    %27 = vector.broadcast %cst_21 : f32 to vector<4x1x64xf32>
    %28 = arith.maximumf %26, %27 : vector<4x1x64xf32>
    %29 = math.rsqrt %28 : vector<4x1x64xf32>
    %30 = vector.broadcast %29 : vector<4x1x64xf32> to vector<4x8x64xf32>
    %31 = arith.mulf %5, %30 : vector<4x8x64xf32>
    %32 = arith.truncf %15 : vector<4x64x8xf32> to vector<4x64x8xbf16>
    %33 = arith.truncf %23 : vector<4x8x64xf32> to vector<4x8x64xbf16>
    "tpu.trace_start"() <{level = 10 : i32, message = "znd,zdm->znm"}> : () -> ()
    %cst_22 = arith.constant dense<0.000000e+00> : vector<4x64x64xf32>
    %34 = tpu.matmul %32, %33, %cst_22 {dimension_numbers = #tpu.dot_dimension_numbers<[2], [1], [1], [2], [0, 0, 0, 1, 1, 2], [0], [0]>} : vector<4x64x8xbf16>, vector<4x8x64xbf16>, vector<4x64x64xf32> -> vector<4x64x64xf32>
    "tpu.trace_stop"() : () -> ()
    %35 = vector.shape_cast %7 : vector<64x64xf32> to vector<1x64x64xf32>
    %36 = vector.broadcast %35 : vector<1x64x64xf32> to vector<4x64x64xf32>
    %37 = arith.mulf %34, %36 : vector<4x64x64xf32>
    %38 = arith.truncf %31 : vector<4x8x64xf32> to vector<4x8x64xbf16>
    %39 = arith.truncf %37 : vector<4x64x64xf32> to vector<4x64x64xbf16>
    "tpu.trace_start"() <{level = 10 : i32, message = "zdm,znm->zdn"}> : () -> ()
    %cst_23 = arith.constant dense<0.000000e+00> : vector<4x8x64xf32>
    %40 = tpu.matmul %38, %39, %cst_23 {dimension_numbers = #tpu.dot_dimension_numbers<[2], [2], [1], [1], [0, 0, 0, 1, 1, 1], [0], [0]>} : vector<4x8x64xbf16>, vector<4x64x64xbf16>, vector<4x8x64xf32> -> vector<4x8x64xf32>
    "tpu.trace_stop"() : () -> ()
    %c0_24 = arith.constant 0 : index
    %c0_25 = arith.constant 0 : index
    %c0_26 = arith.constant 0 : index
    %c0_27 = arith.constant 0 : index
    %c0_28 = arith.constant 0 : index
    %41 = vector.load %arg6[%c0_24, %c0_25, %c0_26, %c0_27, %c0_28] : memref<1x1x4x8x64xf32, #tpu.memory_space<vmem>>, vector<1x1x4x8x64xf32>
    %42 = vector.shape_cast %41 : vector<1x1x4x8x64xf32> to vector<4x8x64xf32>
    %43 = vector.shape_cast %40 : vector<4x8x64xf32> to vector<1x1x4x8x64xf32>
    tpu.vector_store %arg6[%c0_24, %c0_25, %c0_26, %c0_27, %c0_28], %43 {strides = array<i32>} : memref<1x1x4x8x64xf32, #tpu.memory_space<vmem>>, vector<1x1x4x8x64xf32>,
    return
  }
  func.func @transform_0(%arg0: i32, %arg1: i32) -> (i32, i32, i32, i32, i32) {
    %c0_i32 = arith.constant 0 : i32
    %c0_i32_0 = arith.constant 0 : i32
    %c0_i32_1 = arith.constant 0 : i32
    %c0_i32_2 = arith.constant 0 : i32
    return %arg0, %arg1, %c0_i32, %c0_i32_0, %c0_i32_1 : i32, i32, i32, i32, i32
  }
  func.func @transform_1(%arg0: i32, %arg1: i32) -> (i32, i32, i32, i32, i32) {
    %c0_i32 = arith.constant 0 : i32
    %c0_i32_0 = arith.constant 0 : i32
    %c0_i32_1 = arith.constant 0 : i32
    %c0_i32_2 = arith.constant 0 : i32
    return %arg0, %arg1, %c0_i32, %c0_i32_0, %c0_i32_1 : i32, i32, i32, i32, i32
  }
  func.func @transform_2(%arg0: i32, %arg1: i32) -> (i32, i32, i32, i32, i32) {
    %c0_i32 = arith.constant 0 : i32
    %c0_i32_0 = arith.constant 0 : i32
    %c0_i32_1 = arith.constant 0 : i32
    %c0_i32_2 = arith.constant 0 : i32
    return %arg0, %arg1, %c0_i32, %c0_i32_0, %c0_i32_1 : i32, i32, i32, i32, i32
  }
  func.func @transform_3(%arg0: i32, %arg1: i32) -> (i32, i32, i32) {
    %c0_i32 = arith.constant 0 : i32
    %c0_i32_0 = arith.constant 0 : i32
    %c0_i32_1 = arith.constant 0 : i32
    return %arg1, %c0_i32, %c0_i32_0 : i32, i32, i32
  }
  func.func @transform_4(%arg0: i32, %arg1: i32) -> (i32, i32, i32, i32, i32) {
    %c0_i32 = arith.constant 0 : i32
    %c0_i32_0 = arith.constant 0 : i32
    %c0_i32_1 = arith.constant 0 : i32
    %c0_i32_2 = arith.constant 0 : i32
    return %arg0, %arg1, %c0_i32, %c0_i32_0, %c0_i32_1 : i32, i32, i32, i32, i32
  }
}

</mosaic_0001>

<bundles_post_ra>
// kernel: attention_forward.2
= control target key start
LH: loop header
LB: loop body
LE: loop exit
PB: predicated region body
PF: predicated region fallthrough
CT: control target
= control target key end

     0   :  { %s2288_s9 = smov 0   ;;  %s2290_s10 = smov 0   ;;  %s2712_s0 = inlined_call_operand.vmem [shape: bf16[512,1024], index: 0, kind: input, shape index: {}]   ;;  %s2713_s1 = inlined_call_operand.vmem [shape: bf16[1024,128], index: 1, kind: input, shape index: {}]   ;;  %s2714_s2 = inlined_call_operand.vmem [shape: f32[512,128], index: 2, kind: output, shape index: {}]  }
   0x1   :  { %s2292_s11 = smov 0   ;;  %s2294_s12 = smov 0  }
   0x2   :  { %s2296_s13 = smov 0   ;;  %s2298_s14 = smov 0  }
   0x3   :  { %s2300_s15 = smov 0  }
   0x4 LB: > { %s24_s16 = sadd.s32 1, %s2262_s13  ;;  %s31_s17 = sadd.s32 1, %s2266_s14  ;;  %s2270_s15 = sphi %s2300_s15, %s12_s15   ;;  %s2266_s14 = sphi %s2298_s14, %s2720_s14   ;;  %s2262_s13 = sphi %s2296_s13, %s2719_s13   ;;  %s2258_s12 = sphi %s2294_s12, %s2718_s12   ;;  %s2254_s11 = sphi %s2292_s11, %s2717_s11   ;;  %s2250_s10 = sphi %s2290_s10, %s2716_s10   ;;  %s2246_s9 = sphi %s2288_s9, %s2715_s9  }
   0x5   : > { %p25_p0 = scmp.ge.s32.totalorder %s24_s16, 2  ;;  %p47_p1 = scmp.ne.s32.totalorder %s2250_s10, %s2246_s9 }
   0x6   : > { %p48_p2 = scmp.eq.s32.totalorder %s2270_s15, 0  ;;  %s40_s21 = sadd.s32 1, %s2250_s10 }
   0x7   : > { %s2722_s16 = smov (%p25_p0, %s24_s16), 0  ;;  %s2724_s17 = smov (!%p25_p0, %s31_s17), %s2266_s14 }
   0x8   : > { %p49_p3 = por %p48_p2, %p47_p1  ;;  %p33_p4 = scmp.ge.s32.totalorder %s2724_s17, 2 }
   0x9   : > { %s36_s18 = ssub.s32 %s2262_s13, %s2722_s16  ;;  %p1662_p6 = scmp.ge.s32.totalorder %s2270_s15, 4 }
   0xa   : > { %s2726_s17 = smov (%p33_p4, %s2724_s17), 0 }
   0xb   : > { %s35_s19 = ssub.s32 %s2266_s14, %s2726_s17  ;;  %129 = sbr.rel (%p1662_p6) target bundleno = 87 (0x57), region = 16 }
   0xc   : > { %s37_s20 = sor.u32 %s36_s18, %s35_s19 }
   0xd   : > { %p38_p5 = scmp.eq.s32.totalorder %s37_s20, 0 }
   0xf   : > { %s2339_s22 = scalar_select %p38_p5, %s2250_s10, %s40_s21  }
  0x10   : > { %132 = sbr.rel (!%p49_p3) target bundleno = 87 (0x57), region = 20  ;;  %s134_s23 = sand.u32 (%p49_p3), 1, %s2250_s10  }
  0x11   : > { %s1665_s24 = sshll.u32 (%p49_p3), %s2262_s13, 2  ;;  %s1663_s25 = sshll.u32 (%p49_p3), %s134_s23, 9 }
  0x12   : > { %s2062_s26 = sshll.u32 (%p49_p3), %s2266_s14, 8  ;;  %s2353_s4 = scalar_lea.vmem (%p49_p3), [#allocation3], %s1663_s25 }
  0x13   : > { %s140_s27 = sadd.s32 (%p49_p3), %s2062_s26, %s1665_s24 }
  0x14   : > { %s1667_s28 = sshll.u32 (%p49_p3), %s140_s27, 2 }
  0x15   : > { %s2348_s3 = scalar_lea.vmem %s2712_s0, %s1667_s28 }
  0x16   : > { %v155_v0 = vld [vmem:[%s2348_s3] sm:$0xff]  ;;  %v157_v1 = vld [vmem:[%s2348_s3 + $0x8] sm:$0xff] }
  0x17   : > { %v159_v2 = vld [vmem:[%s2348_s3 + $0x20] sm:$0xff]  ;;  %156 = vst [vmem:[%s2353_s4] sm:$0xff] %v155_v0  ;;  %v161_v3 = vld [vmem:[%s2348_s3 + $0x28] sm:$0xff] }
  0x18   : > { %158 = vst [vmem:[%s2353_s4 + $0x8] sm:$0xff] %v157_v1  ;;  %v163_v4 = vld [vmem:[%s2348_s3 + $0x40] sm:$0xff]  ;;  %v165_v5 = vld [vmem:[%s2348_s3 + $0x48] sm:$0xff] }
  0x19   : > { %160 = vst [vmem:[%s2353_s4 + $0x10] sm:$0xff] %v159_v2  ;;  %v167_v6 = vld [vmem:[%s2348_s3 + $0x60] sm:$0xff]  ;;  %v169_v7 = vld [vmem:[%s2348_s3 + $0x68] sm:$0xff] }
  0x1a   : > { %162 = vst [vmem:[%s2353_s4 + $0x18] sm:$0xff] %v161_v3  ;;  %v171_v8 = vld [vmem:[%s2348_s3 + $0x80] sm:$0xff]  ;;  %v173_v9 = vld [vmem:[%s2348_s3 + $0x88] sm:$0xff] }
  0x1b   : > { %164 = vst [vmem:[%s2353_s4 + $0x20] sm:$0xff] %v163_v4  ;;  %v175_v10 = vld [vmem:[%s2348_s3 + $0xa0] sm:$0xff]  ;;  %v177_v11 = vld [vmem:[%s2348_s3 + $0xa8] sm:$0xff] }
  0x1c   : > { %166 = vst [vmem:[%s2353_s4 + $0x28] sm:$0xff] %v165_v5  ;;  %v179_v12 = vld [vmem:[%s2348_s3 + $0xc0] sm:$0xff]  ;;  %v181_v13 = vld [vmem:[%s2348_s3 + $0xc8] sm:$0xff] }
  0x1d   : > { %168 = vst [vmem:[%s2353_s4 + $0x30] sm:$0xff] %v167_v6  ;;  %v183_v14 = vld [vmem:[%s2348_s3 + $0xe0] sm:$0xff]  ;;  %v185_v15 = vld [vmem:[%s2348_s3 + $0xe8] sm:$0xff] }
  0x1e   : > { %170 = vst [vmem:[%s2353_s4 + $0x38] sm:$0xff] %v169_v7  ;;  %v187_v16 = vld [vmem:[%s2348_s3 + $0x100] sm:$0xff]  ;;  %v189_v17 = vld [vmem:[%s2348_s3 + $0x108] sm:$0xff] }
  0x1f   : > { %172 = vst [vmem:[%s2353_s4 + $0x40] sm:$0xff] %v171_v8  ;;  %v191_v18 = vld [vmem:[%s2348_s3 + $0x120] sm:$0xff]  ;;  %v193_v19 = vld [vmem:[%s2348_s3 + $0x128] sm:$0xff] }
  0x20   : > { %174 = vst [vmem:[%s2353_s4 + $0x48] sm:$0xff] %v173_v9  ;;  %v195_v20 = vld [vmem:[%s2348_s3 + $0x140] sm:$0xff]  ;;  %v197_v21 = vld [vmem:[%s2348_s3 + $0x148] sm:$0xff] }
  0x21   : > { %176 = vst [vmem:[%s2353_s4 + $0x50] sm:$0xff] %v175_v10  ;;  %v199_v22 = vld [vmem:[%s2348_s3 + $0x160] sm:$0xff]  ;;  %v201_v23 = vld [vmem:[%s2348_s3 + $0x168] sm:$0xff] }
  0x22   : > { %178 = vst [vmem:[%s2353_s4 + $0x58] sm:$0xff] %v177_v11  ;;  %v203_v24 = vld [vmem:[%s2348_s3 + $0x180] sm:$0xff]  ;;  %v205_v25 = vld [vmem:[%s2348_s3 + $0x188] sm:$0xff] }
  0x23   : > { %180 = vst [vmem:[%s2353_s4 + $0x60] sm:$0xff] %v179_v12  ;;  %v207_v26 = vld [vmem:[%s2348_s3 + $0x1a0] sm:$0xff]  ;;  %v209_v27 = vld [vmem:[%s2348_s3 + $0x1a8] sm:$0xff] }
  0x24   : > { %182 = vst [vmem:[%s2353_s4 + $0x68] sm:$0xff] %v181_v13  ;;  %v211_v28 = vld [vmem:[%s2348_s3 + $0x1c0] sm:$0xff]  ;;  %v213_v29 = vld [vmem:[%s2348_s3 + $0x1c8] sm:$0xff] }
  0x25   : > { %184 = vst [vmem:[%s2353_s4 + $0x70] sm:$0xff] %v183_v14  ;;  %v215_v30 = vld [vmem:[%s2348_s3 + $0x1e0] sm:$0xff]  ;;  %v217_v31 = vld [vmem:[%s2348_s3 + $0x1e8] sm:$0xff] }
  0x26   : > { %186 = vst [vmem:[%s2353_s4 + $0x78] sm:$0xff] %v185_v15  ;;  %v219_v32 = vld [vmem:[%s2348_s3 + $0x200] sm:$0xff]  ;;  %v221_v33 = vld [vmem:[%s2348_s3 + $0x208] sm:$0xff] }
  0x27   : > { %188 = vst [vmem:[%s2353_s4 + $0x80] sm:$0xff] %v187_v16  ;;  %v223_v34 = vld [vmem:[%s2348_s3 + $0x220] sm:$0xff]  ;;  %v225_v35 = vld [vmem:[%s2348_s3 + $0x228] sm:$0xff] }
  0x28   : > { %190 = vst [vmem:[%s2353_s4 + $0x88] sm:$0xff] %v189_v17  ;;  %v227_v36 = vld [vmem:[%s2348_s3 + $0x240] sm:$0xff]  ;;  %v229_v37 = vld [vmem:[%s2348_s3 + $0x248] sm:$0xff] }
  0x29   : > { %192 = vst [vmem:[%s2353_s4 + $0x90] sm:$0xff] %v191_v18  ;;  %v231_v38 = vld [vmem:[%s2348_s3 + $0x260] sm:$0xff]  ;;  %v233_v39 = vld [vmem:[%s2348_s3 + $0x268] sm:$0xff] }
  0x2a   : > { %194 = vst [vmem:[%s2353_s4 + $0x98] sm:$0xff] %v193_v19  ;;  %v235_v40 = vld [vmem:[%s2348_s3 + $0x280] sm:$0xff]  ;;  %v237_v41 = vld [vmem:[%s2348_s3 + $0x288] sm:$0xff] }
  0x2b   : > { %196 = vst [vmem:[%s2353_s4 + $0xa0] sm:$0xff] %v195_v20  ;;  %v239_v42 = vld [vmem:[%s2348_s3 + $0x2a0] sm:$0xff]  ;;  %v241_v43 = vld [vmem:[%s2348_s3 + $0x2a8] sm:$0xff] }
  0x2c   : > { %198 = vst [vmem:[%s2353_s4 + $0xa8] sm:$0xff] %v197_v21  ;;  %v243_v44 = vld [vmem:[%s2348_s3 + $0x2c0] sm:$0xff]  ;;  %v245_v45 = vld [vmem:[%s2348_s3 + $0x2c8] sm:$0xff] }
  0x2d   : > { %200 = vst [vmem:[%s2353_s4 + $0xb0] sm:$0xff] %v199_v22  ;;  %v247_v46 = vld [vmem:[%s2348_s3 + $0x2e0] sm:$0xff]  ;;  %v249_v47 = vld [vmem:[%s2348_s3 + $0x2e8] sm:$0xff] }
  0x2e   : > { %202 = vst [vmem:[%s2353_s4 + $0xb8] sm:$0xff] %v201_v23  ;;  %v251_v48 = vld [vmem:[%s2348_s3 + $0x300] sm:$0xff]  ;;  %v253_v49 = vld [vmem:[%s2348_s3 + $0x308] sm:$0xff] }
  0x2f   : > { %204 = vst [vmem:[%s2353_s4 + $0xc0] sm:$0xff] %v203_v24  ;;  %v255_v50 = vld [vmem:[%s2348_s3 + $0x320] sm:$0xff]  ;;  %v257_v51 = vld [vmem:[%s2348_s3 + $0x328] sm:$0xff] }
  0x30   : > { %206 = vst [vmem:[%s2353_s4 + $0xc8] sm:$0xff] %v205_v25  ;;  %v259_v52 = vld [vmem:[%s2348_s3 + $0x340] sm:$0xff]  ;;  %v261_v53 = vld [vmem:[%s2348_s3 + $0x348] sm:$0xff] }
  0x31   : > { %208 = vst [vmem:[%s2353_s4 + $0xd0] sm:$0xff] %v207_v26  ;;  %v263_v54 = vld [vmem:[%s2348_s3 + $0x360] sm:$0xff]  ;;  %v265_v55 = vld [vmem:[%s2348_s3 + $0x368] sm:$0xff] }
  0x32   : > { %210 = vst [vmem:[%s2353_s4 + $0xd8] sm:$0xff] %v209_v27  ;;  %v267_v56 = vld [vmem:[%s2348_s3 + $0x380] sm:$0xff]  ;;  %v269_v57 = vld [vmem:[%s2348_s3 + $0x388] sm:$0xff] }
  0x33   : > { %212 = vst [vmem:[%s2353_s4 + $0xe0] sm:$0xff] %v211_v28  ;;  %v271_v58 = vld [vmem:[%s2348_s3 + $0x3a0] sm:$0xff]  ;;  %v273_v59 = vld [vmem:[%s2348_s3 + $0x3a8] sm:$0xff] }
  0x34   : > { %214 = vst [vmem:[%s2353_s4 + $0xe8] sm:$0xff] %v213_v29  ;;  %v275_v60 = vld [vmem:[%s2348_s3 + $0x3c0] sm:$0xff]  ;;  %v277_v61 = vld [vmem:[%s2348_s3 + $0x3c8] sm:$0xff] }
  0x35   : > { %216 = vst [vmem:[%s2353_s4 + $0xf0] sm:$0xff] %v215_v30  ;;  %v279_v62 = vld [vmem:[%s2348_s3 + $0x3e0] sm:$0xff]  ;;  %v281_v63 = vld [vmem:[%s2348_s3 + $0x3e8] sm:$0xff] }
  0x36   : > { %218 = vst [vmem:[%s2353_s4 + $0xf8] sm:$0xff] %v217_v31 }
  0x37   : > { %220 = vst [vmem:[%s2353_s4 + $0x100] sm:$0xff] %v219_v32 }
  0x38   : > { %222 = vst [vmem:[%s2353_s4 + $0x108] sm:$0xff] %v221_v33 }
  0x39   : > { %224 = vst [vmem:[%s2353_s4 + $0x110] sm:$0xff] %v223_v34 }
  0x3a   : > { %226 = vst [vmem:[%s2353_s4 + $0x118] sm:$0xff] %v225_v35 }
  0x3b   : > { %228 = vst [vmem:[%s2353_s4 + $0x120] sm:$0xff] %v227_v36 }
  0x3c   : > { %230 = vst [vmem:[%s2353_s4 + $0x128] sm:$0xff] %v229_v37 }
  0x3d   : > { %232 = vst [vmem:[%s2353_s4 + $0x130] sm:$0xff] %v231_v38 }
  0x3e   : > { %234 = vst [vmem:[%s2353_s4 + $0x138] sm:$0xff] %v233_v39 }
  0x3f   : > { %236 = vst [vmem:[%s2353_s4 + $0x140] sm:$0xff] %v235_v40 }
  0x40   : > { %238 = vst [vmem:[%s2353_s4 + $0x148] sm:$0xff] %v237_v41 }
  0x41   : > { %240 = vst [vmem:[%s2353_s4 + $0x150] sm:$0xff] %v239_v42 }
  0x42   : > { %242 = vst [vmem:[%s2353_s4 + $0x158] sm:$0xff] %v241_v43 }
  0x43   : > { %244 = vst [vmem:[%s2353_s4 + $0x160] sm:$0xff] %v243_v44 }
  0x44   : > { %246 = vst [vmem:[%s2353_s4 + $0x168] sm:$0xff] %v245_v45 }
  0x45   : > { %248 = vst [vmem:[%s2353_s4 + $0x170] sm:$0xff] %v247_v46 }
  0x46   : > { %250 = vst [vmem:[%s2353_s4 + $0x178] sm:$0xff] %v249_v47 }
  0x47   : > { %252 = vst [vmem:[%s2353_s4 + $0x180] sm:$0xff] %v251_v48 }
  0x48   : > { %254 = vst [vmem:[%s2353_s4 + $0x188] sm:$0xff] %v253_v49 }
  0x49   : > { %256 = vst [vmem:[%s2353_s4 + $0x190] sm:$0xff] %v255_v50 }
  0x4a   : > { %258 = vst [vmem:[%s2353_s4 + $0x198] sm:$0xff] %v257_v51 }
  0x4b   : > { %260 = vst [vmem:[%s2353_s4 + $0x1a0] sm:$0xff] %v259_v52 }
  0x4c   : > { %262 = vst [vmem:[%s2353_s4 + $0x1a8] sm:$0xff] %v261_v53 }
  0x4d   : > { %264 = vst [vmem:[%s2353_s4 + $0x1b0] sm:$0xff] %v263_v54 }
  0x4e   : > { %266 = vst [vmem:[%s2353_s4 + $0x1b8] sm:$0xff] %v265_v55 }
  0x4f   : > { %268 = vst [vmem:[%s2353_s4 + $0x1c0] sm:$0xff] %v267_v56 }
  0x50   : > { %270 = vst [vmem:[%s2353_s4 + $0x1c8] sm:$0xff] %v269_v57 }
  0x51   : > { %272 = vst [vmem:[%s2353_s4 + $0x1d0] sm:$0xff] %v271_v58 }
  0x52   : > { %274 = vst [vmem:[%s2353_s4 + $0x1d8] sm:$0xff] %v273_v59 }
  0x53   : > { %276 = vst [vmem:[%s2353_s4 + $0x1e0] sm:$0xff] %v275_v60 }
  0x54   : > { %278 = vst [vmem:[%s2353_s4 + $0x1e8] sm:$0xff] %v277_v61 }
  0x55   : > { %280 = vst [vmem:[%s2353_s4 + $0x1f0] sm:$0xff] %v279_v62 }
  0x56   : > { %282 = vst [vmem:[%s2353_s4 + $0x1f8] sm:$0xff] %v281_v63 }
  0x57 PF: > { %p1668_p7 = scmp.ge.s32.totalorder %s2270_s15, 1  ;;  %p299_p8 = scmp.lt.s32.totalorder %s2270_s15, 5 }
  0x59   : > { %p300_p9 = pnand %p1668_p7, %p299_p8 }
  0x5a   : > { %s306_s5 = sand.u32 (!%p300_p9), 1, %s2246_s9   ;;  %s1670_s6 = sshll.u32 (!%p300_p9), %s2254_s11, 6 }
  0x5b   : > { %303 = sbr.rel (%p300_p9) target bundleno = 591 (0x24f), region = 47  ;;  %s1669_s7 = sshll.u32 (!%p300_p9), %s306_s5, 9 }
  0x5c   : > { %p341_p10 = scmp.lt.s32.totalorder (!%p300_p9), %s1670_s6, 127  ;;  %s1672_s8 = sshll.u32 (!%p300_p9), %s2258_s12, 5 }
  0x5d   : > { %p350_p11 = scmp.lt.s32.totalorder (!%p300_p9), %s1672_s8, 63  ;;  %s2495_s9 = scalar_lea.vmem (!%p300_p9), [#allocation3], %s1669_s7 }
  0x5e   : > { %p1674_p12 = scmp.ne.s32.totalorder (!%p300_p9), %s2254_s11, 0 }
  0x60   : > { %s2728_s6 = smov (!%p341_p10, %s1670_s6), 127  ;;  %s2730_s8 = smov (!%p350_p11, %s1672_s8), 63 }
  0x61   : > { %s1671_s18 = sshll.u32 %s2728_s6, 2  ;;  %s1673_s23 = sshll.u32 %s2730_s8, 3 }
  0x62   : > { %s2488_s21 = scalar_lea.vmem %s2713_s1, %s1671_s18  ;;  %s2493_s26 = scalar_lea.vmem %s2714_s2, %s1673_s23 }
  0x63   : > { %361 = sbr.rel (%p1674_p12) target bundleno = 137 (0x89), region = 55 }
  0x68   : > { %v2272_v0 = vmov 0.0  }
  0x69   : > { %362 = vst [vmem:[#allocation2 + $0xb0] sm:$0xff] %v2272_v0 }
  0x6a   : > { %363 = vst [vmem:[#allocation2] sm:$0xff] %v2272_v0 }
  0x6b   : > { %364 = vst [vmem:[#allocation2 + $0xd8] sm:$0xff] %v2272_v0 }
  0x6c   : > { %365 = vst [vmem:[#allocation2 + $0x18] sm:$0xff] %v2272_v0 }
  0x6d   : > { %366 = vst [vmem:[#allocation2 + $0x50] sm:$0xff] %v2272_v0 }
  0x6e   : > { %367 = vst [vmem:[#allocation2 + $0x68] sm:$0xff] %v2272_v0 }
  0x6f   : > { %368 = vst [vmem:[#allocation2 + $0x30] sm:$0xff] %v2272_v0 }
  0x70   : > { %369 = vst [vmem:[#allocation2 + $0x48] sm:$0xff] %v2272_v0 }
  0x71   : > { %370 = vst [vmem:[#allocation2 + $0x80] sm:$0xff] %v2272_v0 }
  0x72   : > { %371 = vst [vmem:[#allocation2 + $0x88] sm:$0xff] %v2272_v0 }
  0x73   : > { %372 = vst [vmem:[#allocation2 + $0xe8] sm:$0xff] %v2272_v0 }
  0x74   : > { %373 = vst [vmem:[#allocation2 + $0xb8] sm:$0xff] %v2272_v0 }
  0x75   : > { %374 = vst [vmem:[#allocation2 + $0x60] sm:$0xff] %v2272_v0 }
  0x76   : > { %375 = vst [vmem:[#allocation2 + $0xf0] sm:$0xff] %v2272_v0 }
  0x77   : > { %376 = vst [vmem:[#allocation2 + $0x8] sm:$0xff] %v2272_v0 }
  0x78   : > { %377 = vst [vmem:[#allocation2 + $0x78] sm:$0xff] %v2272_v0 }
  0x79   : > { %378 = vst [vmem:[#allocation2 + $0x38] sm:$0xff] %v2272_v0 }
  0x7a   : > { %379 = vst [vmem:[#allocation2 + $0x58] sm:$0xff] %v2272_v0 }
  0x7b   : > { %380 = vst [vmem:[#allocation2 + $0x40] sm:$0xff] %v2272_v0 }
  0x7c   : > { %381 = vst [vmem:[#allocation2 + $0xc8] sm:$0xff] %v2272_v0 }
  0x7d   : > { %382 = vst [vmem:[#allocation2 + $0xe0] sm:$0xff] %v2272_v0 }
  0x7e   : > { %383 = vst [vmem:[#allocation2 + $0x90] sm:$0xff] %v2272_v0 }
  0x7f   : > { %384 = vst [vmem:[#allocation2 + $0x70] sm:$0xff] %v2272_v0 }
  0x80   : > { %385 = vst [vmem:[#allocation2 + $0xc0] sm:$0xff] %v2272_v0 }
  0x81   : > { %386 = vst [vmem:[#allocation2 + $0xa8] sm:$0xff] %v2272_v0 }
  0x82   : > { %387 = vst [vmem:[#allocation2 + $0xd0] sm:$0xff] %v2272_v0 }
  0x83   : > { %388 = vst [vmem:[#allocation2 + $0x10] sm:$0xff] %v2272_v0 }
  0x84   : > { %389 = vst [vmem:[#allocation2 + $0x28] sm:$0xff] %v2272_v0 }
  0x85   : > { %390 = vst [vmem:[#allocation2 + $0xa0] sm:$0xff] %v2272_v0 }
  0x86   : > { %391 = vst [vmem:[#allocation2 + $0xf8] sm:$0xff] %v2272_v0 }
  0x87   : > { %392 = vst [vmem:[#allocation2 + $0x20] sm:$0xff] %v2272_v0 }
  0x88   : > { %393 = vst [vmem:[#allocation2 + $0x98] sm:$0xff] %v2272_v0 }
  0x89 PF: > { %v2134_v1 = vld [vmem:[%s2488_s21 + $0x38] sm:$0xff]  ;;  %v2133_v5 = vld [vmem:[%s2488_s21 + $0x30] sm:$0xff]  ;;  %v2132_v9 = vld [vmem:[%s2488_s21 + $0x28] sm:$0xff]  ;;  %p2059_p13 = scmp.ne.s32.totalorder %s2254_s11, 1 }
  0x8a   : > { %v2142_v2 = vld [vmem:[%s2488_s21 + $0x78] sm:$0xff]  ;;  %1066 = vmatpush.bf16.msra.mxu0 %v2134_v1  ;;  %v2141_v6 = vld [vmem:[%s2488_s21 + $0x70] sm:$0xff]  ;;  %v2140_v10 = vld [vmem:[%s2488_s21 + $0x68] sm:$0xff] }
  0x8b   : > { %v2150_v3 = vld [vmem:[%s2488_s21 + $0xb8] sm:$0xff]  ;;  %1155 = vmatpush.bf16.msra.mxu1 %v2142_v2  ;;  %v2149_v7 = vld [vmem:[%s2488_s21 + $0xb0] sm:$0xff]  ;;  %v2148_v11 = vld [vmem:[%s2488_s21 + $0xa8] sm:$0xff] }
  0x8c   : > { %v2158_v4 = vld [vmem:[%s2488_s21 + $0xf8] sm:$0xff]  ;;  %1244 = vmatpush.bf16.msra.mxu2 %v2150_v3  ;;  %v2157_v8 = vld [vmem:[%s2488_s21 + $0xf0] sm:$0xff]  ;;  %v2156_v12 = vld [vmem:[%s2488_s21 + $0xe8] sm:$0xff] }
  0x8d   : > { %1333 = vmatpush.bf16.msra.mxu3 %v2158_v4  ;;  %v2131_v13 = vld [vmem:[%s2488_s21 + $0x20] sm:$0xff]  ;;  %v2130_v17 = vld [vmem:[%s2488_s21 + $0x18] sm:$0xff]  ;;  %v2129_v21 = vld [vmem:[%s2488_s21 + $0x10] sm:$0xff] }
  0x8e   : > { %1067 = vmatpush.bf16.msra.mxu0 %v2133_v5  ;;  %v2139_v14 = vld [vmem:[%s2488_s21 + $0x60] sm:$0xff]  ;;  %v2138_v18 = vld [vmem:[%s2488_s21 + $0x58] sm:$0xff]  ;;  %v2137_v22 = vld [vmem:[%s2488_s21 + $0x50] sm:$0xff] }
  0x8f   : > { %1156 = vmatpush.bf16.msra.mxu1 %v2141_v6  ;;  %v2147_v15 = vld [vmem:[%s2488_s21 + $0xa0] sm:$0xff]  ;;  %v2146_v19 = vld [vmem:[%s2488_s21 + $0x98] sm:$0xff]  ;;  %v2145_v23 = vld [vmem:[%s2488_s21 + $0x90] sm:$0xff] }
  0x90   : > { %1245 = vmatpush.bf16.msra.mxu2 %v2149_v7  ;;  %v2155_v16 = vld [vmem:[%s2488_s21 + $0xe0] sm:$0xff]  ;;  %v2154_v20 = vld [vmem:[%s2488_s21 + $0xd8] sm:$0xff]  ;;  %v2153_v24 = vld [vmem:[%s2488_s21 + $0xd0] sm:$0xff] }
  0x91   : > { %1334 = vmatpush.bf16.msra.mxu3 %v2157_v8  ;;  %v2128_v25 = vld [vmem:[%s2488_s21 + $0x8] sm:$0xff]  ;;  %v2127_v29 = vld [vmem:[%s2488_s21] sm:$0xff]  ;;  %v2065_v34 = vld [vmem:[%s2495_s9 + $0xc] sm:$0xf0] }
  0x92   : > { %1068 = vmatpush.bf16.msra.mxu0 %v2132_v9  ;;  %v2136_v26 = vld [vmem:[%s2488_s21 + $0x48] sm:$0xff]  ;;  %v2135_v30 = vld [vmem:[%s2488_s21 + $0x40] sm:$0xff]  ;;  %v1679_v36 = vld [vmem:[%s2495_s9 + $0x10] sm:$0xf0] }
  0x93   : > { %1157 = vmatpush.bf16.msra.mxu1 %v2140_v10  ;;  %v2144_v27 = vld [vmem:[%s2488_s21 + $0x88] sm:$0xff]  ;;  %v2143_v31 = vld [vmem:[%s2488_s21 + $0x80] sm:$0xff]  ;;  %v2066_v38 = vld [vmem:[%s2495_s9 + $0x14] sm:$0xf0] }
  0x94   : > { %1246 = vmatpush.bf16.msra.mxu2 %v2148_v11  ;;  %v2152_v28 = vld [vmem:[%s2488_s21 + $0xc8] sm:$0xff]  ;;  %v2151_v32 = vld [vmem:[%s2488_s21 + $0xc0] sm:$0xff]  ;;  %v1687_v40 = vld [vmem:[%s2495_s9 + $0x18] sm:$0xf0] }
  0x95   : > { %1335 = vmatpush.bf16.msra.mxu3 %v2156_v12  ;;  %v1677_v33 = vld [vmem:[%s2495_s9] sm:$0xf]  ;;  %v2063_v35 = vld [vmem:[%s2495_s9 + $0x4] sm:$0xf]  ;;  %v1685_v37 = vld [vmem:[%s2495_s9 + $0x8] sm:$0xf] }
  0x96   : > { %1069 = vmatpush.bf16.msra.mxu0 %v2131_v13  ;;  %v2064_v39 = vld [vmem:[%s2495_s9 + $0xc] sm:$0xf]  ;;  %v1678_v41 = vor.u32 %v2065_v34, %v1677_v33  ;;  %v1682_v42 = vor.u32 %v2063_v35, %v1679_v36  ;;  %v1686_v43 = vor.u32 %v2066_v38, %v1685_v37  ;;  %v1693_v45 = vld [vmem:[%s2495_s9 + $0x20] sm:$0xf]  ;;  %v2069_v46 = vld [vmem:[%s2495_s9 + $0x2c] sm:$0xf0] }
  0x97   : > { %1158 = vmatpush.bf16.msra.mxu1 %v2139_v14  ;;  %v1690_v44 = vor.u32 %v2064_v39, %v1687_v40  ;;  %v2067_v47 = vld [vmem:[%s2495_s9 + $0x24] sm:$0xf]  ;;  %v1695_v48 = vld [vmem:[%s2495_s9 + $0x30] sm:$0xf0]  ;;  %v1701_v49 = vld [vmem:[%s2495_s9 + $0x28] sm:$0xf]  ;;  %v1694_v53 = vor.u32 %v2069_v46, %v1693_v45 }
  0x98   : > { %1247 = vmatpush.bf16.msra.mxu2 %v2147_v15  ;;  %v2070_v50 = vld [vmem:[%s2495_s9 + $0x34] sm:$0xf0]  ;;  %v2068_v51 = vld [vmem:[%s2495_s9 + $0x2c] sm:$0xf]  ;;  %v1703_v52 = vld [vmem:[%s2495_s9 + $0x38] sm:$0xf0]  ;;  %v1698_v54 = vor.u32 %v2067_v47, %v1695_v48 }
  0x99   : > { %1336 = vmatpush.bf16.msra.mxu3 %v2155_v16  ;;  %v1702_v55 = vor.u32 %v2070_v50, %v1701_v49  ;;  %v1706_v56 = vor.u32 %v2068_v51, %v1703_v52  ;;  %v1709_v57 = vld [vmem:[%s2495_s9 + $0x40] sm:$0xf]  ;;  %v2073_v58 = vld [vmem:[%s2495_s9 + $0x4c] sm:$0xf0]  ;;  %v2071_v59 = vld [vmem:[%s2495_s9 + $0x44] sm:$0xf] }
  0x9a   : > { %1070 = vmatpush.bf16.msra.mxu0 %v2130_v17  ;;  %v1711_v60 = vld [vmem:[%s2495_s9 + $0x50] sm:$0xf0]  ;;  %v1717_v61 = vld [vmem:[%s2495_s9 + $0x48] sm:$0xf]  ;;  %v2074_v62 = vld [vmem:[%s2495_s9 + $0x54] sm:$0xf0]  ;;  %v1710_v1 = vor.u32 %v2073_v58, %v1709_v57 }
  0x9b   : > { %1159 = vmatpush.bf16.msra.mxu1 %v2138_v18  ;;  %v2072_v63 = vld [vmem:[%s2495_s9 + $0x4c] sm:$0xf]  ;;  %v1719_v0 = vld [vmem:[%s2495_s9 + $0x58] sm:$0xf0]  ;;  %v1714_v2 = vor.u32 %v2071_v59, %v1711_v60  ;;  %v1718_v3 = vor.u32 %v2074_v62, %v1717_v61  ;;  %v1725_v5 = vld [vmem:[%s2495_s9 + $0x60] sm:$0xf] }
  0x9c   : > { %1248 = vmatpush.bf16.msra.mxu2 %v2146_v19  ;;  %v1722_v4 = vor.u32 %v2072_v63, %v1719_v0  ;;  %v2077_v6 = vld [vmem:[%s2495_s9 + $0x6c] sm:$0xf0]  ;;  %v2075_v7 = vld [vmem:[%s2495_s9 + $0x64] sm:$0xf]  ;;  %v1727_v8 = vld [vmem:[%s2495_s9 + $0x70] sm:$0xf0] }
  0x9d   : > { %1337 = vmatpush.bf16.msra.mxu3 %v2154_v20  ;;  %v1733_v9 = vld [vmem:[%s2495_s9 + $0x68] sm:$0xf]  ;;  %v2078_v10 = vld [vmem:[%s2495_s9 + $0x74] sm:$0xf0]  ;;  %v2076_v11 = vld [vmem:[%s2495_s9 + $0x6c] sm:$0xf]  ;;  %v1726_v13 = vor.u32 %v2077_v6, %v1725_v5  ;;  %v1730_v14 = vor.u32 %v2075_v7, %v1727_v8 }
  0x9e   : > { %1071 = vmatpush.bf16.msra.mxu0 %v2129_v21  ;;  %v1735_v12 = vld [vmem:[%s2495_s9 + $0x78] sm:$0xf0]  ;;  %v1734_v15 = vor.u32 %v2078_v10, %v1733_v9  ;;  %v1741_v17 = vld [vmem:[%s2495_s9 + $0x80] sm:$0xf]  ;;  %v2081_v18 = vld [vmem:[%s2495_s9 + $0x8c] sm:$0xf0] }
  0x9f   : > { %1160 = vmatpush.bf16.msra.mxu1 %v2137_v22  ;;  %v1738_v16 = vor.u32 %v2076_v11, %v1735_v12  ;;  %v2079_v19 = vld [vmem:[%s2495_s9 + $0x84] sm:$0xf]  ;;  %v1743_v20 = vld [vmem:[%s2495_s9 + $0x90] sm:$0xf0]  ;;  %v1749_v21 = vld [vmem:[%s2495_s9 + $0x88] sm:$0xf] }
  0xa0   : > { %1249 = vmatpush.bf16.msra.mxu2 %v2145_v23  ;;  %v2082_v22 = vld [vmem:[%s2495_s9 + $0x94] sm:$0xf0]  ;;  %v2080_v23 = vld [vmem:[%s2495_s9 + $0x8c] sm:$0xf]  ;;  %v1765_v33 = vld [vmem:[%s2495_s9 + $0xa8] sm:$0xf] }
  0xa1   : > { %1338 = vmatpush.bf16.msra.mxu3 %v2153_v24  ;;  %v1751_v24 = vld [vmem:[%s2495_s9 + $0x98] sm:$0xf0]  ;;  %v2086_v34 = vld [vmem:[%s2495_s9 + $0xb4] sm:$0xf0]  ;;  %v2084_v35 = vld [vmem:[%s2495_s9 + $0xac] sm:$0xf] }
  0xa2   : > { %1072 = vmatpush.bf16.msra.mxu0 %v2128_v25  ;;  %v1742_v25 = vor.u32 %v2081_v18, %v1741_v17  ;;  %v1767_v36 = vld [vmem:[%s2495_s9 + $0xb8] sm:$0xf0]  ;;  %v1766_v39 = vor.u32 %v2086_v34, %v1765_v33  ;;  %v1781_v45 = vld [vmem:[%s2495_s9 + $0xc8] sm:$0xf]  ;;  %v2090_v46 = vld [vmem:[%s2495_s9 + $0xd4] sm:$0xf0] }
  0xa3   : > { %1161 = vmatpush.bf16.msra.mxu1 %v2136_v26  ;;  %v1746_v26 = vor.u32 %v2079_v19, %v1743_v20  ;;  %v1770_v40 = vor.u32 %v2084_v35, %v1767_v36  ;;  %v2088_v47 = vld [vmem:[%s2495_s9 + $0xcc] sm:$0xf]  ;;  %v1783_v48 = vld [vmem:[%s2495_s9 + $0xd8] sm:$0xf0]  ;;  %v1782_v51 = vor.u32 %v2090_v46, %v1781_v45  ;;  %v1797_v57 = vld [vmem:[%s2495_s9 + $0xe8] sm:$0xf] }
  0xa4   : > { %1250 = vmatpush.bf16.msra.mxu2 %v2144_v27  ;;  %v1750_v27 = vor.u32 %v2082_v22, %v1749_v21  ;;  %v1786_v52 = vor.u32 %v2088_v47, %v1783_v48  ;;  %v2094_v58 = vld [vmem:[%s2495_s9 + $0xf4] sm:$0xf0]  ;;  %v2092_v59 = vld [vmem:[%s2495_s9 + $0xec] sm:$0xf]  ;;  %v1799_v60 = vld [vmem:[%s2495_s9 + $0xf8] sm:$0xf0] }
  0xa5   : > { %1339 = vmatpush.bf16.msra.mxu3 %v2152_v28  ;;  %v1754_v28 = vor.u32 %v2080_v23, %v1751_v24  ;;  %v1798_v63 = vor.u32 %v2094_v58, %v1797_v57  ;;  %v1802_v0 = vor.u32 %v2092_v59, %v1799_v60  ;;  %v1813_v5 = vld [vmem:[%s2495_s9 + $0x108] sm:$0xf]  ;;  %v2098_v6 = vld [vmem:[%s2495_s9 + $0x114] sm:$0xf0]  ;;  %v2096_v7 = vld [vmem:[%s2495_s9 + $0x10c] sm:$0xf] }
  0xa6   : > { %1073 = vmatpush.bf16.msra.mxu0 %v2127_v29  ;;  %v1757_v29 = vld [vmem:[%s2495_s9 + $0xa0] sm:$0xf]  ;;  %v1815_v8 = vld [vmem:[%s2495_s9 + $0x118] sm:$0xf0]  ;;  %v394_v21 = vld [vmem:[#allocation2 + $0xb0] sm:$0xff] }
  0xa7   : > { %1162 = vmatpush.bf16.msra.mxu1 %v2135_v30  ;;  %v2085_v30 = vld [vmem:[%s2495_s9 + $0xac] sm:$0xf0]  ;;  %v1821_v23 = vld [vmem:[%s2495_s9 + $0x120] sm:$0xf]  ;;  %v1839_v57 = vld [vmem:[%s2495_s9 + $0x150] sm:$0xf0] }
  0xa8   : > { %1251 = vmatpush.bf16.msra.mxu2 %v2143_v31  ;;  %v2083_v31 = vld [vmem:[%s2495_s9 + $0xa4] sm:$0xf]  ;;  %v1758_v37 = vor.u32 %v2085_v30, %v1757_v29  ;;  %v2101_v24 = vld [vmem:[%s2495_s9 + $0x12c] sm:$0xf0]  ;;  %v2102_v29 = vld [vmem:[%s2495_s9 + $0x134] sm:$0xf0] }
  0xa9   : > { %1340 = vmatpush.bf16.msra.mxu3 %v2151_v32  ;;  %1074 = vmatmul.bf16.vlgmr.msra.gmra.mxu0 %v1678_v41  ;;  %v1759_v32 = vld [vmem:[%s2495_s9 + $0xb0] sm:$0xf0]  ;;  %v1773_v41 = vld [vmem:[%s2495_s9 + $0xc0] sm:$0xf]  ;;  %v2100_v30 = vld [vmem:[%s2495_s9 + $0x12c] sm:$0xf]  ;;  %v1822_v35 = vor.u32 %v2101_v24, %v1821_v23 }
  0xaa   : > { %1163 = vmatmul.bf16.vlgmr.msra.gmra.mxu1 %v1682_v42  ;;  %v1762_v38 = vor.u32 %v2083_v31, %v1759_v32  ;;  %v2089_v42 = vld [vmem:[%s2495_s9 + $0xcc] sm:$0xf0]  ;;  %v1831_v31 = vld [vmem:[%s2495_s9 + $0x138] sm:$0xf0]  ;;  %v1845_v58 = vld [vmem:[%s2495_s9 + $0x148] sm:$0xf] }
  0xab   : > { %1252 = vmatmul.bf16.vlgmr.msra.gmra.mxu2 %v1686_v43  ;;  %v2087_v43 = vld [vmem:[%s2495_s9 + $0xc4] sm:$0xf]  ;;  %v1774_v49 = vor.u32 %v2089_v42, %v1773_v41  ;;  %v1834_v41 = vor.u32 %v2100_v30, %v1831_v31  ;;  %v2106_v59 = vld [vmem:[%s2495_s9 + $0x154] sm:$0xf0]  ;;  %v2104_v60 = vld [vmem:[%s2495_s9 + $0x14c] sm:$0xf] }
  0xac   : > { %1341 = vmatmul.bf16.vlgmr.msra.gmra.mxu3 %v1690_v44  ;;  %v1775_v44 = vld [vmem:[%s2495_s9 + $0xd0] sm:$0xf0]  ;;  %v395_v42 = vld [vmem:[#allocation2] sm:$0xff]  ;;  %v1861_v24 = vld [vmem:[%s2495_s9 + $0x168] sm:$0xf] }
  0xad   : > { %v1778_v50 = vor.u32 %v2087_v43, %v1775_v44  ;;  %v1855_v23 = vld [vmem:[%s2495_s9 + $0x170] sm:$0xf0] }
  0xb9   : > { %1079 = vmatmul.bf16.gmra.mxu0 %v1694_v53  ;;  %v1789_v53 = vld [vmem:[%s2495_s9 + $0xe0] sm:$0xf] }
  0xba   : > { %1168 = vmatmul.bf16.gmra.mxu1 %v1698_v54  ;;  %v2093_v54 = vld [vmem:[%s2495_s9 + $0xec] sm:$0xf0] }
  0xbb   : > { %1257 = vmatmul.bf16.gmra.mxu2 %v1702_v55  ;;  %v2091_v55 = vld [vmem:[%s2495_s9 + $0xe4] sm:$0xf]  ;;  %v1790_v61 = vor.u32 %v2093_v54, %v1789_v53  ;;  %v1837_v53 = vld [vmem:[%s2495_s9 + $0x140] sm:$0xf]  ;;  %v2105_v54 = vld [vmem:[%s2495_s9 + $0x14c] sm:$0xf0] }
  0xbc   : > { %1346 = vmatmul.bf16.gmra.mxu3 %v1706_v56  ;;  %v1791_v56 = vld [vmem:[%s2495_s9 + $0xf0] sm:$0xf0] }
  0xbd   : > { %v1794_v62 = vor.u32 %v2091_v55, %v1791_v56  ;;  %v2103_v56 = vld [vmem:[%s2495_s9 + $0x144] sm:$0xf] }
  0xc9   : > { %1084 = vmatmul.bf16.gmra.mxu0 %v1710_v1  ;;  %v1805_v1 = vld [vmem:[%s2495_s9 + $0x100] sm:$0xf] }
  0xca   : > { %1173 = vmatmul.bf16.gmra.mxu1 %v1714_v2  ;;  %v2097_v2 = vld [vmem:[%s2495_s9 + $0x10c] sm:$0xf0] }
  0xcb   : > { %1262 = vmatmul.bf16.gmra.mxu2 %v1718_v3  ;;  %v2095_v3 = vld [vmem:[%s2495_s9 + $0x104] sm:$0xf]  ;;  %v1806_v9 = vor.u32 %v2097_v2, %v1805_v1  ;;  %v1838_v1 = vor.u32 %v2105_v54, %v1837_v53  ;;  %v1842_v2 = vor.u32 %v2103_v56, %v1839_v57  ;;  %v1871_v53 = vld [vmem:[%s2495_s9 + $0x190] sm:$0xf0]  ;;  %v1877_v54 = vld [vmem:[%s2495_s9 + $0x188] sm:$0xf] }
  0xcc   : > { %1351 = vmatmul.bf16.gmra.mxu3 %v1722_v4  ;;  %v1807_v4 = vld [vmem:[%s2495_s9 + $0x110] sm:$0xf0]  ;;  %v2112_v56 = vld [vmem:[%s2495_s9 + $0x18c] sm:$0xf]  ;;  %v1879_v57 = vld [vmem:[%s2495_s9 + $0x198] sm:$0xf0] }
  0xcd   : > { %v1810_v10 = vor.u32 %v2095_v3, %v1807_v4 }
  0xd9   : > { %1089 = vmatmul.bf16.gmra.mxu0 %v1726_v13  ;;  %v1814_v13 = vor.u32 %v2098_v6, %v1813_v5  ;;  %v1846_v6 = vor.u32 %v2106_v59, %v1845_v58 }
  0xda   : > { %1178 = vmatmul.bf16.gmra.mxu1 %v1730_v14  ;;  %v1818_v14 = vor.u32 %v2096_v7, %v1815_v8  ;;  %v397_v8 = vld [vmem:[#allocation2 + $0x18] sm:$0xff] }
  0xdb   : > { %1267 = vmatmul.bf16.gmra.mxu2 %v1734_v15 }
  0xdc   : > { %1356 = vmatmul.bf16.gmra.mxu3 %v1738_v16 }
  0xe9   : > { %1094 = vmatmul.bf16.gmra.mxu0 %v1742_v25 }
  0xea   : > { %1183 = vmatmul.bf16.gmra.mxu1 %v1746_v26  ;;  %v2099_v26 = vld [vmem:[%s2495_s9 + $0x124] sm:$0xf] }
  0xeb   : > { %1272 = vmatmul.bf16.gmra.mxu2 %v1750_v27  ;;  %v1823_v27 = vld [vmem:[%s2495_s9 + $0x130] sm:$0xf0] }
  0xec   : > { %1361 = vmatmul.bf16.gmra.mxu3 %v1754_v28  ;;  %v1829_v28 = vld [vmem:[%s2495_s9 + $0x128] sm:$0xf]  ;;  %v1826_v36 = vor.u32 %v2099_v26, %v1823_v27  ;;  %v2108_v26 = vld [vmem:[%s2495_s9 + $0x16c] sm:$0xf]  ;;  %v1863_v27 = vld [vmem:[%s2495_s9 + $0x178] sm:$0xf0] }
  0xf9   : > { %1099 = vmatmul.bf16.gmra.mxu0 %v1758_v37 }
  0xfa   : > { %1188 = vmatmul.bf16.gmra.mxu1 %v1762_v38 }
  0xfb   : > { %1277 = vmatmul.bf16.gmra.mxu2 %v1766_v39 }
  0xfc   : > { %1366 = vmatmul.bf16.gmra.mxu3 %v1770_v40  ;;  %v1830_v40 = vor.u32 %v2102_v29, %v1829_v28 }
 0x109   : > { %1104 = vmatmul.bf16.gmra.mxu0 %v1774_v49 }
 0x10a   : > { %1193 = vmatmul.bf16.gmra.mxu1 %v1778_v50 }
 0x10b   : > { %1282 = vmatmul.bf16.gmra.mxu2 %v1782_v51  ;;  %v396_v51 = vld [vmem:[#allocation2 + $0xd8] sm:$0xff] }
 0x10c   : > { %1371 = vmatmul.bf16.gmra.mxu3 %v1786_v52 }
 0x119   : > { %1109 = vmatmul.bf16.gmra.mxu0 %v1790_v61  ;;  %v1847_v61 = vld [vmem:[%s2495_s9 + $0x158] sm:$0xf0] }
 0x11a   : > { %1198 = vmatmul.bf16.gmra.mxu1 %v1794_v62  ;;  %v1850_v7 = vor.u32 %v2104_v60, %v1847_v61 }
 0x11b   : > { %1287 = vmatmul.bf16.gmra.mxu2 %v1798_v63 }
 0x11c   : > { %1376 = vmatmul.bf16.gmra.mxu3 %v1802_v0 }
 0x126   : > { %v1075_v11 = vpop.f32.mrf.mxu0 }
 0x127   : > { %v1164_v12 = vpop.f32.mrf.mxu1 }
 0x128   : > { %v1165_v15 = vadd.f32 %v1164_v12, %v1075_v11 }
 0x129   : > { %1114 = vmatmul.bf16.gmra.mxu0 %v1806_v9 }
 0x12a   : > { %1203 = vmatmul.bf16.gmra.mxu1 %v1810_v10 }
 0x12b   : > { %1292 = vmatmul.bf16.gmra.mxu2 %v1814_v13 }
 0x12c   : > { %1381 = vmatmul.bf16.gmra.mxu3 %v1818_v14 }
 0x12e   : > { %v1253_v16 = vpop.f32.mrf.mxu2  ;;  %v1077_v19 = vpop.f32.mrf.mxu0 }
 0x12f   : > { %v1342_v17 = vpop.f32.mrf.mxu3  ;;  %v1254_v18 = vadd.f32 %v1253_v16, %v1165_v15  ;;  %v1166_v20 = vpop.f32.mrf.mxu1 }
 0x130   : > { %v1167_v32 = vadd.f32 %v1166_v20, %v1077_v19  ;;  %v1853_v19 = vld [vmem:[%s2495_s9 + $0x160] sm:$0xf]  ;;  %v2109_v20 = vld [vmem:[%s2495_s9 + $0x16c] sm:$0xf0] }
 0x131   : > { %v1343_v22 = vadd.f32 %v1342_v17, %v1254_v18  ;;  %v398_v17 = vld [vmem:[#allocation2 + $0x50] sm:$0xff]  ;;  %v1854_v31 = vor.u32 %v2109_v20, %v1853_v19  ;;  %v1893_v20 = vld [vmem:[%s2495_s9 + $0x1a8] sm:$0xf] }
 0x132   : > { %v1887_v19 = vld [vmem:[%s2495_s9 + $0x1b0] sm:$0xf0] }
 0x133   : > { %v1422_v25 = vadd.f32 %v1343_v22, %v394_v21  ;;  %v2107_v22 = vld [vmem:[%s2495_s9 + $0x164] sm:$0xf] }
 0x135   : > { %1454 = vst [vmem:[#allocation2 + $0xb0] sm:$0xff] %v1422_v25  ;;  %v2110_v25 = vld [vmem:[%s2495_s9 + $0x174] sm:$0xf0] }
 0x136   : > { %v1255_v33 = vpop.f32.mrf.mxu2  ;;  %v1080_v38 = vpop.f32.mrf.mxu0 }
 0x137   : > { %v1344_v34 = vpop.f32.mrf.mxu3  ;;  %v1256_v37 = vadd.f32 %v1255_v33, %v1167_v32  ;;  %v1169_v39 = vpop.f32.mrf.mxu1  ;;  %v1858_v32 = vor.u32 %v2107_v22, %v1855_v23  ;;  %v2116_v22 = vld [vmem:[%s2495_s9 + $0x1ac] sm:$0xf]  ;;  %v1895_v23 = vld [vmem:[%s2495_s9 + $0x1b8] sm:$0xf0] }
 0x138   : > { %v1170_v45 = vadd.f32 %v1169_v39, %v1080_v38  ;;  %v399_v38 = vld [vmem:[#allocation2 + $0x68] sm:$0xff] }
 0x139   : > { %v1345_v43 = vadd.f32 %v1344_v34, %v1256_v37  ;;  %1119 = vmatmul.bf16.gmra.mxu0 %v1822_v35  ;;  %v1866_v37 = vor.u32 %v2108_v26, %v1863_v27 }
 0x13a   : > { %1208 = vmatmul.bf16.gmra.mxu1 %v1826_v36  ;;  %v1862_v36 = vor.u32 %v2110_v25, %v1861_v24 }
 0x13b   : > { %v1423_v44 = vadd.f32 %v1345_v43, %v395_v42  ;;  %1297 = vmatmul.bf16.gmra.mxu2 %v1830_v40 }
 0x13c   : > { %1386 = vmatmul.bf16.gmra.mxu3 %v1834_v41 }
 0x13d   : > { %1455 = vst [vmem:[#allocation2] sm:$0xff] %v1423_v44 }
 0x13e   : > { %v1258_v46 = vpop.f32.mrf.mxu2  ;;  %v1082_v49 = vpop.f32.mrf.mxu0 }
 0x13f   : > { %v1347_v47 = vpop.f32.mrf.mxu3  ;;  %v1259_v48 = vadd.f32 %v1258_v46, %v1170_v45  ;;  %v1171_v50 = vpop.f32.mrf.mxu1 }
 0x140   : > { %v1172_v62 = vadd.f32 %v1171_v50, %v1082_v49  ;;  %v1869_v49 = vld [vmem:[%s2495_s9 + $0x180] sm:$0xf]  ;;  %v2113_v50 = vld [vmem:[%s2495_s9 + $0x18c] sm:$0xf0] }
 0x141   : > { %v1348_v52 = vadd.f32 %v1347_v47, %v1259_v48  ;;  %v400_v47 = vld [vmem:[#allocation2 + $0x30] sm:$0xff]  ;;  %v1870_v61 = vor.u32 %v2113_v50, %v1869_v49  ;;  %v1909_v50 = vld [vmem:[%s2495_s9 + $0x1c8] sm:$0xf] }
 0x142   : > { %v1903_v49 = vld [vmem:[%s2495_s9 + $0x1d0] sm:$0xf0] }
 0x143   : > { %v1424_v55 = vadd.f32 %v1348_v52, %v396_v51  ;;  %v2111_v52 = vld [vmem:[%s2495_s9 + $0x184] sm:$0xf] }
 0x145   : > { %1456 = vst [vmem:[#allocation2 + $0xd8] sm:$0xff] %v1424_v55  ;;  %v2114_v55 = vld [vmem:[%s2495_s9 + $0x194] sm:$0xf0] }
 0x146   : > { %v1260_v63 = vpop.f32.mrf.mxu2  ;;  %v1085_v4 = vpop.f32.mrf.mxu0 }
 0x147   : > { %v1349_v0 = vpop.f32.mrf.mxu3  ;;  %v1261_v3 = vadd.f32 %v1260_v63, %v1172_v62  ;;  %v1174_v5 = vpop.f32.mrf.mxu1  ;;  %v1874_v62 = vor.u32 %v2111_v52, %v1871_v53  ;;  %v2120_v52 = vld [vmem:[%s2495_s9 + $0x1cc] sm:$0xf]  ;;  %v1911_v53 = vld [vmem:[%s2495_s9 + $0x1d8] sm:$0xf0] }
 0x148   : > { %v1175_v11 = vadd.f32 %v1174_v5, %v1085_v4  ;;  %v401_v4 = vld [vmem:[#allocation2 + $0x48] sm:$0xff] }
 0x149   : > { %v1350_v9 = vadd.f32 %v1349_v0, %v1261_v3  ;;  %1124 = vmatmul.bf16.gmra.mxu0 %v1838_v1  ;;  %v1882_v3 = vor.u32 %v2112_v56, %v1879_v57 }
 0x14a   : > { %1213 = vmatmul.bf16.gmra.mxu1 %v1842_v2  ;;  %v1878_v2 = vor.u32 %v2114_v55, %v1877_v54 }
 0x14b   : > { %v1425_v10 = vadd.f32 %v1350_v9, %v397_v8  ;;  %1302 = vmatmul.bf16.gmra.mxu2 %v1846_v6 }
 0x14c   : > { %1391 = vmatmul.bf16.gmra.mxu3 %v1850_v7 }
 0x14d   : > { %1457 = vst [vmem:[#allocation2 + $0x18] sm:$0xff] %v1425_v10 }
 0x14e   : > { %v1263_v12 = vpop.f32.mrf.mxu2  ;;  %v1087_v15 = vpop.f32.mrf.mxu0 }
 0x14f   : > { %v1352_v13 = vpop.f32.mrf.mxu3  ;;  %v1264_v14 = vadd.f32 %v1263_v12, %v1175_v11  ;;  %v1176_v16 = vpop.f32.mrf.mxu1 }
 0x150   : > { %v1177_v28 = vadd.f32 %v1176_v16, %v1087_v15  ;;  %v1885_v15 = vld [vmem:[%s2495_s9 + $0x1a0] sm:$0xf]  ;;  %v2117_v16 = vld [vmem:[%s2495_s9 + $0x1ac] sm:$0xf0] }
 0x151   : > { %v1353_v18 = vadd.f32 %v1352_v13, %v1264_v14  ;;  %v402_v13 = vld [vmem:[#allocation2 + $0x80] sm:$0xff]  ;;  %v1886_v27 = vor.u32 %v2117_v16, %v1885_v15  ;;  %v1919_v15 = vld [vmem:[%s2495_s9 + $0x1f0] sm:$0xf0]  ;;  %v1925_v16 = vld [vmem:[%s2495_s9 + $0x1e8] sm:$0xf] }
 0x153   : > { %v1426_v21 = vadd.f32 %v1353_v18, %v398_v17  ;;  %v2115_v18 = vld [vmem:[%s2495_s9 + $0x1a4] sm:$0xf] }
 0x155   : > { %1458 = vst [vmem:[#allocation2 + $0x50] sm:$0xff] %v1426_v21  ;;  %v2118_v21 = vld [vmem:[%s2495_s9 + $0x1b4] sm:$0xf0] }
 0x156   : > { %v1265_v29 = vpop.f32.mrf.mxu2  ;;  %v1090_v34 = vpop.f32.mrf.mxu0 }
 0x157   : > { %v1354_v30 = vpop.f32.mrf.mxu3  ;;  %v1266_v33 = vadd.f32 %v1265_v29, %v1177_v28  ;;  %v1179_v35 = vpop.f32.mrf.mxu1  ;;  %v1890_v28 = vor.u32 %v2115_v18, %v1887_v19  ;;  %v2124_v18 = vld [vmem:[%s2495_s9 + $0x1ec] sm:$0xf]  ;;  %v1927_v19 = vld [vmem:[%s2495_s9 + $0x1f8] sm:$0xf0] }
 0x158   : > { %v1180_v41 = vadd.f32 %v1179_v35, %v1090_v34  ;;  %v403_v34 = vld [vmem:[#allocation2 + $0x88] sm:$0xff] }
 0x159   : > { %v1355_v39 = vadd.f32 %v1354_v30, %v1266_v33  ;;  %1129 = vmatmul.bf16.gmra.mxu0 %v1854_v31  ;;  %v1898_v33 = vor.u32 %v2116_v22, %v1895_v23 }
 0x15a   : > { %1218 = vmatmul.bf16.gmra.mxu1 %v1858_v32  ;;  %v1894_v32 = vor.u32 %v2118_v21, %v1893_v20 }
 0x15b   : > { %v1427_v40 = vadd.f32 %v1355_v39, %v399_v38  ;;  %1307 = vmatmul.bf16.gmra.mxu2 %v1862_v36 }
 0x15c   : > { %1396 = vmatmul.bf16.gmra.mxu3 %v1866_v37 }
 0x15d   : > { %1459 = vst [vmem:[#allocation2 + $0x68] sm:$0xff] %v1427_v40 }
 0x15e   : > { %v1268_v42 = vpop.f32.mrf.mxu2  ;;  %v1092_v45 = vpop.f32.mrf.mxu0 }
 0x15f   : > { %v1357_v43 = vpop.f32.mrf.mxu3  ;;  %v1269_v44 = vadd.f32 %v1268_v42, %v1180_v41  ;;  %v1181_v46 = vpop.f32.mrf.mxu1 }
 0x160   : > { %v1182_v58 = vadd.f32 %v1181_v46, %v1092_v45  ;;  %v1901_v45 = vld [vmem:[%s2495_s9 + $0x1c0] sm:$0xf]  ;;  %v2121_v46 = vld [vmem:[%s2495_s9 + $0x1cc] sm:$0xf0] }
 0x161   : > { %v1358_v48 = vadd.f32 %v1357_v43, %v1269_v44  ;;  %v404_v43 = vld [vmem:[#allocation2 + $0xe8] sm:$0xff]  ;;  %v1902_v57 = vor.u32 %v2121_v46, %v1901_v45 }
 0x163   : > { %v1428_v51 = vadd.f32 %v1358_v48, %v400_v47  ;;  %v2119_v48 = vld [vmem:[%s2495_s9 + $0x1c4] sm:$0xf] }
 0x165   : > { %1460 = vst [vmem:[#allocation2 + $0x30] sm:$0xff] %v1428_v51  ;;  %v2122_v51 = vld [vmem:[%s2495_s9 + $0x1d4] sm:$0xf0] }
 0x166   : > { %v1270_v59 = vpop.f32.mrf.mxu2  ;;  %v1095_v0 = vpop.f32.mrf.mxu0 }
 0x167   : > { %v1359_v60 = vpop.f32.mrf.mxu3  ;;  %v1271_v63 = vadd.f32 %v1270_v59, %v1182_v58  ;;  %v1184_v1 = vpop.f32.mrf.mxu1  ;;  %v1906_v58 = vor.u32 %v2119_v48, %v1903_v49  ;;  %v409_v48 = vld [vmem:[#allocation2 + $0x78] sm:$0xff] }
 0x168   : > { %v1185_v7 = vadd.f32 %v1184_v1, %v1095_v0  ;;  %v405_v0 = vld [vmem:[#allocation2 + $0xb8] sm:$0xff] }
 0x169   : > { %v1360_v5 = vadd.f32 %v1359_v60, %v1271_v63  ;;  %1134 = vmatmul.bf16.gmra.mxu0 %v1870_v61  ;;  %v1914_v63 = vor.u32 %v2120_v52, %v1911_v53 }
 0x16a   : > { %1223 = vmatmul.bf16.gmra.mxu1 %v1874_v62  ;;  %v1910_v62 = vor.u32 %v2122_v51, %v1909_v50 }
 0x16b   : > { %v1429_v6 = vadd.f32 %v1360_v5, %v401_v4  ;;  %1312 = vmatmul.bf16.gmra.mxu2 %v1878_v2 }
 0x16c   : > { %1401 = vmatmul.bf16.gmra.mxu3 %v1882_v3 }
 0x16d   : > { %1461 = vst [vmem:[#allocation2 + $0x48] sm:$0xff] %v1429_v6 }
 0x16e   : > { %v1273_v8 = vpop.f32.mrf.mxu2  ;;  %v1097_v11 = vpop.f32.mrf.mxu0 }
 0x16f   : > { %v1362_v9 = vpop.f32.mrf.mxu3  ;;  %v1274_v10 = vadd.f32 %v1273_v8, %v1185_v7  ;;  %v1186_v12 = vpop.f32.mrf.mxu1 }
 0x170   : > { %v1187_v24 = vadd.f32 %v1186_v12, %v1097_v11  ;;  %v1917_v11 = vld [vmem:[%s2495_s9 + $0x1e0] sm:$0xf]  ;;  %v2125_v12 = vld [vmem:[%s2495_s9 + $0x1ec] sm:$0xf0] }
 0x171   : > { %v1363_v14 = vadd.f32 %v1362_v9, %v1274_v10  ;;  %v406_v9 = vld [vmem:[#allocation2 + $0x60] sm:$0xff]  ;;  %v1918_v23 = vor.u32 %v2125_v12, %v1917_v11 }
 0x172   : > { %v412_v11 = vld [vmem:[#allocation2 + $0x40] sm:$0xff] }
 0x173   : > { %v1430_v17 = vadd.f32 %v1363_v14, %v402_v13  ;;  %v2123_v14 = vld [vmem:[%s2495_s9 + $0x1e4] sm:$0xf] }
 0x175   : > { %1462 = vst [vmem:[#allocation2 + $0x80] sm:$0xff] %v1430_v17  ;;  %v2126_v17 = vld [vmem:[%s2495_s9 + $0x1f4] sm:$0xf0] }
 0x176   : > { %v1275_v25 = vpop.f32.mrf.mxu2  ;;  %v1100_v30 = vpop.f32.mrf.mxu0 }
 0x177   : > { %v1364_v26 = vpop.f32.mrf.mxu3  ;;  %v1276_v29 = vadd.f32 %v1275_v25, %v1187_v24  ;;  %v1189_v31 = vpop.f32.mrf.mxu1  ;;  %v1922_v24 = vor.u32 %v2123_v14, %v1919_v15 }
 0x178   : > { %v1190_v37 = vadd.f32 %v1189_v31, %v1100_v30  ;;  %v407_v30 = vld [vmem:[#allocation2 + $0xf0] sm:$0xff] }
 0x179   : > { %v1365_v35 = vadd.f32 %v1364_v26, %v1276_v29  ;;  %1139 = vmatmul.bf16.gmra.mxu0 %v1886_v27  ;;  %v1930_v29 = vor.u32 %v2124_v18, %v1927_v19 }
 0x17a   : > { %1228 = vmatmul.bf16.gmra.mxu1 %v1890_v28  ;;  %v1926_v28 = vor.u32 %v2126_v17, %v1925_v16 }
 0x17b   : > { %v1431_v36 = vadd.f32 %v1365_v35, %v403_v34  ;;  %1317 = vmatmul.bf16.gmra.mxu2 %v1894_v32 }
 0x17c   : > { %1406 = vmatmul.bf16.gmra.mxu3 %v1898_v33 }
 0x17d   : > { %1463 = vst [vmem:[#allocation2 + $0x88] sm:$0xff] %v1431_v36 }
 0x17e   : > { %v1278_v38 = vpop.f32.mrf.mxu2  ;;  %v1102_v41 = vpop.f32.mrf.mxu0 }
 0x17f   : > { %v1367_v39 = vpop.f32.mrf.mxu3  ;;  %v1279_v40 = vadd.f32 %v1278_v38, %v1190_v37  ;;  %v1191_v42 = vpop.f32.mrf.mxu1 }
 0x180   : > { %v1192_v54 = vadd.f32 %v1191_v42, %v1102_v41 }
 0x181   : > { %v1368_v44 = vadd.f32 %v1367_v39, %v1279_v40  ;;  %v408_v39 = vld [vmem:[#allocation2 + $0x8] sm:$0xff] }
 0x183   : > { %v1432_v47 = vadd.f32 %v1368_v44, %v404_v43 }
 0x185   : > { %1464 = vst [vmem:[#allocation2 + $0xe8] sm:$0xff] %v1432_v47 }
 0x186   : > { %v1280_v55 = vpop.f32.mrf.mxu2  ;;  %v1105_v60 = vpop.f32.mrf.mxu0 }
 0x187   : > { %v1369_v56 = vpop.f32.mrf.mxu3  ;;  %v1281_v59 = vadd.f32 %v1280_v55, %v1192_v54  ;;  %v1194_v61 = vpop.f32.mrf.mxu1 }
 0x188   : > { %v1195_v3 = vadd.f32 %v1194_v61, %v1105_v60 }
 0x189   : > { %v1370_v1 = vadd.f32 %v1369_v56, %v1281_v59  ;;  %1144 = vmatmul.bf16.gmra.mxu0 %v1902_v57  ;;  %v410_v57 = vld [vmem:[#allocation2 + $0x38] sm:$0xff] }
 0x18a   : > { %1233 = vmatmul.bf16.gmra.mxu1 %v1906_v58 }
 0x18b   : > { %v1433_v2 = vadd.f32 %v1370_v1, %v405_v0  ;;  %1322 = vmatmul.bf16.gmra.mxu2 %v1910_v62 }
 0x18c   : > { %1411 = vmatmul.bf16.gmra.mxu3 %v1914_v63 }
 0x18d   : > { %1465 = vst [vmem:[#allocation2 + $0xb8] sm:$0xff] %v1433_v2  ;;  %v411_v2 = vld [vmem:[#allocation2 + $0x58] sm:$0xff] }
 0x18e   : > { %v1283_v4 = vpop.f32.mrf.mxu2  ;;  %v1107_v7 = vpop.f32.mrf.mxu0 }
 0x18f   : > { %v1372_v5 = vpop.f32.mrf.mxu3  ;;  %v1284_v6 = vadd.f32 %v1283_v4, %v1195_v3  ;;  %v1196_v8 = vpop.f32.mrf.mxu1 }
 0x190   : > { %v1197_v20 = vadd.f32 %v1196_v8, %v1107_v7 }
 0x191   : > { %v1373_v10 = vadd.f32 %v1372_v5, %v1284_v6 }
 0x193   : > { %v1434_v13 = vadd.f32 %v1373_v10, %v406_v9 }
 0x195   : > { %1466 = vst [vmem:[#allocation2 + $0x60] sm:$0xff] %v1434_v13 }
 0x196   : > { %v1285_v21 = vpop.f32.mrf.mxu2  ;;  %v1110_v26 = vpop.f32.mrf.mxu0 }
 0x197   : > { %v1374_v22 = vpop.f32.mrf.mxu3  ;;  %v1286_v25 = vadd.f32 %v1285_v21, %v1197_v20  ;;  %v1199_v27 = vpop.f32.mrf.mxu1  ;;  %v413_v20 = vld [vmem:[#allocation2 + $0xc8] sm:$0xff] }
 0x198   : > { %v1200_v33 = vadd.f32 %v1199_v27, %v1110_v26 }
 0x199   : > { %v1375_v31 = vadd.f32 %v1374_v22, %v1286_v25  ;;  %1149 = vmatmul.bf16.gmra.mxu0 %v1918_v23 }
 0x19a   : > { %1238 = vmatmul.bf16.gmra.mxu1 %v1922_v24 }
 0x19b   : > { %v1435_v32 = vadd.f32 %v1375_v31, %v407_v30  ;;  %1327 = vmatmul.bf16.gmra.mxu2 %v1926_v28 }
 0x19c   : > { %1416 = vmatmul.bf16.gmra.mxu3 %v1930_v29  ;;  %v414_v29 = vld [vmem:[#allocation2 + $0xe0] sm:$0xff] }
 0x19d   : > { %1467 = vst [vmem:[#allocation2 + $0xf0] sm:$0xff] %v1435_v32 }
 0x19e   : > { %v1288_v34 = vpop.f32.mrf.mxu2  ;;  %v1112_v37 = vpop.f32.mrf.mxu0 }
 0x19f   : > { %v1377_v35 = vpop.f32.mrf.mxu3  ;;  %v1289_v36 = vadd.f32 %v1288_v34, %v1200_v33  ;;  %v1201_v38 = vpop.f32.mrf.mxu1 }
 0x1a0   : > { %v1202_v42 = vadd.f32 %v1201_v38, %v1112_v37  ;;  %v415_v38 = vld [vmem:[#allocation2 + $0x90] sm:$0xff] }
 0x1a1   : > { %v1378_v40 = vadd.f32 %v1377_v35, %v1289_v36 }
 0x1a3   : > { %v1436_v41 = vadd.f32 %v1378_v40, %v408_v39 }
 0x1a5   : > { %1468 = vst [vmem:[#allocation2 + $0x8] sm:$0xff] %v1436_v41 }
 0x1a6   : > { %v1290_v43 = vpop.f32.mrf.mxu2  ;;  %v1115_v46 = vpop.f32.mrf.mxu0 }
 0x1a7   : > { %v1379_v44 = vpop.f32.mrf.mxu3  ;;  %v1291_v45 = vadd.f32 %v1290_v43, %v1202_v42  ;;  %v1204_v47 = vpop.f32.mrf.mxu1 }
 0x1a8   : > { %v1205_v51 = vadd.f32 %v1204_v47, %v1115_v46  ;;  %v416_v47 = vld [vmem:[#allocation2 + $0x70] sm:$0xff] }
 0x1a9   : > { %v1380_v49 = vadd.f32 %v1379_v44, %v1291_v45 }
 0x1ab   : > { %v1437_v50 = vadd.f32 %v1380_v49, %v409_v48 }
 0x1ad   : > { %1469 = vst [vmem:[#allocation2 + $0x78] sm:$0xff] %v1437_v50 }
 0x1ae   : > { %v1293_v52 = vpop.f32.mrf.mxu2  ;;  %v1117_v55 = vpop.f32.mrf.mxu0 }
 0x1af   : > { %v1382_v53 = vpop.f32.mrf.mxu3  ;;  %v1294_v54 = vadd.f32 %v1293_v52, %v1205_v51  ;;  %v1206_v56 = vpop.f32.mrf.mxu1 }
 0x1b0   : > { %v1207_v60 = vadd.f32 %v1206_v56, %v1117_v55  ;;  %v417_v56 = vld [vmem:[#allocation2 + $0xc0] sm:$0xff] }
 0x1b1   : > { %v1383_v58 = vadd.f32 %v1382_v53, %v1294_v54 }
 0x1b3   : > { %v1438_v59 = vadd.f32 %v1383_v58, %v410_v57 }
 0x1b5   : > { %1470 = vst [vmem:[#allocation2 + $0x38] sm:$0xff] %v1438_v59 }
 0x1b6   : > { %v1295_v61 = vpop.f32.mrf.mxu2  ;;  %v1120_v0 = vpop.f32.mrf.mxu0 }
 0x1b7   : > { %v1384_v62 = vpop.f32.mrf.mxu3  ;;  %v1296_v63 = vadd.f32 %v1295_v61, %v1207_v60  ;;  %v1209_v1 = vpop.f32.mrf.mxu1 }
 0x1b8   : > { %v1210_v5 = vadd.f32 %v1209_v1, %v1120_v0  ;;  %v418_v1 = vld [vmem:[#allocation2 + $0xa8] sm:$0xff] }
 0x1b9   : > { %v1385_v3 = vadd.f32 %v1384_v62, %v1296_v63 }
 0x1bb   : > { %v1439_v4 = vadd.f32 %v1385_v3, %v411_v2 }
 0x1bd   : > { %1471 = vst [vmem:[#allocation2 + $0x58] sm:$0xff] %v1439_v4 }
 0x1be   : > { %v1298_v6 = vpop.f32.mrf.mxu2  ;;  %v1122_v9 = vpop.f32.mrf.mxu0 }
 0x1bf   : > { %v1387_v7 = vpop.f32.mrf.mxu3  ;;  %v1299_v8 = vadd.f32 %v1298_v6, %v1210_v5  ;;  %v1211_v10 = vpop.f32.mrf.mxu1 }
 0x1c0   : > { %v1212_v14 = vadd.f32 %v1211_v10, %v1122_v9  ;;  %v419_v10 = vld [vmem:[#allocation2 + $0xd0] sm:$0xff] }
 0x1c1   : > { %v1388_v12 = vadd.f32 %v1387_v7, %v1299_v8 }
 0x1c3   : > { %v1440_v13 = vadd.f32 %v1388_v12, %v412_v11 }
 0x1c5   : > { %1472 = vst [vmem:[#allocation2 + $0x40] sm:$0xff] %v1440_v13 }
 0x1c6   : > { %v1300_v15 = vpop.f32.mrf.mxu2  ;;  %v1125_v18 = vpop.f32.mrf.mxu0 }
 0x1c7   : > { %v1389_v16 = vpop.f32.mrf.mxu3  ;;  %v1301_v17 = vadd.f32 %v1300_v15, %v1212_v14  ;;  %v1214_v19 = vpop.f32.mrf.mxu1 }
 0x1c8   : > { %v1215_v23 = vadd.f32 %v1214_v19, %v1125_v18  ;;  %v420_v19 = vld [vmem:[#allocation2 + $0x10] sm:$0xff] }
 0x1c9   : > { %v1390_v21 = vadd.f32 %v1389_v16, %v1301_v17 }
 0x1cb   : > { %v1441_v22 = vadd.f32 %v1390_v21, %v413_v20 }
 0x1cd   : > { %1473 = vst [vmem:[#allocation2 + $0xc8] sm:$0xff] %v1441_v22 }
 0x1ce   : > { %v1303_v24 = vpop.f32.mrf.mxu2  ;;  %v1127_v27 = vpop.f32.mrf.mxu0 }
 0x1cf   : > { %v1392_v25 = vpop.f32.mrf.mxu3  ;;  %v1304_v26 = vadd.f32 %v1303_v24, %v1215_v23  ;;  %v1216_v28 = vpop.f32.mrf.mxu1 }
 0x1d0   : > { %v1217_v32 = vadd.f32 %v1216_v28, %v1127_v27  ;;  %v421_v28 = vld [vmem:[#allocation2 + $0x28] sm:$0xff] }
 0x1d1   : > { %v1393_v30 = vadd.f32 %v1392_v25, %v1304_v26 }
 0x1d3   : > { %v1442_v31 = vadd.f32 %v1393_v30, %v414_v29 }
 0x1d5   : > { %1474 = vst [vmem:[#allocation2 + $0xe0] sm:$0xff] %v1442_v31 }
 0x1d6   : > { %v1305_v33 = vpop.f32.mrf.mxu2  ;;  %v1130_v36 = vpop.f32.mrf.mxu0 }
 0x1d7   : > { %v1394_v34 = vpop.f32.mrf.mxu3  ;;  %v1306_v35 = vadd.f32 %v1305_v33, %v1217_v32  ;;  %v1219_v37 = vpop.f32.mrf.mxu1 }
 0x1d8   : > { %v1220_v41 = vadd.f32 %v1219_v37, %v1130_v36  ;;  %v422_v37 = vld [vmem:[#allocation2 + $0xa0] sm:$0xff] }
 0x1d9   : > { %v1395_v39 = vadd.f32 %v1394_v34, %v1306_v35 }
 0x1db   : > { %v1443_v40 = vadd.f32 %v1395_v39, %v415_v38 }
 0x1dd   : > { %1475 = vst [vmem:[#allocation2 + $0x90] sm:$0xff] %v1443_v40 }
 0x1de   : > { %v1308_v42 = vpop.f32.mrf.mxu2  ;;  %v1132_v45 = vpop.f32.mrf.mxu0 }
 0x1df   : > { %v1397_v43 = vpop.f32.mrf.mxu3  ;;  %v1309_v44 = vadd.f32 %v1308_v42, %v1220_v41  ;;  %v1221_v46 = vpop.f32.mrf.mxu1 }
 0x1e0   : > { %v1222_v50 = vadd.f32 %v1221_v46, %v1132_v45 }
 0x1e1   : > { %v1398_v48 = vadd.f32 %v1397_v43, %v1309_v44  ;;  %v423_v44 = vld [vmem:[#allocation2 + $0xf8] sm:$0xff] }
 0x1e3   : > { %v1444_v49 = vadd.f32 %v1398_v48, %v416_v47 }
 0x1e5   : > { %1476 = vst [vmem:[#allocation2 + $0x70] sm:$0xff] %v1444_v49 }
 0x1e6   : > { %v1310_v51 = vpop.f32.mrf.mxu2  ;;  %v1135_v54 = vpop.f32.mrf.mxu0 }
 0x1e7   : > { %v1399_v52 = vpop.f32.mrf.mxu3  ;;  %v1311_v53 = vadd.f32 %v1310_v51, %v1222_v50  ;;  %v1224_v55 = vpop.f32.mrf.mxu1 }
 0x1e8   : > { %v1225_v59 = vadd.f32 %v1224_v55, %v1135_v54 }
 0x1e9   : > { %v1400_v57 = vadd.f32 %v1399_v52, %v1311_v53  ;;  %v424_v53 = vld [vmem:[#allocation2 + $0x20] sm:$0xff] }
 0x1eb   : > { %v1445_v58 = vadd.f32 %v1400_v57, %v417_v56 }
 0x1ed   : > { %1477 = vst [vmem:[#allocation2 + $0xc0] sm:$0xff] %v1445_v58 }
 0x1ee   : > { %v1313_v60 = vpop.f32.mrf.mxu2  ;;  %v1137_v63 = vpop.f32.mrf.mxu0 }
 0x1ef   : > { %v1402_v61 = vpop.f32.mrf.mxu3  ;;  %v1314_v62 = vadd.f32 %v1313_v60, %v1225_v59  ;;  %v1226_v0 = vpop.f32.mrf.mxu1 }
 0x1f0   : > { %v1227_v4 = vadd.f32 %v1226_v0, %v1137_v63 }
 0x1f1   : > { %v1403_v2 = vadd.f32 %v1402_v61, %v1314_v62  ;;  %v425_v61 = vld [vmem:[#allocation2 + $0x98] sm:$0xff] }
 0x1f3   : > { %v1446_v3 = vadd.f32 %v1403_v2, %v418_v1 }
 0x1f5   : > { %1478 = vst [vmem:[#allocation2 + $0xa8] sm:$0xff] %v1446_v3 }
 0x1f6   : > { %v1315_v5 = vpop.f32.mrf.mxu2  ;;  %v1140_v8 = vpop.f32.mrf.mxu0 }
 0x1f7   : > { %v1404_v6 = vpop.f32.mrf.mxu3  ;;  %v1316_v7 = vadd.f32 %v1315_v5, %v1227_v4  ;;  %v1229_v9 = vpop.f32.mrf.mxu1 }
 0x1f8   : > { %v1230_v13 = vadd.f32 %v1229_v9, %v1140_v8 }
 0x1f9   : > { %v1405_v11 = vadd.f32 %v1404_v6, %v1316_v7 }
 0x1fb   : > { %v1447_v12 = vadd.f32 %v1405_v11, %v419_v10 }
 0x1fd   : > { %1479 = vst [vmem:[#allocation2 + $0xd0] sm:$0xff] %v1447_v12 }
 0x1fe   : > { %v1318_v14 = vpop.f32.mrf.mxu2  ;;  %v1142_v17 = vpop.f32.mrf.mxu0 }
 0x1ff   : > { %v1407_v15 = vpop.f32.mrf.mxu3  ;;  %v1319_v16 = vadd.f32 %v1318_v14, %v1230_v13  ;;  %v1231_v18 = vpop.f32.mrf.mxu1 }
 0x200   : > { %v1232_v22 = vadd.f32 %v1231_v18, %v1142_v17 }
 0x201   : > { %v1408_v20 = vadd.f32 %v1407_v15, %v1319_v16 }
 0x203   : > { %v1448_v21 = vadd.f32 %v1408_v20, %v420_v19 }
 0x205   : > { %1480 = vst [vmem:[#allocation2 + $0x10] sm:$0xff] %v1448_v21 }
 0x206   : > { %v1320_v23 = vpop.f32.mrf.mxu2  ;;  %v1145_v26 = vpop.f32.mrf.mxu0 }
 0x207   : > { %v1409_v24 = vpop.f32.mrf.mxu3  ;;  %v1321_v25 = vadd.f32 %v1320_v23, %v1232_v22  ;;  %v1234_v27 = vpop.f32.mrf.mxu1 }
 0x208   : > { %v1235_v31 = vadd.f32 %v1234_v27, %v1145_v26 }
 0x209   : > { %v1410_v29 = vadd.f32 %v1409_v24, %v1321_v25 }
 0x20b   : > { %v1449_v30 = vadd.f32 %v1410_v29, %v421_v28 }
 0x20d   : > { %1481 = vst [vmem:[#allocation2 + $0x28] sm:$0xff] %v1449_v30 }
 0x20e   : > { %v1323_v32 = vpop.f32.mrf.mxu2  ;;  %v1147_v35 = vpop.f32.mrf.mxu0 }
 0x20f   : > { %v1412_v33 = vpop.f32.mrf.mxu3  ;;  %v1324_v34 = vadd.f32 %v1323_v32, %v1235_v31  ;;  %v1236_v36 = vpop.f32.mrf.mxu1 }
 0x210   : > { %v1237_v40 = vadd.f32 %v1236_v36, %v1147_v35 }
 0x211   : > { %v1413_v38 = vadd.f32 %v1412_v33, %v1324_v34 }
 0x213   : > { %v1450_v39 = vadd.f32 %v1413_v38, %v422_v37 }
 0x215   : > { %1482 = vst [vmem:[#allocation2 + $0xa0] sm:$0xff] %v1450_v39 }
 0x216   : > { %v1325_v41 = vpop.f32.mrf.mxu2  ;;  %v1150_v45 = vpop.f32.mrf.mxu0 }
 0x217   : > { %v1414_v42 = vpop.f32.mrf.mxu3  ;;  %v1326_v43 = vadd.f32 %v1325_v41, %v1237_v40  ;;  %v1239_v46 = vpop.f32.mrf.mxu1 }
 0x218   : > { %v1240_v49 = vadd.f32 %v1239_v46, %v1150_v45 }
 0x219   : > { %v1415_v47 = vadd.f32 %v1414_v42, %v1326_v43 }
 0x21b   : > { %v1451_v48 = vadd.f32 %v1415_v47, %v423_v44 }
 0x21d   : > { %1483 = vst [vmem:[#allocation2 + $0xf8] sm:$0xff] %v1451_v48 }
 0x21e   : > { %v1328_v50 = vpop.f32.mrf.mxu2  ;;  %v1152_v55 = vpop.f32.mrf.mxu0 }
 0x21f   : > { %v1417_v51 = vpop.f32.mrf.mxu3  ;;  %v1329_v52 = vadd.f32 %v1328_v50, %v1240_v49  ;;  %v1241_v56 = vpop.f32.mrf.mxu1 }
 0x220   : > { %v1242_v58 = vadd.f32 %v1241_v56, %v1152_v55 }
 0x221   : > { %v1418_v54 = vadd.f32 %v1417_v51, %v1329_v52 }
 0x223   : > { %v1452_v57 = vadd.f32 %v1418_v54, %v424_v53 }
 0x225   : > { %1484 = vst [vmem:[#allocation2 + $0x20] sm:$0xff] %v1452_v57 }
 0x226   : > { %v1330_v59 = vpop.f32.mrf.mxu2 }
 0x227   : > { %v1331_v60 = vadd.f32 %v1330_v59, %v1242_v58  ;;  %v1419_v62 = vpop.f32.mrf.mxu3 }
 0x229   : > { %v1420_v63 = vadd.f32 %v1419_v62, %v1331_v60  ;;  %1489 = sbr.rel (%p2059_p13) target bundleno = 591 (0x24f), region = 59 }
 0x22b   : > { %v1453_v0 = vadd.f32 %v1420_v63, %v425_v61 }
 0x22d   : > { %1485 = vst [vmem:[#allocation2 + $0x98] sm:$0xff] %v1453_v0 }
 0x22e   : > { %v1490_v1 = vld [vmem:[#allocation2 + $0xb0] sm:$0xff]  ;;  %v1491_v2 = vld [vmem:[#allocation2] sm:$0xff]  ;;  %v1492_v3 = vld [vmem:[#allocation2 + $0xd8] sm:$0xff] }
 0x22f   : > { %1522 = vst [vmem:[%s2493_s26] sm:$0xff] %v1490_v1  ;;  %v1493_v4 = vld [vmem:[#allocation2 + $0x18] sm:$0xff]  ;;  %v1494_v5 = vld [vmem:[#allocation2 + $0x50] sm:$0xff]  ;;  %v1495_v6 = vld [vmem:[#allocation2 + $0x68] sm:$0xff] }
 0x230   : > { %1523 = vst [vmem:[%s2493_s26 + $0x8] sm:$0xff] %v1491_v2  ;;  %v1496_v7 = vld [vmem:[#allocation2 + $0x30] sm:$0xff]  ;;  %v1497_v8 = vld [vmem:[#allocation2 + $0x48] sm:$0xff]  ;;  %v1498_v9 = vld [vmem:[#allocation2 + $0x80] sm:$0xff] }
 0x231   : > { %1524 = vst [vmem:[%s2493_s26 + $0x10] sm:$0xff] %v1492_v3  ;;  %v1499_v10 = vld [vmem:[#allocation2 + $0x88] sm:$0xff]  ;;  %v1501_v12 = vld [vmem:[#allocation2 + $0xb8] sm:$0xff]  ;;  %v1502_v13 = vld [vmem:[#allocation2 + $0x60] sm:$0xff] }
 0x232   : > { %1525 = vst [vmem:[%s2493_s26 + $0x18] sm:$0xff] %v1493_v4  ;;  %v1500_v11 = vld [vmem:[#allocation2 + $0xe8] sm:$0xff]  ;;  %v1503_v14 = vld [vmem:[#allocation2 + $0xf0] sm:$0xff]  ;;  %v1505_v16 = vld [vmem:[#allocation2 + $0x78] sm:$0xff] }
 0x233   : > { %1526 = vst [vmem:[%s2493_s26 + $0x20] sm:$0xff] %v1494_v5  ;;  %v1504_v15 = vld [vmem:[#allocation2 + $0x8] sm:$0xff]  ;;  %v1506_v17 = vld [vmem:[#allocation2 + $0x38] sm:$0xff]  ;;  %v1508_v19 = vld [vmem:[#allocation2 + $0x40] sm:$0xff] }
 0x234   : > { %1527 = vst [vmem:[%s2493_s26 + $0x28] sm:$0xff] %v1495_v6  ;;  %v1507_v18 = vld [vmem:[#allocation2 + $0x58] sm:$0xff]  ;;  %v1509_v20 = vld [vmem:[#allocation2 + $0xc8] sm:$0xff]  ;;  %v1510_v21 = vld [vmem:[#allocation2 + $0xe0] sm:$0xff] }
 0x235   : > { %1528 = vst [vmem:[%s2493_s26 + $0x30] sm:$0xff] %v1496_v7  ;;  %v1511_v22 = vld [vmem:[#allocation2 + $0x90] sm:$0xff]  ;;  %v1513_v24 = vld [vmem:[#allocation2 + $0xc0] sm:$0xff]  ;;  %v1514_v25 = vld [vmem:[#allocation2 + $0xa8] sm:$0xff] }
 0x236   : > { %1529 = vst [vmem:[%s2493_s26 + $0x38] sm:$0xff] %v1497_v8  ;;  %v1512_v23 = vld [vmem:[#allocation2 + $0x70] sm:$0xff]  ;;  %v1517_v28 = vld [vmem:[#allocation2 + $0x28] sm:$0xff]  ;;  %v1518_v29 = vld [vmem:[#allocation2 + $0xa0] sm:$0xff] }
 0x237   : > { %1530 = vst [vmem:[%s2493_s26 + $0x40] sm:$0xff] %v1498_v9  ;;  %v1515_v26 = vld [vmem:[#allocation2 + $0xd0] sm:$0xff]  ;;  %v1519_v30 = vld [vmem:[#allocation2 + $0xf8] sm:$0xff]  ;;  %v1520_v31 = vld [vmem:[#allocation2 + $0x20] sm:$0xff] }
 0x238   : > { %1531 = vst [vmem:[%s2493_s26 + $0x48] sm:$0xff] %v1499_v10  ;;  %v1516_v27 = vld [vmem:[#allocation2 + $0x10] sm:$0xff]  ;;  %v1521_v32 = vld [vmem:[#allocation2 + $0x98] sm:$0xff] }
 0x239   : > { %1532 = vst [vmem:[%s2493_s26 + $0x50] sm:$0xff] %v1500_v11 }
 0x23a   : > { %1533 = vst [vmem:[%s2493_s26 + $0x58] sm:$0xff] %v1501_v12 }
 0x23b   : > { %1534 = vst [vmem:[%s2493_s26 + $0x60] sm:$0xff] %v1502_v13 }
 0x23c   : > { %1535 = vst [vmem:[%s2493_s26 + $0x68] sm:$0xff] %v1503_v14 }
 0x23d   : > { %1536 = vst [vmem:[%s2493_s26 + $0x70] sm:$0xff] %v1504_v15 }
 0x23e   : > { %1537 = vst [vmem:[%s2493_s26 + $0x78] sm:$0xff] %v1505_v16 }
 0x23f   : > { %1538 = vst [vmem:[%s2493_s26 + $0x80] sm:$0xff] %v1506_v17 }
 0x240   : > { %1539 = vst [vmem:[%s2493_s26 + $0x88] sm:$0xff] %v1507_v18 }
 0x241   : > { %1540 = vst [vmem:[%s2493_s26 + $0x90] sm:$0xff] %v1508_v19 }
 0x242   : > { %1541 = vst [vmem:[%s2493_s26 + $0x98] sm:$0xff] %v1509_v20 }
 0x243   : > { %1542 = vst [vmem:[%s2493_s26 + $0xa0] sm:$0xff] %v1510_v21 }
 0x244   : > { %1543 = vst [vmem:[%s2493_s26 + $0xa8] sm:$0xff] %v1511_v22 }
 0x245   : > { %1544 = vst [vmem:[%s2493_s26 + $0xb0] sm:$0xff] %v1512_v23 }
 0x246   : > { %1545 = vst [vmem:[%s2493_s26 + $0xb8] sm:$0xff] %v1513_v24 }
 0x247   : > { %1546 = vst [vmem:[%s2493_s26 + $0xc0] sm:$0xff] %v1514_v25 }
 0x248   : > { %1547 = vst [vmem:[%s2493_s26 + $0xc8] sm:$0xff] %v1515_v26 }
 0x249   : > { %1548 = vst [vmem:[%s2493_s26 + $0xd0] sm:$0xff] %v1516_v27 }
 0x24a   : > { %1549 = vst [vmem:[%s2493_s26 + $0xd8] sm:$0xff] %v1517_v28 }
 0x24b   : > { %1550 = vst [vmem:[%s2493_s26 + $0xe0] sm:$0xff] %v1518_v29 }
 0x24c   : > { %1551 = vst [vmem:[%s2493_s26 + $0xe8] sm:$0xff] %v1519_v30 }
 0x24d   : > { %1552 = vst [vmem:[%s2493_s26 + $0xf0] sm:$0xff] %v1520_v31 }
 0x24e   : > { %1553 = vst [vmem:[%s2493_s26 + $0xf8] sm:$0xff] %v1521_v32 }
 0x24f PF: > { %s12_s15 = sadd.s32 1, %s2270_s15   ;;  %s2715_s9 = smov %s2250_s10 }
 0x250   : > { %p9_p0 = scmp.ge.s32.totalorder %s12_s15, 6   ;;  %s2716_s10 = smov %s2339_s22 }
 0x251   : > { %s2717_s11 = smov %s2262_s13  ;;  %s2718_s12 = smov %s2266_s14 }
 0x252   : > { %s2719_s13 = smov %s2722_s16  ;;  %s2720_s14 = smov %s2726_s17 }
 0x253   :  { %11 = sbr.rel (!%p9_p0) target bundleno = 4 (0x4), region = 97 }

// kernel: sub.8
= control target key start
LH: loop header
LB: loop body
LE: loop exit
PB: predicated region body
PF: predicated region fallthrough
CT: control target
= control target key end

     0   :  { %s7_s6 = smov 3  ;;  %s21_s9 = smov 3  ;;  %vm4_vm0 = vcmask 64512   ;;  %vm11_vm1 = vcmask 523712   ;;  %vm18_vm2 = vcmask 458112   ;;  %vm25_vm3 = vcmask 392512   ;;  %s119_s0 = inlined_call_operand.vmem [shape: s32[2,8,8], index: 0, kind: input, shape index: {}]   ;;  %s120_s1 = inlined_call_operand.vmem [shape: s32[2,64], index: 1, kind: output, shape index: {}]  }
   0x1   :  { %v61_v0 = vld [vmem:[%s119_s0 + $0x7] ss:$8 sm:%s7_s6]   ;;  %s75_s10 = smov 56   ;;  %v63_v1 = vld [vmem:[%s119_s0 + $0x5] ss:$8 sm:%s21_s9]   ;;  %s76_s13 = smov 40  }
   0x2   :  { %9 = vrot.lane.b32.xlu0 %v61_v0, %s75_s10  ;;  %23 = vrot.lane.b32.xlu1 %v63_v1, %s76_s13  ;;  %s14_s14 = smov 3  ;;  %s28_s15 = smov 3  ;;  %vm32_vm4 = vcmask 326912   ;;  %vm39_vm5 = vcmask 261312   ;;  %vm46_vm6 = vcmask 195712   ;;  %vm53_vm7 = vcmask 130112  }
   0x3   :  { %s35_s16 = smov 3  ;;  %v62_v3 = vld [vmem:[%s119_s0 + $0x6] ss:$8 sm:%s14_s14]   ;;  %s77_s21 = smov 24   ;;  %v64_v4 = vld [vmem:[%s119_s0 + $0x4] ss:$8 sm:%s28_s15]  }
   0x4   :  { %v65_v2 = vld [vmem:[%s119_s0 + $0x3] ss:$8 sm:%s35_s16]   ;;  %s42_s24 = smov 3  ;;  %s78_s25 = smov 48  }
   0x5   :  { %37 = vrot.lane.b32.xlu2 %v65_v2, %s77_s21  ;;  %s79_s26 = smov 32   ;;  %s49_s27 = smov 3  ;;  %v66_v5 = vld [vmem:[%s119_s0 + $0x2] ss:$8 sm:%s42_s24]  }
   0x6   :  { %v67_v6 = vld [vmem:[%s119_s0 + $0x1] ss:$8 sm:%s49_s27]   ;;  %s80_s3 = smov 16   ;;  %s81_s4 = smov 8  }
   0x7   :  { %s2_s5 = smov 3 }
   0x8   :  { %v3_v7 = vld [vmem:[%s119_s0] ss:$8 sm:%s2_s5]  }
   0x9   :  { %5 = vst.msk [vmem:[#allocation0] sm:$0x3] %vm4_vm0, %v3_v7  }
   0xa   :  { %16 = vrot.lane.b32.xlu0 %v62_v3, %s78_s25  ;;  %30 = vrot.lane.b32.xlu1 %v64_v4, %s79_s26 }
   0xd   :  { %44 = vrot.lane.b32.xlu2 %v66_v5, %s80_s3 }
  0x12   :  { %51 = vrot.lane.b32.xlu0 %v67_v6, %s81_s4 }
  0x5f   :  { %v38_v8 = vpop.permute.xlu2 %37  }
  0x67   :  { %v45_v9 = vpop.permute.xlu2 %44  }
  0x74   :  { %v10_v10 = vpop.permute.xlu0 %9   ;;  %v24_v11 = vpop.permute.xlu1 %23  }
  0x75   :  { %12 = vst.msk [vmem:[#allocation0] sm:$0x3] %vm11_vm1, %v10_v10  }
  0x7c   :  { %v17_v12 = vpop.permute.xlu0 %16   ;;  %v31_v13 = vpop.permute.xlu1 %30  }
  0x7d   :  { %19 = vst.msk [vmem:[#allocation0] sm:$0x3] %vm18_vm2, %v17_v12  }
  0x7e   :  { %26 = vst.msk [vmem:[#allocation0] sm:$0x3] %vm25_vm3, %v24_v11  }
  0x7f   :  { %33 = vst.msk [vmem:[#allocation0] sm:$0x3] %vm32_vm4, %v31_v13  }
  0x80   :  { %40 = vst.msk [vmem:[#allocation0] sm:$0x3] %vm39_vm5, %v38_v8  }
  0x81   :  { %47 = vst.msk [vmem:[#allocation0] sm:$0x3] %vm46_vm6, %v45_v9  }
  0x84   :  { %v52_v14 = vpop.permute.xlu0 %51  }
  0x85   :  { %54 = vst.msk [vmem:[#allocation0] sm:$0x3] %vm53_vm7, %v52_v14  }
  0x8c   :  { %v57_v15 = vld [vmem:[#allocation0] sm:$0x3] }
  0x8d   :  { %60 = vst [vmem:[%s120_s1] sm:$0x3] %v57_v15 }

// kernel: attention_forward.3
= control target key start
LH: loop header
LB: loop body
LE: loop exit
PB: predicated region body
PF: predicated region fallthrough
CT: control target
= control target key end

     0   :  { %s1977_s15 = smov 0   ;;  %s1979_s16 = smov 0   ;;  %s3165_s0 = inlined_call_operand.vmem [shape: f32[2,4,4,64,8], index: 0, kind: input, shape index: {}]   ;;  %s3166_s1 = inlined_call_operand.vmem [shape: f32[2,4,4,8,64], index: 1, kind: input, shape index: {}]   ;;  %s3167_s2 = inlined_call_operand.vmem [shape: f32[2,4,4,8,64], index: 2, kind: input, shape index: {}]   ;;  %s3168_s3 = inlined_call_operand.vmem [shape: f32[4,64,64], index: 3, kind: input, shape index: {}]   ;;  %s3169_s4 = inlined_call_operand.vmem [shape: f32[2,4,4,8,64], index: 4, kind: output, shape index: {}]  }
   0x1   :  { %s1981_s17 = smov 0   ;;  %s1983_s18 = smov 0  }
   0x2   :  { %s1985_s19 = smov 0  }
   0x3 LB: > { %s23_s20 = sadd.s32 1, %s1942_s17  ;;  %s26_s21 = sadd.s32 1, %s1946_s18  ;;  %s1950_s19 = sphi %s1985_s19, %s14_s19   ;;  %s1946_s18 = sphi %s1983_s18, %s3254_s18   ;;  %s1942_s17 = sphi %s1981_s17, %s3253_s17   ;;  %s1938_s16 = sphi %s1979_s16, %s3252_s16   ;;  %s1934_s15 = sphi %s1977_s15, %s3251_s15  }
   0x4   : > { %p24_p0 = scmp.ge.s32.totalorder %s23_s20, 4  ;;  %p1739_p1 = scmp.ge.s32.totalorder %s1950_s19, 1 }
   0x5   : > { %p224_p2 = scmp.lt.s32.totalorder %s1950_s19, 9 }
   0x6   : > { %s3256_s20 = smov (%p24_p0, %s23_s20), 0  ;;  %s3258_s21 = smov (!%p24_p0, %s26_s21), %s1946_s18 }
   0x7   : > { %p225_p3 = pnand %p1739_p1, %p224_p2  ;;  %p28_p4 = scmp.ge.s32.totalorder %s3258_s21, 2 }
   0x8   : > { %p281_p5 = scmp.lt.s32.totalorder (!%p225_p3), %s1938_s16, 1  ;;  %p283_p6 = scmp.lt.s32.totalorder (!%p225_p3), %s1934_s15, 3 }
   0x9   : > { %s3260_s21 = smov (%p28_p4, %s3258_s21), 0  ;;  %228 = sbr.rel (%p225_p3) target bundleno = 588 (0x24c), region = 36 }
   0xe   : > { %s3262_s16 = smov (!%p281_p5, %s1938_s16), 1  ;;  %s3264_s15 = smov (!%p283_p6, %s1934_s15), 3  ;;  %vm3170_vm0 = vcmask 523264   ;;  %vm403_vm1 = vcmask 64512   ;;  %vm1097_vm5 = vcmask 1043456  }
   0xf   : > { %s1744_s22 = sshll.u32 %s3262_s16, 4  ;;  %s1743_s23 = sshll.u32 %s3264_s15, 2 }
  0x10   : > { %s1741_s24 = sshll.u32 %s3262_s16, 7  ;;  %s1740_s25 = sshll.u32 %s3264_s15, 5 }
  0x11   : > { %s296_s26 = sadd.s32 %s1744_s22, %s1743_s23  ;;  %s287_s5 = sadd.s32 %s1741_s24, %s1740_s25 }
  0x12   : > { %s2011_s27 = sshll.u32 %s296_s26, 3  ;;  %s1742_s6 = sshll.u32 %s287_s5, 3 }
  0x13   : > { %s2017_s30 = scalar_lea.vmem %s3166_s1, %s2011_s27  ;;  %s2027_s9 = scalar_lea.vmem %s3165_s0, %s1742_s6 }
  0x14   : > { %v2020_v0 = vld [vmem:[%s2017_s30 + $0x10] sm:$0xff]  ;;  %v2030_v2 = vld [vmem:[%s2017_s30 + $0x18] sm:$0xff]  ;;  %v2034_v4 = vld [vmem:[%s2027_s9 + $0xc0] sm:$0xff]  ;;  %s1776_s10 = sshll.u32 %s3264_s15, 6  ;;  %s307_s16 = scalar_lea.vmem %s3167_s2, %s2011_s27 }
  0x15   : > { %v886_v1 = vmul.f32 %v2020_v0, %v2020_v0  ;;  %v2037_v5 = vld [vmem:[%s2027_s9 + $0x80] sm:$0xff]  ;;  %v395_v6 = vmul.f32 %v2034_v4, %v2034_v4  ;;  %v887_v8 = vmul.f32 %v2030_v2, %v2030_v2  ;;  %v2046_v9 = vld [vmem:[%s2027_s9 + $0xc8] sm:$0xff]  ;;  %v2095_v34 = vld [vmem:[%s2027_s9 + $0xd0] sm:$0xff]  ;;  %s2918_s13 = scalar_lea.vmem %s3168_s3, %s1776_s10  ;;  %s321_s24 = scalar_lea.vmem %s3169_s4, %s2011_s27 }
  0x16   : > { %v387_v7 = vmul.f32 %v2037_v5, %v2037_v5  ;;  %v2049_v10 = vld [vmem:[%s2027_s9 + $0x88] sm:$0xff]  ;;  %v396_v13 = vmul.f32 %v2046_v9, %v2046_v9  ;;  %v2059_v16 = vld [vmem:[%s2027_s9 + $0x40] sm:$0xff]  ;;  %v397_v37 = vmul.f32 %v2095_v34, %v2095_v34  ;;  %v2102_v38 = vld [vmem:[%s2027_s9 + $0x98] sm:$0xff] }
  0x17   : > { %v895_v3 = vsel %vm3170_vm0, %v886_v1, 0.0  ;;  %v476_v11 = vsel %vm403_vm1, %v395_v6, 0.0  ;;  %v388_v14 = vmul.f32 %v2049_v10, %v2049_v10  ;;  %v898_v15 = vsel %vm3170_vm0, %v887_v8, 0.0  ;;  %v2066_v20 = vld [vmem:[%s2027_s9 + $0x8] sm:$0xff]  ;;  %v2069_v21 = vld [vmem:[%s2027_s9] sm:$0xff]  ;;  %v2105_v39 = vld [vmem:[%s2027_s9 + $0x90] sm:$0xff] }
  0x18   : > { %896 = vadd.xlane.f32.xlu2 %v895_v3  ;;  %v452_v12 = vsel %vm403_vm1, %v387_v7, 0.0  ;;  %477 = vadd.xlane.f32.xlu1 %v476_v11  ;;  %v479_v17 = vsel %vm403_vm1, %v396_v13, 0.0  ;;  %v379_v19 = vmul.f32 %v2059_v16, %v2059_v16  ;;  %v372_v22 = vmul.f32 %v2066_v20, %v2066_v20  ;;  %v2077_v25 = vld [vmem:[%s2017_s30 + $0x8] sm:$0xff]  ;;  %v2084_v29 = vld [vmem:[%s2017_s30] sm:$0xff]  ;;  %v2113_v43 = vld [vmem:[%s2027_s9 + $0x18] sm:$0xff] }
  0x19   : > { %453 = vadd.xlane.f32.xlu0 %v452_v12  ;;  %v455_v18 = vsel %vm403_vm1, %v388_v14, 0.0  ;;  %v371_v23 = vmul.f32 %v2069_v21, %v2069_v21  ;;  %v885_v28 = vmul.f32 %v2077_v25, %v2077_v25  ;;  %v2087_v30 = vld [vmem:[%s2027_s9 + $0x48] sm:$0xff]  ;;  %v884_v31 = vmul.f32 %v2084_v29, %v2084_v29  ;;  %v2120_v47 = vld [vmem:[%s2027_s9 + $0x10] sm:$0xff]  ;;  %v2123_v48 = vld [vmem:[%s2027_s9 + $0xd8] sm:$0xff] }
  0x1a   : > { %v428_v24 = vsel %vm403_vm1, %v379_v19, 0.0  ;;  %v407_v26 = vsel %vm403_vm1, %v372_v22, 0.0  ;;  %v380_v32 = vmul.f32 %v2087_v30, %v2087_v30  ;;  %v390_v40 = vmul.f32 %v2102_v38, %v2102_v38  ;;  %v343_v52 = vld [vmem:[%s2027_s9 + $0xa0] sm:$0xff]  ;;  %v2134_v56 = vld [vmem:[%s2027_s9 + $0x58] sm:$0xff]  ;;  %v2137_v57 = vld [vmem:[%s2027_s9 + $0x50] sm:$0xff] }
  0x1b   : > { %v404_v27 = vsel %vm403_vm1, %v371_v23, 0.0  ;;  %v892_v33 = vsel %vm3170_vm0, %v885_v28, 0.0  ;;  %v889_v35 = vsel %vm3170_vm0, %v884_v31, 0.0  ;;  %v389_v41 = vmul.f32 %v2105_v39, %v2105_v39  ;;  %v352_v61 = vld [vmem:[%s2027_s9 + $0xe8] sm:$0xff]  ;;  %v351_v3 = vld [vmem:[%s2027_s9 + $0xe0] sm:$0xff]  ;;  %v345_v31 = vld [vmem:[%s2027_s9 + $0xb0] sm:$0xff] }
  0x1c   : > { %v431_v36 = vsel %vm403_vm1, %v380_v32, 0.0  ;;  %v482_v42 = vsel %vm403_vm1, %v397_v37, 0.0  ;;  %v461_v44 = vsel %vm403_vm1, %v390_v40, 0.0  ;;  %v374_v46 = vmul.f32 %v2113_v43, %v2113_v43  ;;  %v2149_v6 = vld [vmem:[%s2027_s9 + $0xa8] sm:$0xff]  ;;  %v335_v12 = vld [vmem:[%s2027_s9 + $0x60] sm:$0xff]  ;;  %v329_v37 = vld [vmem:[%s2027_s9 + $0x30] sm:$0xff] }
  0x1d   : > { %v458_v45 = vsel %vm403_vm1, %v389_v41, 0.0  ;;  %v373_v49 = vmul.f32 %v2120_v47, %v2120_v47  ;;  %v398_v50 = vmul.f32 %v2123_v48, %v2123_v48  ;;  %v391_v55 = vmul.f32 %v343_v52, %v343_v52  ;;  %v336_v32 = vld [vmem:[%s2027_s9 + $0x68] sm:$0xff] }
  0x1e   : > { %v413_v51 = vsel %vm403_vm1, %v374_v46, 0.0  ;;  %v382_v58 = vmul.f32 %v2134_v56, %v2134_v56  ;;  %v381_v59 = vmul.f32 %v2137_v57, %v2137_v57  ;;  %v400_v1 = vmul.f32 %v352_v61, %v352_v61 }
  0x1f   : > { %v410_v53 = vsel %vm403_vm1, %v373_v49, 0.0  ;;  %v485_v54 = vsel %vm403_vm1, %v398_v50, 0.0  ;;  %v464_v60 = vsel %vm403_vm1, %v391_v55, 0.0  ;;  %v399_v7 = vmul.f32 %v351_v3, %v351_v3  ;;  %v337_v55 = vld [vmem:[%s2027_s9 + $0x70] sm:$0xff] }
  0x20   : > { %899 = vadd.xlane.f32.xlu2 %v898_v15  ;;  %480 = vadd.xlane.f32.xlu1 %v479_v17  ;;  %v437_v62 = vsel %vm403_vm1, %v382_v58, 0.0  ;;  %v434_v63 = vsel %vm403_vm1, %v381_v59, 0.0  ;;  %v392_v8 = vmul.f32 %v2149_v6, %v2149_v6  ;;  %v491_v11 = vsel %vm403_vm1, %v400_v1, 0.0  ;;  %v328_v17 = vld [vmem:[%s2027_s9 + $0x28] sm:$0xff]  ;;  %v330_v58 = vld [vmem:[%s2027_s9 + $0x38] sm:$0xff] }
  0x21   : > { %456 = vadd.xlane.f32.xlu0 %v455_v18  ;;  %v488_v13 = vsel %vm403_vm1, %v399_v7, 0.0  ;;  %v383_v15 = vmul.f32 %v335_v12, %v335_v12  ;;  %v327_v18 = vld [vmem:[%s2027_s9 + $0x20] sm:$0xff]  ;;  %v376_v19 = vmul.f32 %v328_v17, %v328_v17  ;;  %v385_v59 = vmul.f32 %v337_v55, %v337_v55 }
  0x22   : > { %v467_v14 = vsel %vm403_vm1, %v392_v8, 0.0  ;;  %v375_v22 = vmul.f32 %v327_v18, %v327_v18 }
  0x23   : > { %v440_v23 = vsel %vm403_vm1, %v383_v15, 0.0 }
  0x28   : > { %429 = vadd.xlane.f32.xlu2 %v428_v24  ;;  %408 = vadd.xlane.f32.xlu1 %v407_v26  ;;  %v346_v24 = vld [vmem:[%s2027_s9 + $0xb8] sm:$0xff]  ;;  %v419_v26 = vsel %vm403_vm1, %v376_v19, 0.0 }
  0x29   : > { %405 = vadd.xlane.f32.xlu0 %v404_v27  ;;  %v416_v27 = vsel %vm403_vm1, %v375_v22, 0.0  ;;  %v394_v28 = vmul.f32 %v346_v24, %v346_v24 }
  0x30   : > { %893 = vadd.xlane.f32.xlu2 %v892_v33  ;;  %890 = vadd.xlane.f32.xlu1 %v889_v35  ;;  %v393_v33 = vmul.f32 %v345_v31, %v345_v31  ;;  %v384_v35 = vmul.f32 %v336_v32, %v336_v32 }
  0x31   : > { %432 = vadd.xlane.f32.xlu0 %v431_v36  ;;  %v473_v36 = vsel %vm403_vm1, %v394_v28, 0.0 }
  0x32   : > { %v470_v40 = vsel %vm403_vm1, %v393_v33, 0.0  ;;  %v443_v41 = vsel %vm403_vm1, %v384_v35, 0.0 }
  0x38   : > { %483 = vadd.xlane.f32.xlu2 %v482_v42  ;;  %462 = vadd.xlane.f32.xlu1 %v461_v44  ;;  %v377_v42 = vmul.f32 %v329_v37, %v329_v37  ;;  %v354_v44 = vld [vmem:[%s2027_s9 + $0xf8] sm:$0xff] }
  0x39   : > { %459 = vadd.xlane.f32.xlu0 %v458_v45  ;;  %v353_v45 = vld [vmem:[%s2027_s9 + $0xf0] sm:$0xff]  ;;  %v402_v46 = vmul.f32 %v354_v44, %v354_v44 }
  0x3a   : > { %v401_v49 = vmul.f32 %v353_v45, %v353_v45  ;;  %v422_v50 = vsel %vm403_vm1, %v377_v42, 0.0 }
  0x3b   : > { %v497_v52 = vsel %vm403_vm1, %v402_v46, 0.0 }
  0x40   : > { %414 = vadd.xlane.f32.xlu2 %v413_v51  ;;  %411 = vadd.xlane.f32.xlu1 %v410_v53  ;;  %v338_v51 = vld [vmem:[%s2027_s9 + $0x78] sm:$0xff]  ;;  %v494_v53 = vsel %vm403_vm1, %v401_v49, 0.0 }
  0x41   : > { %486 = vadd.xlane.f32.xlu0 %v485_v54  ;;  %v386_v54 = vmul.f32 %v338_v51, %v338_v51 }
  0x43   : > { %v449_v61 = vsel %vm403_vm1, %v386_v54, 0.0 }
  0x48   : > { %465 = vadd.xlane.f32.xlu2 %v464_v60  ;;  %438 = vadd.xlane.f32.xlu1 %v437_v62  ;;  %v378_v60 = vmul.f32 %v330_v58, %v330_v58  ;;  %v446_v62 = vsel %vm403_vm1, %v385_v59, 0.0 }
  0x49   : > { %435 = vadd.xlane.f32.xlu0 %v434_v63 }
  0x4a   : > { %v425_v63 = vsel %vm403_vm1, %v378_v60, 0.0 }
  0x50   : > { %492 = vadd.xlane.f32.xlu2 %v491_v11  ;;  %489 = vadd.xlane.f32.xlu1 %v488_v13 }
  0x51   : > { %468 = vadd.xlane.f32.xlu0 %v467_v14 }
  0x58   : > { %441 = vadd.xlane.f32.xlu2 %v440_v23  ;;  %420 = vadd.xlane.f32.xlu1 %v419_v26 }
  0x59   : > { %417 = vadd.xlane.f32.xlu0 %v416_v27 }
  0x60   : > { %474 = vadd.xlane.f32.xlu2 %v473_v36  ;;  %471 = vadd.xlane.f32.xlu1 %v470_v40 }
  0x61   : > { %444 = vadd.xlane.f32.xlu0 %v443_v41 }
  0x68   : > { %423 = vadd.xlane.f32.xlu2 %v422_v50  ;;  %498 = vadd.xlane.f32.xlu1 %v497_v52 }
  0x69   : > { %495 = vadd.xlane.f32.xlu0 %v494_v53 }
  0x70   : > { %450 = vadd.xlane.f32.xlu2 %v449_v61  ;;  %447 = vadd.xlane.f32.xlu1 %v446_v62 }
  0x71   : > { %426 = vadd.xlane.f32.xlu0 %v425_v63 }
  0x8b   : > { %v897_v1 = vpop.xlane.xlu2 %896  ;;  %v478_v7 = vpop.xlane.xlu1 %477 }
  0x8c   : > { %v903_v3 = vmax.f32 %v897_v1, 1e-24  ;;  %v454_v8 = vpop.xlane.xlu0 %453  ;;  %v2182_v12 = vmax.f32 %v478_v7, 1e-24 }
  0x8d   : > { %v2180_v11 = vmax.f32 %v454_v8, 1e-24 }
  0x8e   : > { %1817 = vrsqrt.f32 %v903_v3  ;;  %vm931_vm3 = vweird.f32 %v903_v3  ;;  %vm778_vm15 = vweird.f32 %v2182_v12 }
  0x8f   : > { %1819 = vrsqrt.f32 %v2180_v11  ;;  %vm698_vm8 = vweird.f32 %v2180_v11 }
  0x90   : > { %1821 = vrsqrt.f32 %v2182_v12 }
  0x93   : > { %v900_v13 = vpop.xlane.xlu2 %899  ;;  %v481_v18 = vpop.xlane.xlu1 %480 }
  0x94   : > { %v1818_v14 = vpop.eup %1817  ;;  %v2185_v15 = vmax.f32 %v900_v13, 1e-24  ;;  %v457_v19 = vpop.xlane.xlu0 %456  ;;  %v2189_v23 = vmax.f32 %v481_v18, 1e-24 }
  0x95   : > { %v926_v17 = vmul.f32 %v1818_v14, %v903_v3  ;;  %v2191_v24 = vmax.f32 %v457_v19, 1e-24  ;;  %v2193_v26 = vpop.eup %1819  ;;  %vm932_vm2 = vweird.f32 %v1818_v14 }
  0x96   : > { %1823 = vrsqrt.f32 %v2185_v15  ;;  %v693_v28 = vmul.f32 %v2193_v26, %v2180_v11  ;;  %v2199_v31 = vpop.eup %1821  ;;  %vm933_vm4 = vmor %vm931_vm3, %vm932_vm2  ;;  %vm699_vm6 = vweird.f32 %v2193_v26  ;;  %vm941_vm10 = vweird.f32 %v2185_v15 }
  0x97   : > { %v927_v22 = vmul.f32 %v1818_v14, %v926_v17  ;;  %1825 = vrsqrt.f32 %v2189_v23  ;;  %v773_v42 = vmul.f32 %v2199_v31, %v2182_v12  ;;  %vm2231_vm9 = vmor %vm698_vm8, %vm699_vm6  ;;  %vm708_vm13 = vweird.f32 %v2191_v24 }
  0x98   : > { %1827 = vrsqrt.f32 %v2191_v24  ;;  %v694_v33 = vmul.f32 %v2193_v26, %v693_v28  ;;  %vm779_vm2 = vweird.f32 %v2199_v31  ;;  %vm788_vm6 = vweird.f32 %v2189_v23 }
  0x99   : > { %v928_v27 = vmul.f32 0.5, %v927_v22  ;;  %v774_v58 = vmul.f32 %v2199_v31, %v773_v42 }
  0x9a   : > { %v695_v37 = vmul.f32 0.5, %v694_v33 }
  0x9b   : > { %v929_v32 = vsub.f32 1.5, %v928_v27  ;;  %v430_v35 = vpop.xlane.xlu2 %429  ;;  %v409_v44 = vpop.xlane.xlu1 %408  ;;  %v775_v18 = vmul.f32 0.5, %v774_v58 }
  0x9c   : > { %v2202_v36 = vpop.eup %1823  ;;  %v406_v45 = vpop.xlane.xlu0 %405  ;;  %v696_v53 = vsub.f32 1.5, %v695_v37  ;;  %v2217_v62 = vmax.f32 %v430_v35, 1e-24  ;;  %v2222_v7 = vmax.f32 %v409_v44, 1e-24 }
  0x9d   : > { %v936_v40 = vmul.f32 %v2202_v36, %v2185_v15  ;;  %v930_v41 = vmul.f32 %v1818_v14, %v929_v32  ;;  %v2208_v46 = vpop.eup %1825  ;;  %v2215_v59 = vmax.f32 %v406_v45, 1e-24  ;;  %vm942_vm7 = vweird.f32 %v2202_v36 }
  0x9e   : > { %v1828_v50 = vpop.eup %1827  ;;  %v783_v51 = vmul.f32 %v2208_v46, %v2189_v23  ;;  %v697_v8 = vmul.f32 %v2193_v26, %v696_v53  ;;  %vm943_vm12 = vmor %vm941_vm10, %vm942_vm7  ;;  %vm789_vm3 = vweird.f32 %v2208_v46 }
  0x9f   : > { %v937_v49 = vmul.f32 %v2202_v36, %v936_v40  ;;  %v934_v52 = vsel %vm933_vm4, %v1818_v14, %v930_v41  ;;  %v703_v55 = vmul.f32 %v1828_v50, %v2191_v24  ;;  %1829 = vrsqrt.f32 %v2215_v59  ;;  %vm2282_vm4 = vmor %vm778_vm15, %vm779_vm2 }
  0xa0   : > { %v947_v1 = vmul.f32 %v934_v52, %v2020_v0  ;;  %v784_v3 = vmul.f32 %v2208_v46, %v783_v51  ;;  %1831 = vrsqrt.f32 %v2217_v62  ;;  %vm709_vm11 = vweird.f32 %v1828_v50  ;;  %vm790_vm7 = vmor %vm788_vm6, %vm789_vm3 }
  0xa1   : > { %v938_v54 = vmul.f32 0.5, %v937_v49  ;;  %v704_v61 = vmul.f32 %v1828_v50, %v703_v55  ;;  %1833 = vrsqrt.f32 %v2222_v7  ;;  %v701_v37 = vsel %vm2231_vm9, %v2193_v26, %v697_v8  ;;  %vm710_vm14 = vmor %vm708_vm13, %vm709_vm11 }
  0xa2   : > { %v1063_v17 = vpack.c.bf16 %v947_v1, %v947_v1  ;;  %v785_v33 = vmul.f32 0.5, %v784_v3  ;;  %v776_v40 = vsub.f32 1.5, %v775_v18  ;;  %vm538_vm8 = vweird.f32 %v2215_v59 }
  0xa3   : > { %v939_v60 = vsub.f32 1.5, %v938_v54  ;;  %v894_v63 = vpop.xlane.xlu2 %893  ;;  %v705_v13 = vmul.f32 0.5, %v704_v61  ;;  %v891_v0 = vpop.xlane.xlu1 %890  ;;  %vm548_vm9 = vweird.f32 %v2222_v7  ;;  %vm618_vm3 = vweird.f32 %v2217_v62 }
  0xa4   : > { %v2226_v14 = vmax.f32 %v894_v63, 1e-24  ;;  %v433_v19 = vpop.xlane.xlu0 %432  ;;  %v2237_v32 = vmax.f32 %v891_v0, 1e-24  ;;  %v1227_v11 = vsel %vm1097_vm5, %v1063_v17, 0  ;;  %v786_v45 = vsub.f32 1.5, %v785_v33 }
  0xa5   : > { %v940_v22 = vmul.f32 %v2202_v36, %v939_v60  ;;  %v706_v28 = vsub.f32 1.5, %v705_v13  ;;  %1236 = vmatpush.bf16.msra.mxu2 %v1227_v11  ;;  %v2250_v41 = vmax.f32 %v433_v19, 1e-24  ;;  %v2252_v44 = vpop.eup %1829  ;;  %v777_v53 = vmul.f32 %v2199_v31, %v776_v40 }
  0xa6   : > { %1835 = vrsqrt.f32 %v2226_v14  ;;  %v2256_v52 = vpop.eup %1831  ;;  %v787_v61 = vmul.f32 %v2208_v46, %v786_v45  ;;  %vm539_vm13 = vweird.f32 %v2252_v44 }
  0xa7   : > { %v707_v35 = vmul.f32 %v1828_v50, %v706_v28  ;;  %v944_v15 = vsel %vm943_vm12, %v2202_v36, %v940_v22  ;;  %1837 = vrsqrt.f32 %v2237_v32  ;;  %v868_v36 = vmul.f32 %v701_v37, %v2037_v5  ;;  %v2260_v26 = vpop.eup %1833 }
  0xa8   : > { %v948_v49 = vmul.f32 %v944_v15, %v2030_v2  ;;  %v533_v5 = vmul.f32 %v2252_v44, %v2215_v59  ;;  %1839 = vrsqrt.f32 %v2250_v41  ;;  %v613_v17 = vmul.f32 %v2256_v52, %v2217_v62 }
  0xa9   : > { %v711_v51 = vsel %vm710_vm14, %v1828_v50, %v707_v35  ;;  %v1045_v1 = vpack.c.bf16 %v868_v36, %v868_v36  ;;  %v543_v18 = vmul.f32 %v2260_v26, %v2222_v7  ;;  %v781_v12 = vsel %vm2282_vm4, %v2199_v31, %v777_v53  ;;  %vm2374_vm4 = vmor %vm538_vm8, %vm539_vm13 }
  0xaa   : > { %v869_v24 = vmul.f32 %v711_v51, %v2049_v10  ;;  %v1064_v2 = vpack.c.bf16 %v948_v49, %v948_v49  ;;  %v534_v0 = vmul.f32 %v2252_v44, %v533_v5  ;;  %v791_v11 = vsel %vm790_vm7, %v2208_v46, %v787_v61 }
  0xab   : > { %v484_v42 = vpop.xlane.xlu2 %483  ;;  %v463_v54 = vpop.xlane.xlu1 %462  ;;  %v1202_v28 = vunpack.c.l.b16 %v1045_v1  ;;  %v876_v15 = vmul.f32 %v781_v12, %v2034_v4  ;;  %v544_v37 = vmul.f32 %v2260_v26, %v543_v18  ;;  %v877_v45 = vmul.f32 %v791_v11, %v2046_v9 }
  0xac   : > { %v460_v55 = vpop.xlane.xlu0 %459  ;;  %v2265_v50 = vpop.eup %1835  ;;  %v2270_v58 = vmax.f32 %v463_v54, 1e-24  ;;  %v1291_v63 = vsel %vm1097_vm5, %v1064_v2, 0  ;;  %v1046_v3 = vpack.c.bf16 %v869_v24, %v869_v24  ;;  %v2304_v27 = vmax.f32 %v484_v42, 1e-24 }
  0xad   : > { %v2272_v10 = vmax.f32 %v460_v55, 1e-24  ;;  %v2274_v60 = vpop.eup %1837  ;;  %1300 = vmatpush.bf16.msra.mxu3 %v1291_v63  ;;  %v916_v19 = vmul.f32 %v2265_v50, %v2226_v14  ;;  %v614_v24 = vmul.f32 %v2256_v52, %v613_v17  ;;  %v1053_v53 = vpack.c.bf16 %v876_v15, %v876_v15 }
  0xae   : > { %v906_v13 = vmul.f32 %v2274_v60, %v2237_v32  ;;  %1841 = vrsqrt.f32 %v2270_v58  ;;  %v1203_v33 = vunpack.c.l.b16 %v1046_v3  ;;  %v2307_v31 = vpop.eup %1839  ;;  %v535_v55 = vmul.f32 0.5, %v534_v0 }
  0xaf   : > { %1843 = vrsqrt.f32 %v2272_v10  ;;  %v917_v46 = vmul.f32 %v2265_v50, %v916_v19  ;;  %v623_v4 = vmul.f32 %v2307_v31, %v2250_v41  ;;  %v1054_v9 = vpack.c.bf16 %v877_v45, %v877_v45 }
  0xb0   : > { %v907_v23 = vmul.f32 %v2274_v60, %v906_v13  ;;  %v1210_v40 = vpack.c.b16 %v1203_v33, %v1202_v28  ;;  %1845 = vrsqrt.f32 %v2304_v27  ;;  %v545_v61 = vmul.f32 0.5, %v544_v37 }
  0xb1   : > { %v918_v1 = vmul.f32 0.5, %v917_v46  ;;  %v1266_v3 = vunpack.c.l.b16 %v1053_v53  ;;  %v1267_v8 = vunpack.c.l.b16 %v1054_v9  ;;  %v615_v13 = vmul.f32 0.5, %v614_v24 }
  0xb2   : > { %v908_v35 = vmul.f32 0.5, %v907_v23  ;;  %1762 = vmatmul.msk.bf16.vlgmr.msra.gmra.mxu2 %vm403_vm1, %v1210_v40  ;;  %v536_v17 = vsub.f32 1.5, %v535_v55  ;;  %v624_v18 = vmul.f32 %v2307_v31, %v623_v4  ;;  %vm912_vm10 = vweird.f32 %v2274_v60 }
  0xb3   : > { %v415_v22 = vpop.xlane.xlu2 %414  ;;  %v412_v51 = vpop.xlane.xlu1 %411  ;;  %v1274_v19 = vpack.c.b16 %v1267_v8, %v1266_v3  ;;  %v546_v33 = vsub.f32 1.5, %v545_v61  ;;  %vm549_vm11 = vweird.f32 %v2260_v26  ;;  %vm921_vm12 = vweird.f32 %v2226_v14 }
  0xb4   : > { %v2312_v49 = vmax.f32 %v415_v22, 1e-24  ;;  %v487_v36 = vpop.xlane.xlu0 %486  ;;  %v2314_v42 = vpop.eup %1841  ;;  %v2318_v54 = vmax.f32 %v412_v51, 1e-24  ;;  %v909_v5 = vsub.f32 1.5, %v908_v35  ;;  %v919_v40 = vsub.f32 1.5, %v918_v1 }
  0xb5   : > { %v2324_v2 = vpop.eup %1843  ;;  %v723_v63 = vmul.f32 %v2314_v42, %v2270_v58  ;;  %v2335_v23 = vmax.f32 %v487_v36, 1e-24  ;;  %vm911_vm14 = vweird.f32 %v2237_v32  ;;  %1766 = vmatmul.msk.bf16.vlgmr.msra.gmra.mxu3 %vm403_vm1, %v1274_v19  ;;  %v616_v51 = vsub.f32 1.5, %v615_v13 }
  0xb6   : > { %1847 = vrsqrt.f32 %v2312_v49  ;;  %v713_v12 = vmul.f32 %v2324_v2, %v2272_v10  ;;  %v910_v22 = vmul.f32 %v2274_v60, %v909_v5  ;;  %v2339_v28 = vpop.eup %1845  ;;  %vm619_vm15 = vweird.f32 %v2256_v52  ;;  %vm913_vm2 = vmor %vm911_vm14, %vm912_vm10 }
  0xb7   : > { %1849 = vrsqrt.f32 %v2318_v54  ;;  %v724_v11 = vmul.f32 %v2314_v42, %v723_v63  ;;  %v537_v36 = vmul.f32 %v2252_v44, %v536_v17  ;;  %v625_v32 = vmul.f32 0.5, %v624_v18  ;;  %vm2395_vm10 = vmor %vm548_vm9, %vm549_vm11 }
  0xb8   : > { %v714_v24 = vmul.f32 %v2324_v2, %v713_v12  ;;  %1851 = vrsqrt.f32 %v2335_v23  ;;  %v914_v4 = vsel %vm913_vm2, %v2274_v60, %v910_v22  ;;  %v547_v9 = vmul.f32 %v2260_v26, %v546_v33  ;;  %vm2432_vm2 = vmor %vm618_vm3, %vm619_vm15 }
  0xb9   : > { %v793_v5 = vmul.f32 %v2339_v28, %v2304_v27  ;;  %v725_v61 = vmul.f32 0.5, %v724_v11  ;;  %vm628_vm6 = vweird.f32 %v2250_v41  ;;  %v945_v60 = vmul.f32 %v914_v4, %v2084_v29 }
  0xba   : > { %v920_v3 = vmul.f32 %v2265_v50, %v919_v40  ;;  %vm922_vm7 = vweird.f32 %v2265_v50  ;;  %v715_v8 = vmul.f32 0.5, %v714_v24  ;;  %v541_v59 = vsel %vm2374_vm4, %v2252_v44, %v537_v36 }
  0xbb   : > { %v466_v0 = vpop.xlane.xlu2 %465  ;;  %v439_v35 = vpop.xlane.xlu1 %438  ;;  %vm923_vm8 = vmor %vm921_vm12, %vm922_vm7  ;;  %v626_v18 = vsub.f32 1.5, %v625_v32  ;;  %v1061_v12 = vpack.c.bf16 %v945_v60, %v945_v60  ;;  %v617_v14 = vmul.f32 %v2256_v52, %v616_v51  ;;  %v794_v19 = vmul.f32 %v2339_v28, %v793_v5 }
  0xbc   : > { %v436_v15 = vpop.xlane.xlu0 %435  ;;  %v2344_v37 = vpop.eup %1847  ;;  %v2349_v45 = vmax.f32 %v466_v0, 1e-24  ;;  %v2361_v55 = vmax.f32 %v439_v35, 1e-24  ;;  %v924_v0 = vsel %vm923_vm8, %v2265_v50, %v920_v3  ;;  %v551_v7 = vsel %vm2395_vm10, %v2260_v26, %v547_v9 }
  0xbd   : > { %v563_v46 = vmul.f32 %v2344_v37, %v2312_v49  ;;  %v2358_v53 = vpop.eup %1849  ;;  %v2384_v17 = vmax.f32 %v436_v15, 1e-24  ;;  %v726_v33 = vsub.f32 1.5, %v725_v61  ;;  %v1099_v11 = vsel %vm1097_vm5, %v1061_v12, 0 }
  0xbe   : > { %v553_v63 = vmul.f32 %v2358_v53, %v2318_v54  ;;  %1853 = vrsqrt.f32 %v2349_v45  ;;  %v2407_v22 = vpop.eup %1851  ;;  %v946_v35 = vmul.f32 %v924_v0, %v2077_v25  ;;  %v852_v15 = vmul.f32 %v541_v59, %v2069_v21  ;;  %1108 = vmatpush.bf16.msra.mxu0 %v1099_v11 }
  0xbf   : > { %v564_v13 = vmul.f32 %v2344_v37, %v563_v46  ;;  %1855 = vrsqrt.f32 %v2361_v55  ;;  %vm629_vm9 = vweird.f32 %v2307_v31  ;;  %v716_v51 = vsub.f32 1.5, %v715_v8 }
  0xc0   : > { %v554_v44 = vmul.f32 %v2358_v53, %v553_v63  ;;  %1857 = vrsqrt.f32 %v2384_v17  ;;  %v627_v46 = vmul.f32 %v2307_v31, %v626_v18  ;;  %vm729_vm11 = vweird.f32 %v2314_v42  ;;  %vm2443_vm7 = vmor %vm628_vm6, %vm629_vm9 }
  0xc1   : > { %v565_v36 = vmul.f32 0.5, %v564_v13  ;;  %vm718_vm12 = vweird.f32 %v2272_v10  ;;  %v1062_v25 = vpack.c.bf16 %v946_v35, %v946_v35  ;;  %v853_v21 = vmul.f32 %v551_v7, %v2066_v20 }
  0xc2   : > { %v2420_v32 = vmul.f32 0.5, %v794_v19  ;;  %vm728_vm13 = vweird.f32 %v2270_v58  ;;  %vm719_vm14 = vweird.f32 %v2324_v2  ;;  %v555_v4 = vmul.f32 0.5, %v554_v44 }
  0xc3   : > { %v493_v50 = vpop.xlane.xlu2 %492  ;;  %v490_v40 = vpop.xlane.xlu1 %489  ;;  %v803_v9 = vmul.f32 %v2407_v22, %v2335_v23  ;;  %v727_v20 = vmul.f32 %v2314_v42, %v726_v33  ;;  %vm569_vm4 = vweird.f32 %v2344_v37  ;;  %v1163_v63 = vsel %vm1097_vm5, %v1062_v25, 0  ;;  %vm720_vm6 = vmor %vm718_vm12, %vm719_vm14 }
  0xc4   : > { %v469_v24 = vpop.xlane.xlu0 %468  ;;  %v2414_v26 = vpop.eup %1853  ;;  %v1029_v1 = vpack.c.bf16 %v852_v15, %v852_v15  ;;  %v717_v62 = vmul.f32 %v2324_v2, %v716_v51  ;;  %v566_v3 = vsub.f32 1.5, %v565_v36  ;;  %vm558_vm15 = vweird.f32 %v2318_v54  ;;  %1172 = vmatpush.bf16.msra.mxu1 %v1163_v63  ;;  %vm730_vm8 = vmor %vm728_vm13, %vm729_vm11 }
  0xc5   : > { %v2426_v5 = vpop.eup %1855  ;;  %v733_v8 = vmul.f32 %v2414_v26, %v2349_v45  ;;  %v1030_v13 = vpack.c.bf16 %v853_v21, %v853_v21  ;;  %vm568_vm5 = vweird.f32 %v2312_v49  ;;  %vm559_vm3 = vweird.f32 %v2358_v53 }
  0xc6   : > { %v1073_v59 = vunpack.c.l.b16 %v1029_v1  ;;  %v621_v41 = vsel %vm2432_vm2, %v2256_v52, %v617_v14  ;;  %v631_v29 = vsel %vm2443_vm7, %v2307_v31, %v627_v46  ;;  %v2459_v18 = vpop.eup %1857  ;;  %v556_v12 = vsub.f32 1.5, %v555_v4  ;;  %vm2502_vm9 = vmor %vm558_vm15, %vm559_vm3 }
  0xc7   : > { %v804_v0 = vmul.f32 %v2407_v22, %v803_v9  ;;  %v643_v19 = vmul.f32 %v2426_v5, %v2361_v55  ;;  %v1074_v44 = vunpack.c.l.b16 %v1030_v13  ;;  %v860_v7 = vmul.f32 %v621_v41, %v2059_v16  ;;  %vm2515_vm11 = vmor %vm568_vm5, %vm569_vm4 }
  0xc8   : > { %v861_v33 = vmul.f32 %v631_v29, %v2087_v30  ;;  %v2466_v11 = vmax.f32 %v493_v50, 1e-24  ;;  %v2468_v52 = vmax.f32 %v490_v40, 1e-24  ;;  %v567_v14 = vmul.f32 %v2344_v37, %v566_v3 }
  0xc9   : > { %v734_v31 = vmul.f32 %v2414_v26, %v733_v8  ;;  %v1081_v35 = vpack.c.b16 %v1074_v44, %v1073_v59  ;;  %v2472_v15 = vmax.f32 %v469_v24, 1e-24  ;;  %v633_v51 = vmul.f32 %v2459_v18, %v2384_v17 }
  0xca   : > { %v1037_v36 = vpack.c.bf16 %v860_v7, %v860_v7  ;;  %v1038_v46 = vpack.c.bf16 %v861_v33, %v861_v33  ;;  %1859 = vrsqrt.f32 %v2466_v11  ;;  %v557_v50 = vmul.f32 %v2358_v53, %v556_v12 }
  0xcb   : > { %v442_v16 = vpop.xlane.xlu2 %441  ;;  %v421_v30 = vpop.xlane.xlu1 %420  ;;  %v805_v40 = vmul.f32 0.5, %v804_v0  ;;  %v644_v24 = vmul.f32 %v2426_v5, %v643_v19  ;;  %1754 = vmatmul.msk.bf16.vlgmr.msra.gmra.mxu0 %vm403_vm1, %v1081_v35  ;;  %1861 = vrsqrt.f32 %v2468_v52  ;;  %v721_v10 = vsel %vm720_vm6, %v2324_v2, %v717_v62 }
  0xcc   : > { %v418_v25 = vpop.xlane.xlu0 %417  ;;  %v1138_v21 = vunpack.c.l.b16 %v1037_v36  ;;  %v1139_v4 = vunpack.c.l.b16 %v1038_v46  ;;  %1863 = vrsqrt.f32 %v2472_v15  ;;  %vm798_vm10 = vweird.f32 %v2304_v27 }
  0xcd   : > { %v731_v9 = vsel %vm730_vm8, %v2314_v42, %v727_v20  ;;  %v870_v61 = vmul.f32 %v721_v10, %v2105_v39  ;;  %v2494_v63 = vmax.f32 %v442_v16, 1e-24  ;;  %v2496_v1 = vmax.f32 %v421_v30, 1e-24 }
  0xce   : > { %v634_v2 = vmul.f32 %v2459_v18, %v633_v51  ;;  %v1146_v60 = vpack.c.b16 %v1139_v4, %v1138_v21  ;;  %v871_v62 = vmul.f32 %v731_v9, %v2102_v38  ;;  %v2508_v42 = vmax.f32 %v418_v25, 1e-24 }
  0xcf   : > { %v796_v39 = vsub.f32 1.5, %v2420_v32  ;;  %v1047_v54 = vpack.c.bf16 %v870_v61, %v870_v61  ;;  %1865 = vrsqrt.f32 %v2494_v63  ;;  %v561_v3 = vsel %vm2502_vm9, %v2358_v53, %v557_v50 }
  0xd0   : > { %v2523_v38 = vpop.eup %1859  ;;  %v806_v8 = vsub.f32 1.5, %v805_v40  ;;  %1758 = vmatmul.msk.bf16.vlgmr.msra.gmra.mxu1 %vm403_vm1, %v1146_v60  ;;  %v1048_v32 = vpack.c.bf16 %v871_v62, %v871_v62  ;;  %1867 = vrsqrt.f32 %v2496_v1  ;;  %v571_v49 = vsel %vm2515_vm11, %v2344_v37, %v567_v14 }
  0xd1   : > { %v2530_v13 = vpop.eup %1861  ;;  %v735_v59 = vmul.f32 0.5, %v734_v31  ;;  %v645_v41 = vmul.f32 0.5, %v644_v24  ;;  %v1204_v29 = vunpack.c.l.b16 %v1047_v54  ;;  %1869 = vrsqrt.f32 %v2508_v42 }
  0xd2   : > { %v2533_v53 = vpop.eup %1863  ;;  %vm799_vm12 = vweird.f32 %v2339_v28  ;;  %v635_v12 = vmul.f32 0.5, %v634_v2  ;;  %v1205_v0 = vunpack.c.l.b16 %v1048_v32  ;;  %v854_v19 = vmul.f32 %v561_v3, %v2120_v47 }
  0xd3   : > { %v797_v44 = vmul.f32 %v2339_v28, %v796_v39  ;;  %vm808_vm13 = vweird.f32 %v2335_v23  ;;  %v743_v37 = vmul.f32 %v2533_v53, %v2472_v15  ;;  %v855_v7 = vmul.f32 %v571_v49, %v2113_v43  ;;  %v475_v35 = vpop.xlane.xlu2 %474  ;;  %v472_v30 = vpop.xlane.xlu1 %471  ;;  %vm2553_vm2 = vmor %vm798_vm10, %vm799_vm12 }
  0xd4   : > { %v807_v33 = vmul.f32 %v2407_v22, %v806_v8  ;;  %vm809_vm14 = vweird.f32 %v2407_v22  ;;  %v1211_v14 = vpack.c.b16 %v1205_v0, %v1204_v29  ;;  %v1031_v31 = vpack.c.bf16 %v854_v19, %v854_v19  ;;  %v445_v50 = vpop.xlane.xlu0 %444 }
  0xd5   : > { %v2544_v51 = vpop.eup %1865  ;;  %v736_v36 = vsub.f32 1.5, %v735_v59  ;;  %v646_v47 = vsub.f32 1.5, %v645_v41  ;;  %v744_v46 = vmul.f32 %v2533_v53, %v743_v37  ;;  %v1032_v16 = vpack.c.bf16 %v855_v7, %v855_v7  ;;  %vm2569_vm7 = vmor %vm808_vm13, %vm809_vm14 }
  0xd6   : > { %v2547_v40 = vpop.eup %1867  ;;  %vm648_vm4 = vweird.f32 %v2361_v55  ;;  %v636_v24 = vsub.f32 1.5, %v635_v12  ;;  %v823_v25 = vmul.f32 %v2523_v38, %v2466_v11  ;;  %v813_v21 = vmul.f32 %v2530_v13, %v2468_v52  ;;  %1763 = vmatmul.msk.bf16.gmra.mxu2 %vm403_vm1, %v1211_v14 }
  0xd7   : > { %v2563_v4 = vpop.eup %1869  ;;  %vm638_vm15 = vweird.f32 %v2384_v17  ;;  %v745_v10 = vmul.f32 0.5, %v744_v46  ;;  %v653_v9 = vmul.f32 %v2544_v51, %v2494_v63  ;;  %v1075_v61 = vunpack.c.l.b16 %v1031_v31 }
  0xd8   : > { %v801_v58 = vsel %vm2553_vm2, %v2339_v28, %v797_v44  ;;  %vm739_vm5 = vweird.f32 %v2414_v26  ;;  %vm649_vm3 = vweird.f32 %v2426_v5  ;;  %v583_v23 = vmul.f32 %v2547_v40, %v2496_v1 }
  0xd9   : > { %v573_v2 = vmul.f32 %v2563_v4, %v2508_v42  ;;  %v811_v60 = vsel %vm2569_vm7, %v2407_v22, %v807_v33  ;;  %v2589_v62 = vmul.f32 %v2414_v26, %v736_v36  ;;  %v647_v39 = vmul.f32 %v2426_v5, %v646_v47  ;;  %vm2616_vm11 = vmor %vm648_vm4, %vm649_vm3 }
  0xda   : > { %vm639_vm6 = vweird.f32 %v2459_v18  ;;  %v1076_v28 = vunpack.c.l.b16 %v1032_v16  ;;  %vm738_vm8 = vweird.f32 %v2349_v45  ;;  %v637_v20 = vmul.f32 %v2459_v18, %v636_v24 }
  0xdb   : > { %v824_v54 = vmul.f32 %v2523_v38, %v823_v25  ;;  %v814_v3 = vmul.f32 %v2530_v13, %v813_v21  ;;  %v878_v8 = vmul.f32 %v801_v58, %v2095_v34  ;;  %v746_v32 = vsub.f32 1.5, %v745_v10  ;;  %v499_v36 = vpop.xlane.xlu1 %498  ;;  %vm640_vm13 = vmor %vm638_vm15, %vm639_vm6 }
  0xdc   : > { %v654_v22 = vmul.f32 %v2544_v51, %v653_v9  ;;  %v1082_v49 = vpack.c.b16 %v1076_v28, %v1075_v61  ;;  %v879_v59 = vmul.f32 %v811_v60, %v2123_v48  ;;  %v584_v41 = vmul.f32 %v2547_v40, %v583_v23  ;;  %v424_v48 = vpop.xlane.xlu2 %423  ;;  %v496_v47 = vpop.xlane.xlu0 %495  ;;  %vm2647_vm7 = vmor %vm738_vm8, %vm739_vm5 }
  0xdd   : > { %v574_v29 = vmul.f32 %v2563_v4, %v573_v2  ;;  %v1055_v12 = vpack.c.bf16 %v878_v8, %v878_v8  ;;  %v2602_v0 = vmax.f32 %v475_v35, 1e-24  ;;  %vm748_vm10 = vweird.f32 %v2472_v15 }
  0xde   : > { %1755 = vmatmul.msk.bf16.gmra.mxu0 %vm403_vm1, %v1082_v49  ;;  %v1056_v19 = vpack.c.bf16 %v879_v59, %v879_v59  ;;  %v2606_v44 = vmax.f32 %v472_v30, 1e-24  ;;  %v2608_v34 = vmax.f32 %v445_v50, 1e-24  ;;  %v825_v37 = vmul.f32 0.5, %v824_v54 }
  0xdf   : > { %v815_v7 = vmul.f32 0.5, %v814_v3  ;;  %vm749_vm9 = vweird.f32 %v2533_v53  ;;  %1871 = vrsqrt.f32 %v2602_v0  ;;  %vm829_vm12 = vweird.f32 %v2523_v38 }
  0xe0   : > { %v655_v14 = vmul.f32 0.5, %v654_v22  ;;  %v1268_v31 = vunpack.c.l.b16 %v1055_v12  ;;  %v1269_v35 = vunpack.c.l.b16 %v1056_v19  ;;  %1873 = vrsqrt.f32 %v2606_v44  ;;  %vm2659_vm15 = vmor %vm748_vm10, %vm749_vm9 }
  0xe1   : > { %vm819_vm14 = vweird.f32 %v2530_v13  ;;  %v747_v55 = vmul.f32 %v2533_v53, %v746_v32  ;;  %v585_v46 = vmul.f32 0.5, %v584_v41  ;;  %v575_v16 = vmul.f32 0.5, %v574_v29  ;;  %v1897_v32 = vld [vmem:[%s2027_s9 + $0xa0] sm:$0xff] }
  0xe2   : > { %1875 = vrsqrt.f32 %v2608_v34  ;;  %vm828_vm2 = vweird.f32 %v2466_v11  ;;  %v1275_v30 = vpack.c.b16 %v1269_v35, %v1268_v31  ;;  %v641_v50 = vsel %vm640_vm13, %v2459_v18, %v637_v20  ;;  %v1900_v11 = vld [vmem:[%s2027_s9 + $0x20] sm:$0xff] }
  0xe3   : > { %v651_v43 = vsel %vm2616_vm11, %v2426_v5, %v647_v39  ;;  %v2634_v24 = vmax.f32 %v424_v48, 1e-24  ;;  %vm818_vm4 = vweird.f32 %v2468_v52  ;;  %v862_v17 = vmul.f32 %v641_v50, %v2137_v57  ;;  %vm2707_vm10 = vmor %vm828_vm2, %vm829_vm12  ;;  %v448_v57 = vpop.xlane.xlu1 %447 }
  0xe4   : > { %v863_v25 = vmul.f32 %v651_v43, %v2134_v56  ;;  %v2639_v21 = vmax.f32 %v499_v36, 1e-24  ;;  %v2641_v27 = vmax.f32 %v496_v47, 1e-24  ;;  %v826_v5 = vsub.f32 1.5, %v825_v37  ;;  %1767 = vmatmul.msk.bf16.gmra.mxu3 %vm403_vm1, %v1275_v30  ;;  %vm2724_vm11 = vmor %vm818_vm4, %vm819_vm14  ;;  %v451_v18 = vpop.xlane.xlu2 %450 }
  0xe5   : > { %v816_v10 = vsub.f32 1.5, %v815_v7  ;;  %v656_v9 = vsub.f32 1.5, %v655_v14  ;;  %1877 = vrsqrt.f32 %v2634_v24  ;;  %v2653_v56 = vpop.eup %1871  ;;  %v1039_v45 = vpack.c.bf16 %v862_v17, %v862_v17 }
  0xe6   : > { %v1040_v61 = vpack.c.bf16 %v863_v25, %v863_v25  ;;  %1879 = vrsqrt.f32 %v2639_v21  ;;  %v741_v58 = vsel %vm2647_vm7, %v2414_v26, %v2589_v62  ;;  %v2668_v23 = vpop.eup %1873  ;;  %v586_v2 = vsub.f32 1.5, %v585_v46 }
  0xe7   : > { %v763_v15 = vmul.f32 %v2653_v56, %v2602_v0  ;;  %1881 = vrsqrt.f32 %v2641_v27  ;;  %v751_v60 = vsel %vm2659_vm15, %v2533_v53, %v747_v55  ;;  %v576_v28 = vsub.f32 1.5, %v575_v16 }
  0xe8   : > { %v2676_v39 = vpop.eup %1875  ;;  %v753_v20 = vmul.f32 %v2668_v23, %v2606_v44  ;;  %v1140_v54 = vunpack.c.l.b16 %v1039_v45  ;;  %v1141_v26 = vunpack.c.l.b16 %v1040_v61  ;;  %v827_v62 = vmul.f32 %v2523_v38, %v826_v5  ;;  %v1898_v61 = vld [vmem:[%s2027_s9 + $0xe0] sm:$0xff] }
  0xe9   : > { %vm659_vm5 = vweird.f32 %v2544_v51  ;;  %v764_v3 = vmul.f32 %v2653_v56, %v763_v15  ;;  %v663_v8 = vmul.f32 %v2676_v39, %v2608_v34  ;;  %v872_v22 = vmul.f32 %v1897_v32, %v741_v58 }
  0xea   : > { %v817_v53 = vmul.f32 %v2530_v13, %v816_v10  ;;  %vm579_vm3 = vweird.f32 %v2563_v4  ;;  %v754_v49 = vmul.f32 %v2668_v23, %v753_v20  ;;  %v1147_v59 = vpack.c.b16 %v1141_v26, %v1140_v54 }
  0xeb   : > { %v873_v41 = vmul.f32 %v751_v60, %v2149_v6  ;;  %v2690_v29 = vpop.eup %1877  ;;  %v2693_v12 = vmul.f32 %v2544_v51, %v656_v9  ;;  %vm658_vm6 = vweird.f32 %v2494_v63  ;;  %v2697_v19 = vmul.f32 %v2547_v40, %v586_v2  ;;  %v1899_v2 = vld [vmem:[%s2027_s9 + $0xe8] sm:$0xff] }
  0xec   : > { %vm589_vm8 = vweird.f32 %v2547_v40  ;;  %v765_v37 = vmul.f32 0.5, %v764_v3  ;;  %v664_v7 = vmul.f32 %v2676_v39, %v663_v8  ;;  %v2701_v48 = vpop.eup %1879  ;;  %v2712_v33 = vmul.f32 %v2563_v4, %v576_v28  ;;  %1759 = vmatmul.msk.bf16.gmra.mxu1 %vm403_vm1, %v1147_v59  ;;  %v427_v8 = vpop.xlane.xlu0 %426  ;;  %vm2761_vm15 = vmor %vm658_vm6, %vm659_vm5 }
  0xed   : > { %vm578_vm9 = vweird.f32 %v2508_v42  ;;  %v593_v14 = vmul.f32 %v2690_v29, %v2634_v24  ;;  %v1049_v31 = vpack.c.bf16 %v872_v22, %v872_v22  ;;  %v1050_v35 = vpack.c.bf16 %v873_v41, %v873_v41  ;;  %v2718_v36 = vpop.eup %1881 }
  0xee   : > { %vm588_vm12 = vweird.f32 %v2496_v1  ;;  %v755_v47 = vmul.f32 0.5, %v754_v49  ;;  %vm759_vm13 = vweird.f32 %v2668_v23  ;;  %v665_v55 = vmul.f32 0.5, %v664_v7  ;;  %vm580_vm5 = vmor %vm578_vm9, %vm579_vm3 }
  0xef   : > { %v843_v46 = vmul.f32 %v2701_v48, %v2639_v21  ;;  %vm769_vm2 = vweird.f32 %v2653_v56  ;;  %vm668_vm7 = vweird.f32 %v2608_v34  ;;  %v594_v16 = vmul.f32 %v2690_v29, %v593_v14  ;;  %vm2780_vm6 = vmor %vm588_vm12, %vm589_vm8 }
  0xf0   : > { %v833_v52 = vmul.f32 %v2718_v36, %v2641_v27  ;;  %v821_v30 = vsel %vm2724_vm11, %v2530_v13, %v817_v53  ;;  %v831_v50 = vsel %vm2707_vm10, %v2523_v38, %v827_v62  ;;  %v766_v43 = vsub.f32 1.5, %v765_v37 }
  0xf1   : > { %vm758_vm14 = vweird.f32 %v2606_v44  ;;  %v666_v17 = vsub.f32 1.5, %v665_v55  ;;  %vm669_vm4 = vweird.f32 %v2676_v39  ;;  %v844_v25 = vmul.f32 %v2701_v48, %v843_v46  ;;  %v1902_v55 = vld [vmem:[%s2027_s9 + $0x60] sm:$0xff]  ;;  %v1909_v44 = vld [vmem:[%s2027_s9 + $0x78] sm:$0xff] }
  0xf2   : > { %v595_v5 = vmul.f32 0.5, %v594_v16  ;;  %v834_v13 = vmul.f32 %v2718_v36, %v833_v52  ;;  %v1206_v10 = vunpack.c.l.b16 %v1049_v31  ;;  %v1207_v9 = vunpack.c.l.b16 %v1050_v35  ;;  %vm2796_vm8 = vmor %vm668_vm7, %vm669_vm4  ;;  %v1903_v16 = vld [vmem:[%s2027_s9 + $0x68] sm:$0xff] }
  0xf3   : > { %v756_v45 = vsub.f32 1.5, %v755_v47  ;;  %v845_v38 = vmul.f32 0.5, %v844_v25  ;;  %v880_v58 = vmul.f32 %v1898_v61, %v821_v30  ;;  %v881_v15 = vmul.f32 %v1899_v2, %v831_v50  ;;  %vm2813_vm9 = vmor %vm758_vm14, %vm759_vm13 }
  0xf4   : > { %v596_v60 = vsub.f32 1.5, %v595_v5  ;;  %v835_v28 = vmul.f32 0.5, %v834_v13  ;;  %vm838_vm11 = vweird.f32 %v2641_v27  ;;  %v1212_v20 = vpack.c.b16 %v1207_v9, %v1206_v10 }
  0xf5   : > { %v2752_v54 = vmax.f32 %v451_v18, 1e-24  ;;  %vm839_vm0 = vweird.f32 %v2718_v36  ;;  %v1057_v26 = vpack.c.bf16 %v880_v58, %v880_v58  ;;  %v1058_v62 = vpack.c.bf16 %v881_v15, %v881_v15  ;;  %v1905_v58 = vld [vmem:[%s2027_s9 + $0xb8] sm:$0xff] }
  0xf6   : > { %v2755_v3 = vmax.f32 %v448_v57, 1e-24  ;;  %v767_v22 = vmul.f32 %v2653_v56, %v766_v43  ;;  %v667_v53 = vmul.f32 %v2676_v39, %v666_v17  ;;  %vm848_vm10 = vweird.f32 %v2639_v21  ;;  %1764 = vmatmul.msk.bf16.gmra.mxu2 %vm403_vm1, %v1212_v20  ;;  %v1904_v17 = vld [vmem:[%s2027_s9 + $0xb0] sm:$0xff] }
  0xf7   : > { %v836_v49 = vsub.f32 1.5, %v835_v28  ;;  %1883 = vrsqrt.f32 %v2752_v54  ;;  %v757_v63 = vmul.f32 %v2668_v23, %v756_v45  ;;  %v1270_v59 = vunpack.c.l.b16 %v1057_v26 }
  0xf8   : > { %v1271_v41 = vunpack.c.l.b16 %v1058_v62  ;;  %1885 = vrsqrt.f32 %v2755_v3  ;;  %v2785_v7 = vmul.f32 %v2690_v29, %v596_v60  ;;  %vm599_vm3 = vweird.f32 %v2690_v29 }
  0xf9   : > { %v846_v42 = vsub.f32 1.5, %v845_v38  ;;  %v2788_v6 = vmax.f32 %v427_v8, 1e-24  ;;  %v581_v14 = vsel %vm580_vm5, %v2563_v4, %v2712_v33  ;;  %v591_v35 = vsel %vm2780_vm6, %v2547_v40, %v2697_v19  ;;  %v1901_v19 = vld [vmem:[%s2027_s9 + $0x28] sm:$0xff] }
  0xfa   : > { %v1276_v31 = vpack.c.b16 %v1271_v41, %v1270_v59  ;;  %v856_v47 = vmul.f32 %v1900_v11, %v581_v14  ;;  %v661_v4 = vsel %vm2761_vm15, %v2544_v51, %v2693_v12  ;;  %vm598_vm12 = vweird.f32 %v2634_v24 }
  0xfb   : > { %v837_v40 = vmul.f32 %v2718_v36, %v836_v49  ;;  %1887 = vrsqrt.f32 %v2788_v6  ;;  %v857_v33 = vmul.f32 %v1901_v19, %v591_v35  ;;  %v671_v51 = vsel %vm2796_vm8, %v2676_v39, %v667_v53  ;;  %v1906_v49 = vld [vmem:[%s2027_s9 + $0xf0] sm:$0xff] }
  0xfc   : > { %vm3209_vm13 = vweird.f32 %v2602_v0  ;;  %1768 = vmatmul.msk.bf16.gmra.mxu3 %vm403_vm1, %v1276_v31  ;;  %v1033_v12 = vpack.c.bf16 %v856_v47, %v856_v47  ;;  %v864_v46 = vmul.f32 %v1902_v55, %v661_v4  ;;  %v865_v52 = vmul.f32 %v1903_v16, %v671_v51  ;;  %v1908_v51 = vld [vmem:[%s2027_s9 + $0x30] sm:$0xff] }
  0xfd   : > { %vm2828_vm7 = vmor %vm3209_vm13, %vm769_vm2  ;;  %v761_v30 = vsel %vm2813_vm9, %v2668_v23, %v757_v63  ;;  %v2838_v39 = vpop.eup %1883  ;;  %v847_v50 = vmul.f32 %v2701_v48, %v846_v42  ;;  %v1034_v0 = vpack.c.bf16 %v857_v33, %v857_v33  ;;  %vm688_vm14 = vweird.f32 %v2752_v54  ;;  %v1907_v42 = vld [vmem:[%s2027_s9 + $0xf8] sm:$0xff] }
  0xfe   : > { %v771_v43 = vsel %vm2828_vm7, %v2653_v56, %v767_v22  ;;  %v874_v25 = vmul.f32 %v1904_v17, %v761_v30  ;;  %v2845_v18 = vpop.eup %1885  ;;  %vm2851_vm2 = vmor %vm838_vm11, %vm839_vm0  ;;  %v683_v5 = vmul.f32 %v2838_v39, %v2752_v54  ;;  %v1077_v13 = vunpack.c.l.b16 %v1033_v12 }
  0xff   : > { %v1041_v56 = vpack.c.bf16 %v864_v46, %v864_v46  ;;  %v673_v10 = vmul.f32 %v2845_v18, %v2755_v3  ;;  %v1078_v9 = vunpack.c.l.b16 %v1034_v0  ;;  %v1042_v57 = vpack.c.bf16 %v865_v52, %v865_v52  ;;  %v1910_v46 = vld [vmem:[%s2027_s9 + $0x70] sm:$0xff] }
 0x100   : > { %v841_v27 = vsel %vm2851_vm2, %v2718_v36, %v837_v40  ;;  %vm3214_vm0 = vweird.f32 %v2701_v48  ;;  %v684_v38 = vmul.f32 %v2838_v39, %v683_v5  ;;  %v875_v2 = vmul.f32 %v1905_v58, %v771_v43 }
 0x101   : > { %vm2867_vm4 = vmor %vm848_vm10, %vm3214_vm0  ;;  %v1142_v61 = vunpack.c.l.b16 %v1041_v56  ;;  %v1051_v15 = vpack.c.bf16 %v874_v25, %v874_v25  ;;  %v1888_v60 = vpop.eup %1887  ;;  %v674_v28 = vmul.f32 %v2845_v18, %v673_v10  ;;  %v1083_v20 = vpack.c.b16 %v1078_v9, %v1077_v13  ;;  %v363_v56 = vld [vmem:[%s2918_s13] sm:$0xff] }
 0x102   : > { %v1143_v36 = vunpack.c.l.b16 %v1042_v57  ;;  %v851_v21 = vsel %vm2867_vm4, %v2701_v48, %v847_v50  ;;  %v685_v26 = vmul.f32 0.5, %v684_v38  ;;  %vm689_vm15 = vweird.f32 %v2838_v39  ;;  %vm2885_vm10 = vmor %vm598_vm12, %vm599_vm3  ;;  %v1911_v50 = vld [vmem:[%s2027_s9 + $0x38] sm:$0xff]  ;;  %v364_v57 = vld [vmem:[%s2918_s13 + $0x8] sm:$0xff] }
 0x103   : > { %v603_v62 = vmul.f32 %v1888_v60, %v2788_v6  ;;  %v1052_v8 = vpack.c.bf16 %v875_v2, %v875_v2  ;;  %v675_v32 = vmul.f32 0.5, %v674_v28  ;;  %1756 = vmatmul.msk.bf16.gmra.mxu0 %vm403_vm1, %v1083_v20  ;;  %v1208_v53 = vunpack.c.l.b16 %v1051_v15  ;;  %vm690_vm5 = vmor %vm688_vm14, %vm689_vm15 }
 0x104   : > { %v1148_v22 = vpack.c.b16 %v1143_v36, %v1142_v61  ;;  %v882_v63 = vmul.f32 %v1906_v49, %v841_v27  ;;  %v686_v48 = vsub.f32 1.5, %v685_v26  ;;  %v883_v14 = vmul.f32 %v1907_v42, %v851_v21 }
 0x105   : > { %v604_v41 = vmul.f32 %v1888_v60, %v603_v62  ;;  %v1209_v37 = vunpack.c.l.b16 %v1052_v8  ;;  %v676_v1 = vsub.f32 1.5, %v675_v32  ;;  %vm679_vm11 = vweird.f32 %v2845_v18 }
 0x106   : > { %1760 = vmatmul.msk.bf16.gmra.mxu1 %vm403_vm1, %v1148_v22  ;;  %v1059_v31 = vpack.c.bf16 %v882_v63, %v882_v63  ;;  %v601_v24 = vsel %vm2885_vm10, %v2690_v29, %v2785_v7  ;;  %v687_v35 = vmul.f32 %v2838_v39, %v686_v48  ;;  %v1060_v4 = vpack.c.bf16 %v883_v14, %v883_v14 }
 0x107   : > { %v605_v11 = vmul.f32 0.5, %v604_v41  ;;  %v1213_v47 = vpack.c.b16 %v1209_v37, %v1208_v53  ;;  %v677_v34 = vmul.f32 %v2845_v18, %v676_v1  ;;  %vm678_vm6 = vweird.f32 %v2755_v3 }
 0x108   : > { %v1272_v40 = vunpack.c.l.b16 %v1059_v31  ;;  %v691_v29 = vsel %vm690_vm5, %v2838_v39, %v687_v35  ;;  %vm680_vm3 = vmor %vm678_vm6, %vm679_vm11  ;;  %vm609_vm8 = vweird.f32 %v1888_v60  ;;  %v1273_v19 = vunpack.c.l.b16 %v1060_v4 }
 0x109   : > { %v606_v7 = vsub.f32 1.5, %v605_v11  ;;  %1765 = vmatmul.msk.bf16.gmra.mxu2 %vm403_vm1, %v1213_v47  ;;  %v681_v33 = vsel %vm680_vm3, %v2845_v18, %v677_v34  ;;  %v858_v54 = vmul.f32 %v1908_v51, %v601_v24  ;;  %v867_v12 = vmul.f32 %v1909_v44, %v691_v29 }
 0x10a   : > { %vm608_vm9 = vweird.f32 %v2788_v6  ;;  %v1277_v3 = vpack.c.b16 %v1273_v19, %v1272_v40  ;;  %v866_v16 = vmul.f32 %v1910_v46, %v681_v33 }
 0x10b   : > { %v607_v55 = vmul.f32 %v1888_v60, %v606_v7  ;;  %vm610_vm12 = vmor %vm608_vm9, %vm609_vm8  ;;  %v1044_v52 = vpack.c.bf16 %v867_v12, %v867_v12  ;;  %v1035_v43 = vpack.c.bf16 %v858_v54, %v858_v54 }
 0x10c   : > { %1769 = vmatmul.msk.bf16.gmra.mxu3 %vm403_vm1, %v1277_v3  ;;  %v1043_v39 = vpack.c.bf16 %v866_v16, %v866_v16 }
 0x10d   : > { %v611_v30 = vsel %vm610_vm12, %v1888_v60, %v607_v55  ;;  %v1145_v17 = vunpack.c.l.b16 %v1044_v52  ;;  %v1079_v23 = vunpack.c.l.b16 %v1035_v43  ;;  %v2958_v55 = vld [vmem:[%s307_s16 + $0x10] sm:$0xff] }
 0x10e   : > { %v859_v0 = vmul.f32 %v1911_v50, %v611_v30  ;;  %v1144_v25 = vunpack.c.l.b16 %v1043_v39  ;;  %v951_v3 = vmul.f32 %v2958_v55, %v2958_v55 }
 0x110   : > { %v1036_v18 = vpack.c.bf16 %v859_v0, %v859_v0  ;;  %v1149_v13 = vpack.c.b16 %v1145_v17, %v1144_v25  ;;  %v2969_v17 = vld [vmem:[%s307_s16 + $0x18] sm:$0xff] }
 0x111   : > { %v952_v25 = vmul.f32 %v2969_v17, %v2969_v17 }
 0x112   : > { %v1080_v5 = vunpack.c.l.b16 %v1036_v18  ;;  %v365_v18 = vld [vmem:[%s2918_s13 + $0x10] sm:$0xff] }
 0x114   : > { %v1084_v6 = vpack.c.b16 %v1080_v5, %v1079_v23  ;;  %v2974_v5 = vld [vmem:[%s307_s16] sm:$0xff] }
 0x116   : > { %1757 = vmatmul.msk.bf16.gmra.mxu0 %vm403_vm1, %v1084_v6  ;;  %1761 = vmatmul.msk.bf16.gmra.mxu1 %vm403_vm1, %v1149_v13  ;;  %vm3219_vm1 = vcmask 523264   ;;  %v2976_v13 = vld [vmem:[%s307_s16 + $0x8] sm:$0xff] }
 0x117   : > { %v967_v46 = vsel %vm3219_vm1, %v951_v3, 0.0  ;;  %vm3220_vm13 = vmmov %vm3219_vm1 }
 0x118   : > { %v968_v52 = vrot.slane %v967_v46, 4  ;;  %v974_v6 = vsel %vm3220_vm13, %v952_v25, 0.0  ;;  %vm3221_vm7 = vmmov %vm3219_vm1 }
 0x119   : > { %vm3222_vm2 = vmmov %vm3219_vm1 }
 0x11a   : > { %v969_v39 = vadd.f32 %v968_v52, %v967_v46  ;;  %vm3223_vm14 = vmmov %vm3219_vm1 }
 0x11b   : > { %vm3224_vm0 = vmmov %vm3219_vm1 }
 0x11c   : > { %v970_v43 = vrot.slane %v969_v39, 2  ;;  %vm3225_vm4 = vmmov %vm3224_vm0 }
 0x11d   : > { %vm3226_vm15 = vmmov %vm3224_vm0 }
 0x11e   : > { %v971_v23 = vadd.f32 %v970_v43, %v969_v39  ;;  %vm3227_vm10 = vmmov %vm3224_vm0 }
 0x11f   : > { %vm3228_vm11 = vmmov %vm3224_vm0 }
 0x120   : > { %vm3229_vm5 = vmmov %vm3224_vm0 }
 0x121   : > { %vm3230_vm6 = vmmov %vm3224_vm0 }
 0x122   : > { %vm3231_vm3 = vmmov %vm3224_vm0 }
 0x135   : > { %v1238_v10 = vpop.f32.mrf.mxu2 }
 0x136   : > { %v1338_v9 = vmul.f32 %v1238_v10, %v363_v56  ;;  %v950_v10 = vmul.f32 %v2976_v13, %v2976_v13 }
 0x138   : > { %v1302_v27 = vpop.f32.mrf.mxu3  ;;  %v1374_v61 = vpack.c.bf16 %v1338_v9, %v1338_v9  ;;  %v2984_v9 = vld [vmem:[%s2918_s13 + $0x18] sm:$0xff] }
 0x139   : > { %v1346_v45 = vmul.f32 %v1302_v27, %v363_v56  ;;  %v975_v27 = vrot.slane %v974_v6, 4 }
 0x13a   : > { %v2922_v15 = vunpack.c.l.b16 %v1374_v61 }
 0x13b   : > { %v1382_v36 = vpack.c.bf16 %v1346_v45, %v1346_v45 }
 0x13d   : > { %v1240_v38 = vpop.f32.mrf.mxu2  ;;  %v2928_v62 = vunpack.c.l.b16 %v1382_v36 }
 0x13e   : > { %v1339_v58 = vmul.f32 %v1240_v38, %v364_v57  ;;  %v2987_v38 = vld [vmem:[%s2918_s13 + $0x20] sm:$0xff] }
 0x140   : > { %v1375_v2 = vpack.c.bf16 %v1339_v58, %v1339_v58  ;;  %v1304_v28 = vpop.f32.mrf.mxu3  ;;  %v960_v58 = vsel %vm3222_vm2, %v950_v10, 0.0  ;;  %v370_v10 = vld [vmem:[%s2918_s13 + $0x38] sm:$0xff] }
 0x141   : > { %v1347_v21 = vmul.f32 %v1304_v28, %v364_v57  ;;  %v976_v28 = vadd.f32 %v975_v27, %v974_v6 }
 0x142   : > { %v2924_v60 = vunpack.c.l.b16 %v1375_v2  ;;  %v972_v2 = vrot.slane %v971_v23, 1 }
 0x143   : > { %v1383_v26 = vpack.c.bf16 %v1347_v21, %v1347_v21 }
 0x144   : > { %v1502_v20 = vpack.c.b16 %v2924_v60, %v2922_v15 }
 0x145   : > { %v2930_v8 = vunpack.c.l.b16 %v1383_v26 }
 0x147   : > { %v1550_v53 = vpack.c.b16 %v2930_v8, %v2928_v62 }
 0x148   : > { %v1110_v32 = vpop.f32.mrf.mxu0 }
 0x149   : > { %v1322_v22 = vmul.f32 %v1110_v32, %v363_v56 }
 0x14b   : > { %v1358_v48 = vpack.c.bf16 %v1322_v22, %v1322_v22  ;;  %v961_v22 = vrot.slane %v960_v58, 4 }
 0x14d   : > { %v1174_v49 = vpop.f32.mrf.mxu1  ;;  %v2934_v42 = vunpack.c.l.b16 %v1358_v48  ;;  %v369_v48 = vld [vmem:[%s2918_s13 + $0x30] sm:$0xff] }
 0x14e   : > { %v1330_v63 = vmul.f32 %v1174_v49, %v363_v56  ;;  %v949_v56 = vmul.f32 %v2974_v5, %v2974_v5 }
 0x150   : > { %v1112_v59 = vpop.f32.mrf.mxu0  ;;  %v1366_v31 = vpack.c.bf16 %v1330_v63, %v1330_v63  ;;  %v953_v61 = vsel %vm3221_vm7, %v949_v56, 0.0  ;;  %vm3234_vm7 = vmmov %vm3224_vm0 }
 0x151   : > { %v1323_v41 = vmul.f32 %v1112_v59, %v364_v57  ;;  %v954_v32 = vrot.slane %v953_v61, 4 }
 0x152   : > { %v2940_v47 = vunpack.c.l.b16 %v1366_v31  ;;  %v962_v31 = vadd.f32 %v961_v22, %v960_v58 }
 0x153   : > { %v1359_v37 = vpack.c.bf16 %v1323_v41, %v1323_v41  ;;  %v977_v41 = vrot.slane %v976_v28, 2 }
 0x154   : > { %v963_v39 = vrot.slane %v962_v31, 2 }
 0x155   : > { %v2936_v14 = vunpack.c.l.b16 %v1359_v37  ;;  %v1176_v1 = vpop.f32.mrf.mxu1  ;;  %v955_v37 = vadd.f32 %v954_v32, %v953_v61 }
 0x156   : > { %v1331_v24 = vmul.f32 %v1176_v1, %v364_v57  ;;  %v973_v1 = vadd.f32 %v972_v2, %v971_v23 }
 0x157   : > { %v1406_v35 = vpack.c.b16 %v2936_v14, %v2934_v42  ;;  %v956_v3 = vrot.slane %v955_v37, 2 }
 0x158   : > { %v1367_v11 = vpack.c.bf16 %v1331_v24, %v1331_v24  ;;  %v3003_v23 = vmax.f32 %v973_v1, 1e-24 }
 0x159   : > { %v1243_v40 = vpop.f32.mrf.mxu2  ;;  %v957_v27 = vadd.f32 %v956_v3, %v955_v37 }
 0x15a   : > { %v2942_v4 = vunpack.c.l.b16 %v1367_v11  ;;  %v1340_v45 = vmul.f32 %v1243_v40, %v365_v18  ;;  %v368_v11 = vld [vmem:[%s2918_s13 + $0x28] sm:$0xff]  ;;  %v978_v40 = vadd.f32 %v977_v41, %v976_v28  ;;  %1889 = vrsqrt.f32 %v3003_v23 }
 0x15b   : > { %v1115_v7 = vpop.f32.mrf.mxu0  ;;  %vm1011_vm8 = vweird.f32 %v3003_v23 }
 0x15c   : > { %v1454_v34 = vpack.c.b16 %v2942_v4, %v2940_v47  ;;  %v1376_v59 = vpack.c.bf16 %v1340_v45, %v1340_v45  ;;  %v2997_v25 = vmul.f32 %v1115_v7, %v365_v18  ;;  %v979_v6 = vrot.slane %v978_v40, 1 }
 0x15d   : > { %v964_v45 = vadd.f32 %v963_v39, %v962_v31 }
 0x15e   : > { %v2995_v43 = vunpack.c.l.b16 %v1376_v59 }
 0x15f   : > { %v965_v37 = vrot.slane %v964_v45, 1 }
 0x161   : > { %v1245_v33 = vpop.f32.mrf.mxu2 }
 0x162   : > { %v1341_v36 = vmul.f32 %v1245_v33, %v2984_v9 }
 0x163   : > { %v1117_v54 = vpop.f32.mrf.mxu0 }
 0x164   : > { %v1377_v24 = vpack.c.bf16 %v1341_v36, %v1341_v36  ;;  %v980_v36 = vadd.f32 %v979_v6, %v978_v40 }
 0x166   : > { %v3005_v61 = vunpack.c.l.b16 %v1377_v24 }
 0x167   : > { %v2946_v29 = vpop.f32.mrf.mxu3 }
 0x168   : > { %v3008_v58 = vmul.f32 %v2946_v29, %v365_v18 }
 0x169   : > { %v2948_v19 = vpop.f32.mrf.mxu1 }
 0x16a   : > { %v3011_v2 = vmul.f32 %v2948_v19, %v365_v18  ;;  %v3023_v19 = vmax.f32 %v980_v36, 1e-24 }
 0x16c   : > { %1891 = vrsqrt.f32 %v3023_v19  ;;  %vm1021_vm1 = vweird.f32 %v3023_v19 }
 0x16f   : > { %v2950_v51 = vpop.f32.mrf.mxu3 }
 0x171   : > { %v2956_v44 = vpop.f32.mrf.mxu1 }
 0x179   : > { %v1248_v12 = vpop.f32.mrf.mxu2 }
 0x17a   : > { %v1342_v49 = vmul.f32 %v1248_v12, %v2987_v38  ;;  %v3000_v12 = vmul.f32 %v1117_v54, %v2984_v9  ;;  %v3015_v54 = vmul.f32 %v2950_v51, %v2984_v9 }
 0x17c   : > { %v1378_v46 = vpack.c.bf16 %v1342_v49, %v1342_v49  ;;  %v958_v49 = vrot.slane %v957_v27, 1 }
 0x17e   : > { %v959_v41 = vadd.f32 %v958_v49, %v957_v27 }
 0x17f   : > { %v2963_v16 = vpop.f32.mrf.mxu3 }
 0x180   : > { %v2965_v30 = vpop.f32.mrf.mxu0 }
 0x181   : > { %v1250_v50 = vpop.f32.mrf.mxu2  ;;  %v3028_v51 = vmul.f32 %v2965_v30, %v2987_v38 }
 0x182   : > { %v1343_v56 = vmul.f32 %v1250_v50, %v368_v11  ;;  %v3017_v50 = vunpack.c.l.b16 %v1378_v46  ;;  %v3030_v46 = vmax.f32 %v959_v41, 1e-24 }
 0x183   : > { %v2967_v0 = vpop.f32.mrf.mxu1 }
 0x184   : > { %v1379_v18 = vpack.c.bf16 %v1343_v56, %v1343_v56  ;;  %1893 = vrsqrt.f32 %v3030_v46  ;;  %v1334_v41 = vmul.f32 %v2967_v0, %v2987_v38  ;;  %v1362_v0 = vpack.c.bf16 %v3028_v51, %v3028_v51 }
 0x185   : > { %v1333_v51 = vmul.f32 %v2956_v44, %v2984_v9  ;;  %v1384_v9 = vpack.c.bf16 %v3008_v58, %v3008_v58  ;;  %vm991_vm2 = vweird.f32 %v3030_v46 }
 0x186   : > { %v1499_v56 = vunpack.c.l.b16 %v1379_v18 }
 0x187   : > { %v1314_v57 = vpop.f32.mrf.mxu3 }
 0x188   : > { %v1122_v21 = vpop.f32.mrf.mxu0  ;;  %v1351_v1 = vmul.f32 %v1314_v57, %v368_v11 }
 0x189   : > { %v1327_v27 = vmul.f32 %v1122_v21, %v368_v11 }
 0x18b   : > { %v1186_v26 = vpop.f32.mrf.mxu1 }
 0x18c   : > { %v1253_v63 = vpop.f32.mrf.mxu2  ;;  %v1335_v36 = vmul.f32 %v1186_v26, %v368_v11 }
 0x18d   : > { %v1344_v33 = vmul.f32 %v1253_v63, %v369_v48  ;;  %v3021_v63 = vmul.f32 %v2963_v16, %v2987_v38 }
 0x18f   : > { %v1317_v52 = vpop.f32.mrf.mxu3  ;;  %v1380_v32 = vpack.c.bf16 %v1344_v33, %v1344_v33  ;;  %v966_v33 = vadd.f32 %v965_v37, %v964_v45  ;;  %v1386_v11 = vpack.c.bf16 %v3021_v63, %v3021_v63  ;;  %v1504_v63 = vpack.c.b16 %v1499_v56, %v3017_v50 }
 0x190   : > { %v1352_v59 = vmul.f32 %v1317_v52, %v369_v48 }
 0x191   : > { %v1500_v40 = vunpack.c.l.b16 %v1380_v32 }
 0x192   : > { %v1388_v39 = vpack.c.bf16 %v1352_v59, %v1352_v59  ;;  %v1387_v59 = vpack.c.bf16 %v1351_v1, %v1351_v1 }
 0x193   : > { %v1125_v7 = vpop.f32.mrf.mxu0  ;;  %v1189_v28 = vpop.f32.mrf.mxu1 }
 0x194   : > { %v1255_v22 = vpop.f32.mrf.mxu2  ;;  %v1328_v24 = vmul.f32 %v1125_v7, %v369_v48  ;;  %v1336_v3 = vmul.f32 %v1189_v28, %v369_v48  ;;  %v3036_v48 = vpop.eup %1889  ;;  %v1548_v18 = vunpack.c.l.b16 %v1388_v39  ;;  %v1547_v38 = vunpack.c.l.b16 %v1387_v59 }
 0x195   : > { %v1345_v29 = vmul.f32 %v1255_v22, %v370_v10  ;;  %v3033_v22 = vmax.f32 %v966_v33, 1e-24  ;;  %v1006_v1 = vmul.f32 %v3036_v48, %v3003_v23  ;;  %vm1012_vm9 = vweird.f32 %v3036_v48 }
 0x196   : > { %v1364_v30 = vpack.c.bf16 %v1328_v24, %v1328_v24  ;;  %v1372_v45 = vpack.c.bf16 %v1336_v3, %v1336_v3  ;;  %v3044_v24 = vpop.eup %1891  ;;  %vm3090_vm12 = vmor %vm1011_vm8, %vm1012_vm9 }
 0x197   : > { %v1381_v31 = vpack.c.bf16 %v1345_v29, %v1345_v29  ;;  %v1319_v16 = vpop.f32.mrf.mxu3  ;;  %1895 = vrsqrt.f32 %v3033_v22  ;;  %v1007_v50 = vmul.f32 %v3036_v48, %v1006_v1  ;;  %vm1022_vm13 = vweird.f32 %v3044_v24 }
 0x198   : > { %v1353_v6 = vmul.f32 %v1319_v16, %v370_v10  ;;  %v1404_v16 = vunpack.c.l.b16 %v1364_v30  ;;  %v1452_v33 = vunpack.c.l.b16 %v1372_v45  ;;  %v1016_v30 = vmul.f32 %v3044_v24, %v3023_v19 }
 0x199   : > { %v1501_v52 = vunpack.c.l.b16 %v1381_v31  ;;  %v1546_v45 = vunpack.c.l.b16 %v1386_v11 }
 0x19a   : > { %v1389_v57 = vpack.c.bf16 %v1353_v6, %v1353_v6  ;;  %v3048_v6 = vpop.eup %1893 }
 0x19b   : > { %v1127_v49 = vpop.f32.mrf.mxu0  ;;  %v1191_v7 = vpop.f32.mrf.mxu1  ;;  %v1505_v32 = vpack.c.b16 %v1501_v52, %v1500_v40  ;;  %v1363_v40 = vpack.c.bf16 %v1327_v27, %v1327_v27 }
 0x19c   : > { %v1329_v28 = vmul.f32 %v1127_v49, %v370_v10  ;;  %v1337_v29 = vmul.f32 %v1191_v7, %v370_v10  ;;  %v1549_v21 = vunpack.c.l.b16 %v1389_v57  ;;  %v1371_v10 = vpack.c.bf16 %v1335_v36, %v1335_v36 }
 0x19d   : > { %v1519_v26 = vsel %vm3223_vm14, %v1505_v32, 0  ;;  %v3054_v27 = vpop.eup %1895  ;;  %v1370_v36 = vpack.c.bf16 %v1334_v41, %v1334_v41  ;;  %v1385_v32 = vpack.c.bf16 %v3015_v54, %v3015_v54  ;;  %v1403_v56 = vunpack.c.l.b16 %v1363_v40 }
 0x19e   : > { %v1365_v37 = vpack.c.bf16 %v1329_v28, %v1329_v28  ;;  %v1373_v31 = vpack.c.bf16 %v1337_v29, %v1337_v29  ;;  %1525 = vmatpush.bf16.xpose.msrb.mxu2 %v1519_v26  ;;  %v1553_v3 = vpack.c.b16 %v1549_v21, %v1548_v18  ;;  %v1451_v28 = vunpack.c.l.b16 %v1371_v10 }
 0x19f   : > { %v1516_v18 = vsel %vm3227_vm10, %v1504_v63, 0  ;;  %v1552_v21 = vpack.c.b16 %v1547_v38, %v1546_v45  ;;  %v986_v54 = vmul.f32 %v3048_v6, %v3030_v46  ;;  %v996_v44 = vmul.f32 %v3054_v27, %v3033_v22  ;;  %vm3237_vm10 = vmmov %vm3231_vm3 }
 0x1a0   : > { %v1405_v52 = vunpack.c.l.b16 %v1365_v37  ;;  %v1453_v39 = vunpack.c.l.b16 %v1373_v31  ;;  %v1567_v57 = vsel %vm3224_vm0, %v1553_v3, 0  ;;  %v1402_v26 = vunpack.c.l.b16 %v1362_v0  ;;  %vm3103_vm0 = vmor %vm1021_vm1, %vm1022_vm13 }
 0x1a1   : > { %1573 = vmatpush.bf16.xpose.msrb.mxu3 %v1567_v57  ;;  %v1450_v11 = vunpack.c.l.b16 %v1370_v36  ;;  %v1017_v41 = vmul.f32 %v3044_v24, %v1016_v30  ;;  %v1361_v37 = vpack.c.bf16 %v3000_v12, %v3000_v12  ;;  %v1503_v31 = vpack.c.b16 %v3005_v61, %v2995_v43 }
 0x1a2   : > { %v1409_v49 = vpack.c.b16 %v1405_v52, %v1404_v16  ;;  %v1457_v7 = vpack.c.b16 %v1453_v39, %v1452_v33  ;;  %v1008_v40 = vmul.f32 0.5, %v1007_v50  ;;  %v1545_v10 = vunpack.c.l.b16 %v1385_v32 }
 0x1a3   : > { %v1369_v3 = vpack.c.bf16 %v1333_v51, %v1333_v51  ;;  %v1408_v1 = vpack.c.b16 %v1403_v56, %v1402_v26  ;;  %v1456_v16 = vpack.c.b16 %v1451_v28, %v1450_v11  ;;  %v1564_v33 = vsel %vm3228_vm11, %v1552_v21, 0  ;;  %vm3238_vm11 = vmmov %vm3231_vm3 }
 0x1a4   : > { %v1423_v29 = vsel %vm3225_vm4, %v1409_v49, 0  ;;  %v1471_v59 = vsel %vm3226_vm15, %v1457_v7, 0  ;;  %v987_v58 = vmul.f32 %v3048_v6, %v986_v54  ;;  %v997_v52 = vmul.f32 %v3054_v27, %v996_v44 }
 0x1a5   : > { %1429 = vmatpush.bf16.xpose.msrb.mxu0 %v1423_v29  ;;  %1477 = vmatpush.bf16.xpose.msrb.mxu1 %v1471_v59  ;;  %v1360_v39 = vpack.c.bf16 %v2997_v25, %v2997_v25  ;;  %v1544_v0 = vunpack.c.l.b16 %v1384_v9  ;;  %v1368_v12 = vpack.c.bf16 %v3011_v2, %v3011_v2  ;;  %v1018_v43 = vmul.f32 0.5, %v1017_v41 }
 0x1a6   : > { %1526 = vmatpush.bf16.xpose.msrb.mxu2 %v1516_v18  ;;  %v1401_v61 = vunpack.c.l.b16 %v1361_v37  ;;  %v1513_v38 = vsel %vm3229_vm5, %v1503_v31, 0  ;;  %v1009_v63 = vsub.f32 1.5, %v1008_v40  ;;  %v1449_v57 = vunpack.c.l.b16 %v1369_v3  ;;  %vm3239_vm5 = vmmov %vm3231_vm3 }
 0x1a7   : > { %v1420_v36 = vsel %vm3230_vm6, %v1408_v1, 0  ;;  %v1468_v49 = vsel %vm3231_vm3, %v1456_v16, 0  ;;  %v1551_v7 = vpack.c.b16 %v1545_v10, %v1544_v0  ;;  %v988_v25 = vmul.f32 0.5, %v987_v58  ;;  %vm3240_vm8 = vmmov %vm3239_vm5 }
 0x1a8   : > { %v998_v2 = vmul.f32 0.5, %v997_v52  ;;  %v1400_v30 = vunpack.c.l.b16 %v1360_v39  ;;  %v1448_v32 = vunpack.c.l.b16 %v1368_v12  ;;  %v1019_v51 = vsub.f32 1.5, %v1018_v43  ;;  %vm3241_vm9 = vmmov %vm3239_vm5 }
 0x1a9   : > { %1574 = vmatpush.bf16.xpose.msrb.mxu3 %v1564_v33  ;;  %v1010_v45 = vmul.f32 %v3036_v48, %v1009_v63  ;;  %v1561_v23 = vsel %vm3234_vm7, %v1551_v7, 0  ;;  %v989_v29 = vsub.f32 1.5, %v988_v25  ;;  %vm992_vm14 = vweird.f32 %v3048_v6  ;;  %vm3243_vm1 = vmmov %vm3239_vm5 }
 0x1aa   : > { %v1407_v50 = vpack.c.b16 %v1401_v61, %v1400_v30  ;;  %v1455_v56 = vpack.c.b16 %v1449_v57, %v1448_v32  ;;  %v999_v59 = vsub.f32 1.5, %v998_v2  ;;  %v1020_v18 = vmul.f32 %v3044_v24, %v1019_v51  ;;  %vm993_vm6 = vmor %vm991_vm2, %vm992_vm14 }
 0x1ab   : > { %v1014_v21 = vsel %vm3090_vm12, %v3036_v48, %v1010_v45  ;;  %vm1001_vm4 = vweird.f32 %v3033_v22  ;;  %vm1002_vm15 = vweird.f32 %v3054_v27  ;;  %v1510_v46 = vsel %vm3239_vm5, %v1502_v20, 0  ;;  %vm3242_vm12 = vmmov %vm3239_vm5 }
 0x1ac   : > { %v1417_v19 = vsel %vm3237_vm10, %v1407_v50, 0  ;;  %v1465_v44 = vsel %vm3238_vm11, %v1455_v56, 0  ;;  %v990_v48 = vmul.f32 %v3048_v6, %v989_v29  ;;  %v1000_v9 = vmul.f32 %v3054_v27, %v999_v59  ;;  %vm1003_vm3 = vmor %vm1001_vm4, %vm1002_vm15 }
 0x1ad   : > { %1430 = vmatpush.bf16.xpose.msrb.mxu0 %v1420_v36  ;;  %1478 = vmatpush.bf16.xpose.msrb.mxu1 %v1468_v49  ;;  %v1027_v22 = vmul.f32 %v1014_v21, %v2958_v55  ;;  %v1024_v26 = vsel %vm3103_vm0, %v3044_v24, %v1020_v18  ;;  %v1558_v15 = vsel %vm3240_vm8, %v1550_v53, 0  ;;  %v1414_v55 = vsel %vm3241_vm9, %v1406_v35, 0  ;;  %vm3244_vm13 = vmmov %vm3243_vm1 }
 0x1ae   : > { %1527 = vmatpush.bf16.xpose.msrb.mxu2 %v1513_v38  ;;  %v1028_v60 = vmul.f32 %v1024_v26, %v2969_v17  ;;  %v994_v20 = vsel %vm993_vm6, %v3048_v6, %v990_v48  ;;  %v1004_v11 = vsel %vm1003_vm3, %v3054_v27, %v1000_v9  ;;  %v1462_v62 = vsel %vm3242_vm12, %v1454_v34, 0  ;;  %vm3245_vm7 = vmmov %vm3243_vm1 }
 0x1af   : > { %v1356_v41 = vpack.c.bf16 %v1027_v22, %v1027_v22  ;;  %v1025_v8 = vmul.f32 %v994_v20, %v2974_v5  ;;  %v1026_v53 = vmul.f32 %v1004_v11, %v2976_v13  ;;  %vm3246_vm2 = vmmov %vm3243_vm1 }
 0x1b0   : > { %v1357_v17 = vpack.c.bf16 %v1028_v60, %v1028_v60  ;;  %vm3247_vm14 = vmmov %vm3243_vm1 }
 0x1b1   : > { %1575 = vmatpush.bf16.xpose.msrb.mxu3 %v1561_v23  ;;  %v1354_v24 = vpack.c.bf16 %v1025_v8, %v1025_v8  ;;  %v1355_v6 = vpack.c.bf16 %v1026_v53, %v1026_v53  ;;  %vm3248_vm0 = vmmov %vm3243_vm1 }
 0x1b2   : > { %vm3249_vm4 = vmmov %vm3248_vm0 }
 0x1b3   : > { %vm3250_vm15 = vmmov %vm3248_vm0 }
 0x1b5   : > { %1431 = vmatpush.bf16.xpose.msrb.mxu0 %v1417_v19  ;;  %1479 = vmatpush.bf16.xpose.msrb.mxu1 %v1465_v44 }
 0x1b6   : > { %1528 = vmatpush.bf16.xpose.msrb.mxu2 %v1510_v46 }
 0x1b9   : > { %1576 = vmatpush.bf16.xpose.msrb.mxu3 %v1558_v15 }
 0x1bd   : > { %1432 = vmatpush.bf16.xpose.msrb.mxu0 %v1414_v55  ;;  %1480 = vmatpush.bf16.xpose.msrb.mxu1 %v1462_v62 }
 0x1be   : > { %1772 = vmatmul.msk.bf16.vlgmr.msrb.gmra.mxu2 %vm3243_vm1, %v1356_v41 }
 0x1c0   : > { %1773 = vmatmul.msk.bf16.vlgmr.msrb.gmra.mxu3 %vm3244_vm13, %v1357_v17 }
 0x1c4   : > { %1770 = vmatmul.msk.bf16.vlgmr.msrb.gmra.mxu0 %vm3245_vm7, %v1354_v24  ;;  %1771 = vmatmul.msk.bf16.vlgmr.msrb.gmra.mxu1 %vm3246_vm2, %v1355_v6 }
 0x241   : > { %v1434_v42 = vpop.f32.mrf.mxu0  ;;  %v1482_v14 = vpop.f32.mrf.mxu1 }
 0x242   : > { %1582 = vst.msk [vmem:[%s321_s24] sm:$0xff] %vm3247_vm14, %v1434_v42  ;;  %v1530_v35 = vpop.f32.mrf.mxu2 }
 0x243   : > { %1583 = vst.msk [vmem:[%s321_s24 + $0x8] sm:$0xff] %vm3248_vm0, %v1482_v14  ;;  %v1578_v47 = vpop.f32.mrf.mxu3 }
 0x244   : > { %1584 = vst.msk [vmem:[%s321_s24 + $0x10] sm:$0xff] %vm3249_vm4, %v1530_v35 }
 0x245   : > { %1585 = vst.msk [vmem:[%s321_s24 + $0x18] sm:$0xff] %vm3250_vm15, %v1578_v47 }
 0x249   : > { %v1436_v4 = vpop.f32.mrf.mxu0  ;;  %v1484_v34 = vpop.f32.mrf.mxu1 }
 0x24a   : > { %v1532_v5 = vpop.f32.mrf.mxu2 }
 0x24b   : > { %v1580_v13 = vpop.f32.mrf.mxu3 }
 0x24c PF: > { %s14_s19 = sadd.s32 1, %s1950_s19   ;;  %s3251_s15 = smov %s1942_s17 }
 0x24d   : > { %p11_p7 = scmp.ge.s32.totalorder %s14_s19, 10   ;;  %s3252_s16 = smov %s1946_s18 }
 0x24e   : > { %s3253_s17 = smov %s3256_s20  ;;  %s3254_s18 = smov %s3260_s21 }
 0x24f   :  { %13 = sbr.rel (!%p11_p7) target bundleno = 3 (0x3), region = 75 }

</bundles_post_ra>
